<compile_context>
chip_gen: v7x
topology: tpu7x:2x2x1
jax: 0.10.0
libtpu: 0.0.40
codegen_flags: <defaults>
</compile_context>

<pallas_src>
import functools

import jax
import jax.numpy as jnp
from jax.experimental import pallas as pl
from jax.experimental.pallas import tpu as pltpu


# ---------------------------------------------------------------------------
# In-kernel helpers (trace-time Python; all shapes/kernel sizes are static)
# ---------------------------------------------------------------------------
def _conv_circular_rows(rows, H, W, w_mat, b_row, kh, kw, relu):
    """Stride-1 circular conv on a (H*W, Cin) activation matrix -> (H*W, Cout).

    Spatial structure is recovered with a retiling reshape (W is a multiple of
    8 so the layout is unchanged); circular padding uses sublane-tile-aligned
    concatenates, and each tap is a static slice feeding a small MXU matmul
    accumulated in fp32.
    """
    cin = rows.shape[1]

    if kh == 1 and kw == 1:
        acc = jnp.dot(rows, w_mat, preferred_element_type=jnp.float32)
    else:
        ph, pw = (kh - 1) // 2, (kw - 1) // 2
        x = rows.reshape(H, W, cin)              # (H, W, C): W=sublanes, C=lanes
        if ph:                                   # H is a leading (untiled) dim
            x = jnp.concatenate([x[H - ph:], x, x[:ph]], axis=0)
        woff = 0
        if pw:
            # Pad W (the sublane dim) by a full sublane tile (8) per side so the
            # concatenate stays tile-aligned; taps then start at woff + dj.
            x = jnp.concatenate([x[:, W - 8:, :], x, x[:, :8, :]], axis=1)
            woff = 8 - pw
        acc = None
        for di in range(kh):
            for dj in range(kw):
                patch = x[di:di + H, woff + dj:woff + dj + W, :]    # (H, W, Cin)
                wk = w_mat[(di * kw + dj) * cin:(di * kw + dj + 1) * cin, :]
                term = jnp.dot(patch.reshape(H * W, cin), wk,
                               preferred_element_type=jnp.float32)
                acc = term if acc is None else acc + term

    acc = acc + b_row                             # (1, Cout) broadcasts over rows
    return jnp.maximum(acc, 0.0) if relu else acc


def _srcnn_fused_kernel(x_ref, w1_ref, b1_ref, w2_ref, b2_ref, w3_ref, b3_ref,
                        o_ref, *, H, W, kernel_sizes):
    # Input block is lane-dense (1, Cin, H*W); transpose to activation rows
    # (H*W, Cin) in-kernel (a couple of vregs on the XLU).
    rows = x_ref[0].T.astype(jnp.float32)
    (k1h, k1w), (k2h, k2w), (k3h, k3w) = kernel_sizes
    a = _conv_circular_rows(rows, H, W, w1_ref[...], b1_ref[...], k1h, k1w, True)
    a = _conv_circular_rows(a,    H, W, w2_ref[...], b2_ref[...], k2h, k2w, True)
    a = _conv_circular_rows(a,    H, W, w3_ref[...], b3_ref[...], k3h, k3w, False)
    # Lane-dense, NCHW-flat store: (H*W, Cout) -> (1, Cout, H*W); last dim = 256.
    o_ref[...] = a.T[None].astype(o_ref.dtype)


# ---------------------------------------------------------------------------
# Wrapper: single fused pallas_call over the batch axis
# ---------------------------------------------------------------------------
def srcnn_block(x_nchw, params, kernel_sizes, strides):
    N, C, H, W = x_nchw.shape
    for (kh, kw), (sh, sw) in zip(kernel_sizes, strides):
        assert kh % 2 == 1 and kw % 2 == 1, "kernel_size should be odd"
        assert (W - kw) % sw == 0 and (H - kh) % sh == 0, \
            "(dim-kernel_size) should be divisible by stride"
        # TODO(synk): fused kernel implements the stride-1 path only (module
        # config under test uses stride 1 everywhere).
        assert sh == 1 and sw == 1, "fused Pallas kernel supports stride 1"
        assert (kw - 1) // 2 <= 8 and (kh - 1) // 2 <= H
    assert W % 8 == 0 and W >= 8, "W must be a multiple of 8 for in-kernel padding"

    # NCHW -> (N, C, H*W): free reshape, lane-dense (last dim = H*W).
    x_flat = x_nchw.reshape(N, C, H * W).astype(jnp.float32)

    # Weights as im2col matrices; flatten order (ki, kj, cin) == HWIO reshape.
    w_mats, b_rows = [], []
    for i in (1, 2, 3):
        w = params[f"w{i}"]                                   # (Cout, Cin, kh, kw)
        cout, cin, kh, kw = w.shape
        w_mats.append(jnp.transpose(w, (2, 3, 1, 0))
                      .reshape(kh * kw * cin, cout).astype(jnp.float32))
        b_rows.append(params[f"b{i}"].reshape(1, cout).astype(jnp.float32))
    cout_final = params["w3"].shape[0]

    kern = functools.partial(
        _srcnn_fused_kernel, H=H, W=W,
        kernel_sizes=tuple((int(a), int(b)) for a, b in kernel_sizes))

    out = pl.pallas_call(
        kern,
        out_shape=jax.ShapeDtypeStruct((N, cout_final, H * W), jnp.float32),
        grid_spec=pltpu.PrefetchScalarGridSpec(
            num_scalar_prefetch=0,
            grid=(N,),
            in_specs=[
                pl.BlockSpec((1, C, H * W), lambda n: (n, 0, 0)),   # one image
                pl.BlockSpec(w_mats[0].shape, lambda n: (0, 0)),    # resident
                pl.BlockSpec(b_rows[0].shape, lambda n: (0, 0)),
                pl.BlockSpec(w_mats[1].shape, lambda n: (0, 0)),
                pl.BlockSpec(b_rows[1].shape, lambda n: (0, 0)),
                pl.BlockSpec(w_mats[2].shape, lambda n: (0, 0)),
                pl.BlockSpec(b_rows[2].shape, lambda n: (0, 0)),
            ],
            out_specs=pl.BlockSpec((1, cout_final, H * W), lambda n: (n, 0, 0)),
        ),
        compiler_params=pltpu.CompilerParams(
            dimension_semantics=("parallel",)),
    )(x_flat, w_mats[0], b_rows[0], w_mats[1], b_rows[1], w_mats[2], b_rows[2])

    return out.reshape(N, cout_final, H, W)                   # NCHW (free reshape)


# ---------------------------------------------------------------------------
# Parameter init (matches PyTorch Conv2d default init ranges)
# ---------------------------------------------------------------------------
def init_params(key, c, c_expand, kernel_sizes):
    dw = c * c_expand
    shapes = [
        (dw, c, kernel_sizes[0][0], kernel_sizes[0][1]),
        (dw // 2, dw, kernel_sizes[1][0], kernel_sizes[1][1]),
        (c, dw // 2, kernel_sizes[2][0], kernel_sizes[2][1]),
    ]
    params = {}
    for n, shape in enumerate(shapes, 1):
        key, k1, k2 = jax.random.split(key, 3)
        fan_in = shape[1] * shape[2] * shape[3]
        bound = 1.0 / float(fan_in) ** 0.5
        params[f"w{n}"] = jax.random.uniform(k1, shape, jnp.float32, -bound, bound)
        params[f"b{n}"] = jax.random.uniform(k2, (shape[0],), jnp.float32, -bound, bound)
    return params


# ---------------------------------------------------------------------------
# Pure-JAX reference (correctness check only)
# ---------------------------------------------------------------------------
def _circular_pad_ref(x_nhwc, kh, kw, sh, sw):
    _, H, W, _ = x_nhwc.shape
    pwd = int((W - 1 - (W - kw) // sw) // 2)
    pht = int((H - 1 - (H - kh) // sh) // 2)
    return jnp.pad(x_nhwc, ((0, 0), (pht, pht), (pwd, pwd), (0, 0)), mode="wrap")


def _ref_conv(x_nhwc, w_oihw, b, stride, relu):
    kh, kw = w_oihw.shape[2], w_oihw.shape[3]
    xp = _circular_pad_ref(x_nhwc, kh, kw, *stride)
    out = jax.lax.conv_general_dilated(
        xp, jnp.transpose(w_oihw, (2, 3, 1, 0)),
        window_strides=stride, padding="VALID",
        dimension_numbers=("NHWC", "HWIO", "NHWC"))
    out = out + b
    return jnp.maximum(out, 0.0) if relu else out


def _ref_block(x_nchw, params, strides):
    x = jnp.transpose(x_nchw, (0, 2, 3, 1))
    x = _ref_conv(x, params["w1"], params["b1"], strides[0], True)
    x = _ref_conv(x, params["w2"], params["b2"], strides[1], True)
    x = _ref_conv(x, params["w3"], params["b3"], strides[2], False)
    return jnp.transpose(x, (0, 3, 1, 2))


if __name__ == "__main__":
    # Small, SRCNN-consistent config: c=4, c_expand=8 (dw=32), classic odd
    # kernels, stride 1 everywhere. Input is NCHW like the PyTorch module.
    c, c_expand = 4, 8
    kernel_sizes = [(3, 3), (1, 1), (3, 3)]
    strides = [(1, 1), (1, 1), (1, 1)]

    key = jax.random.PRNGKey(0)
    key, xkey = jax.random.split(key)
    x = jax.random.normal(xkey, (2, c, 16, 16), jnp.float32)
    params = init_params(key, c, c_expand, kernel_sizes)

    fwd = jax.jit(functools.partial(srcnn_block,
                                    kernel_sizes=kernel_sizes, strides=strides))
    out = jax.block_until_ready(fwd(x, params))

    ref = jax.block_until_ready(_ref_block(x, params, strides))
    assert out.shape == (2, c, 16, 16)
    assert jnp.allclose(out, ref, atol=1e-4, rtol=1e-4), "mismatch vs JAX reference"

    print("KERNEL_OK")
</pallas_src>

<mosaic_0001>
module attributes {stable_mosaic.version = 11 : i64} {
  func.func @_srcnn_fused_kernel(%arg0: i32, %arg1: memref<1x4x256xf32, #tpu.memory_space<vmem>>, %arg2: memref<36x32xf32, #tpu.memory_space<vmem>>, %arg3: memref<1x32xf32, #tpu.memory_space<vmem>>, %arg4: memref<32x16xf32, #tpu.memory_space<vmem>>, %arg5: memref<1x16xf32, #tpu.memory_space<vmem>>, %arg6: memref<144x4xf32, #tpu.memory_space<vmem>>, %arg7: memref<1x4xf32, #tpu.memory_space<vmem>>, %arg8: memref<1x4x256xf32, #tpu.memory_space<vmem>>) attributes {dimension_semantics = [#tpu.dimension_semantics<parallel>], iteration_bounds = array<i64: 2>, scalar_prefetch = 0 : i64, scratch_operands = 0 : i64, tpu.core_type = #tpu.core_type<tc>, window_params = [{transform_indices = @transform_0, window_bounds = array<i64: 1, 4, 256>}, {pipeline_mode = #tpu.pipeline_mode<synchronous>, transform_indices = @transform_1, window_bounds = array<i64: 36, 32>}, {pipeline_mode = #tpu.pipeline_mode<synchronous>, transform_indices = @transform_2, window_bounds = array<i64: 1, 32>}, {pipeline_mode = #tpu.pipeline_mode<synchronous>, transform_indices = @transform_3, window_bounds = array<i64: 32, 16>}, {pipeline_mode = #tpu.pipeline_mode<synchronous>, transform_indices = @transform_4, window_bounds = array<i64: 1, 16>}, {pipeline_mode = #tpu.pipeline_mode<synchronous>, transform_indices = @transform_5, window_bounds = array<i64: 144, 4>}, {pipeline_mode = #tpu.pipeline_mode<synchronous>, transform_indices = @transform_6, window_bounds = array<i64: 1, 4>}, {transform_indices = @transform_7, window_bounds = array<i64: 1, 4, 256>}]} {
    %c0 = arith.constant 0 : index
    %c0_0 = arith.constant 0 : index
    %c0_1 = arith.constant 0 : index
    %0 = vector.load %arg1[%c0, %c0_0, %c0_1] : memref<1x4x256xf32, #tpu.memory_space<vmem>>, vector<1x4x256xf32>
    %1 = vector.shape_cast %0 : vector<1x4x256xf32> to vector<4x256xf32>
    %2 = tpu.transpose %1, [1, 0] : vector<4x256xf32> -> vector<256x4xf32>
    %c0_2 = arith.constant 0 : index
    %c0_3 = arith.constant 0 : index
    %3 = vector.load %arg2[%c0_2, %c0_3] : memref<36x32xf32, #tpu.memory_space<vmem>>, vector<36x32xf32>
    %c0_4 = arith.constant 0 : index
    %c0_5 = arith.constant 0 : index
    %4 = vector.load %arg3[%c0_4, %c0_5] : memref<1x32xf32, #tpu.memory_space<vmem>>, vector<1x32xf32>
    %5 = vector.shape_cast %2 : vector<256x4xf32> to vector<16x16x4xf32>
    %6 = vector.extract_strided_slice %5 {offsets = [15, 0, 0], sizes = [1, 16, 4], strides = [1, 1, 1]} : vector<16x16x4xf32> to vector<1x16x4xf32>
    %7 = vector.extract_strided_slice %5 {offsets = [0, 0, 0], sizes = [1, 16, 4], strides = [1, 1, 1]} : vector<16x16x4xf32> to vector<1x16x4xf32>
    %8 = tpu.concatenate %6, %5, %7 in 0 : vector<1x16x4xf32>, vector<16x16x4xf32>, vector<1x16x4xf32> -> vector<18x16x4xf32>
    %9 = vector.extract_strided_slice %8 {offsets = [0, 8, 0], sizes = [18, 8, 4], strides = [1, 1, 1]} : vector<18x16x4xf32> to vector<18x8x4xf32>
    %10 = vector.extract_strided_slice %8 {offsets = [0, 0, 0], sizes = [18, 8, 4], strides = [1, 1, 1]} : vector<18x16x4xf32> to vector<18x8x4xf32>
    %11 = tpu.concatenate %9, %8, %10 in 1 : vector<18x8x4xf32>, vector<18x16x4xf32>, vector<18x8x4xf32> -> vector<18x32x4xf32>
    %12 = vector.extract_strided_slice %11 {offsets = [0, 7, 0], sizes = [16, 16, 4], strides = [1, 1, 1]} : vector<18x32x4xf32> to vector<16x16x4xf32>
    %13 = vector.extract_strided_slice %3 {offsets = [0, 0], sizes = [4, 32], strides = [1, 1]} : vector<36x32xf32> to vector<4x32xf32>
    %14 = vector.shape_cast %12 : vector<16x16x4xf32> to vector<256x4xf32>
    %cst = arith.constant dense<0.000000e+00> : vector<256x32xf32>
    %15 = tpu.matmul %14, %13, %cst {dimension_numbers = #tpu.dot_dimension_numbers<[1], [0], [0], [1], [0, 0, 1, 1], [], []>} : vector<256x4xf32>, vector<4x32xf32>, vector<256x32xf32> -> vector<256x32xf32>
    %16 = vector.extract_strided_slice %11 {offsets = [0, 8, 0], sizes = [16, 16, 4], strides = [1, 1, 1]} : vector<18x32x4xf32> to vector<16x16x4xf32>
    %17 = vector.extract_strided_slice %3 {offsets = [4, 0], sizes = [4, 32], strides = [1, 1]} : vector<36x32xf32> to vector<4x32xf32>
    %18 = vector.shape_cast %16 : vector<16x16x4xf32> to vector<256x4xf32>
    %cst_6 = arith.constant dense<0.000000e+00> : vector<256x32xf32>
    %19 = tpu.matmul %18, %17, %cst_6 {dimension_numbers = #tpu.dot_dimension_numbers<[1], [0], [0], [1], [0, 0, 1, 1], [], []>} : vector<256x4xf32>, vector<4x32xf32>, vector<256x32xf32> -> vector<256x32xf32>
    %20 = arith.addf %15, %19 : vector<256x32xf32>
    %21 = vector.extract_strided_slice %11 {offsets = [0, 9, 0], sizes = [16, 16, 4], strides = [1, 1, 1]} : vector<18x32x4xf32> to vector<16x16x4xf32>
    %22 = vector.extract_strided_slice %3 {offsets = [8, 0], sizes = [4, 32], strides = [1, 1]} : vector<36x32xf32> to vector<4x32xf32>
    %23 = vector.shape_cast %21 : vector<16x16x4xf32> to vector<256x4xf32>
    %cst_7 = arith.constant dense<0.000000e+00> : vector<256x32xf32>
    %24 = tpu.matmul %23, %22, %cst_7 {dimension_numbers = #tpu.dot_dimension_numbers<[1], [0], [0], [1], [0, 0, 1, 1], [], []>} : vector<256x4xf32>, vector<4x32xf32>, vector<256x32xf32> -> vector<256x32xf32>
    %25 = arith.addf %20, %24 : vector<256x32xf32>
    %26 = vector.extract_strided_slice %11 {offsets = [1, 7, 0], sizes = [16, 16, 4], strides = [1, 1, 1]} : vector<18x32x4xf32> to vector<16x16x4xf32>
    %27 = vector.extract_strided_slice %3 {offsets = [12, 0], sizes = [4, 32], strides = [1, 1]} : vector<36x32xf32> to vector<4x32xf32>
    %28 = vector.shape_cast %26 : vector<16x16x4xf32> to vector<256x4xf32>
    %cst_8 = arith.constant dense<0.000000e+00> : vector<256x32xf32>
    %29 = tpu.matmul %28, %27, %cst_8 {dimension_numbers = #tpu.dot_dimension_numbers<[1], [0], [0], [1], [0, 0, 1, 1], [], []>} : vector<256x4xf32>, vector<4x32xf32>, vector<256x32xf32> -> vector<256x32xf32>
    %30 = arith.addf %25, %29 : vector<256x32xf32>
    %31 = vector.extract_strided_slice %11 {offsets = [1, 8, 0], sizes = [16, 16, 4], strides = [1, 1, 1]} : vector<18x32x4xf32> to vector<16x16x4xf32>
    %32 = vector.extract_strided_slice %3 {offsets = [16, 0], sizes = [4, 32], strides = [1, 1]} : vector<36x32xf32> to vector<4x32xf32>
    %33 = vector.shape_cast %31 : vector<16x16x4xf32> to vector<256x4xf32>
    %cst_9 = arith.constant dense<0.000000e+00> : vector<256x32xf32>
    %34 = tpu.matmul %33, %32, %cst_9 {dimension_numbers = #tpu.dot_dimension_numbers<[1], [0], [0], [1], [0, 0, 1, 1], [], []>} : vector<256x4xf32>, vector<4x32xf32>, vector<256x32xf32> -> vector<256x32xf32>
    %35 = arith.addf %30, %34 : vector<256x32xf32>
    %36 = vector.extract_strided_slice %11 {offsets = [1, 9, 0], sizes = [16, 16, 4], strides = [1, 1, 1]} : vector<18x32x4xf32> to vector<16x16x4xf32>
    %37 = vector.extract_strided_slice %3 {offsets = [20, 0], sizes = [4, 32], strides = [1, 1]} : vector<36x32xf32> to vector<4x32xf32>
    %38 = vector.shape_cast %36 : vector<16x16x4xf32> to vector<256x4xf32>
    %cst_10 = arith.constant dense<0.000000e+00> : vector<256x32xf32>
    %39 = tpu.matmul %38, %37, %cst_10 {dimension_numbers = #tpu.dot_dimension_numbers<[1], [0], [0], [1], [0, 0, 1, 1], [], []>} : vector<256x4xf32>, vector<4x32xf32>, vector<256x32xf32> -> vector<256x32xf32>
    %40 = arith.addf %35, %39 : vector<256x32xf32>
    %41 = vector.extract_strided_slice %11 {offsets = [2, 7, 0], sizes = [16, 16, 4], strides = [1, 1, 1]} : vector<18x32x4xf32> to vector<16x16x4xf32>
    %42 = vector.extract_strided_slice %3 {offsets = [24, 0], sizes = [4, 32], strides = [1, 1]} : vector<36x32xf32> to vector<4x32xf32>
    %43 = vector.shape_cast %41 : vector<16x16x4xf32> to vector<256x4xf32>
    %cst_11 = arith.constant dense<0.000000e+00> : vector<256x32xf32>
    %44 = tpu.matmul %43, %42, %cst_11 {dimension_numbers = #tpu.dot_dimension_numbers<[1], [0], [0], [1], [0, 0, 1, 1], [], []>} : vector<256x4xf32>, vector<4x32xf32>, vector<256x32xf32> -> vector<256x32xf32>
    %45 = arith.addf %40, %44 : vector<256x32xf32>
    %46 = vector.extract_strided_slice %11 {offsets = [2, 8, 0], sizes = [16, 16, 4], strides = [1, 1, 1]} : vector<18x32x4xf32> to vector<16x16x4xf32>
    %47 = vector.extract_strided_slice %3 {offsets = [28, 0], sizes = [4, 32], strides = [1, 1]} : vector<36x32xf32> to vector<4x32xf32>
    %48 = vector.shape_cast %46 : vector<16x16x4xf32> to vector<256x4xf32>
    %cst_12 = arith.constant dense<0.000000e+00> : vector<256x32xf32>
    %49 = tpu.matmul %48, %47, %cst_12 {dimension_numbers = #tpu.dot_dimension_numbers<[1], [0], [0], [1], [0, 0, 1, 1], [], []>} : vector<256x4xf32>, vector<4x32xf32>, vector<256x32xf32> -> vector<256x32xf32>
    %50 = arith.addf %45, %49 : vector<256x32xf32>
    %51 = vector.extract_strided_slice %11 {offsets = [2, 9, 0], sizes = [16, 16, 4], strides = [1, 1, 1]} : vector<18x32x4xf32> to vector<16x16x4xf32>
    %52 = vector.extract_strided_slice %3 {offsets = [32, 0], sizes = [4, 32], strides = [1, 1]} : vector<36x32xf32> to vector<4x32xf32>
    %53 = vector.shape_cast %51 : vector<16x16x4xf32> to vector<256x4xf32>
    %cst_13 = arith.constant dense<0.000000e+00> : vector<256x32xf32>
    %54 = tpu.matmul %53, %52, %cst_13 {dimension_numbers = #tpu.dot_dimension_numbers<[1], [0], [0], [1], [0, 0, 1, 1], [], []>} : vector<256x4xf32>, vector<4x32xf32>, vector<256x32xf32> -> vector<256x32xf32>
    %55 = arith.addf %50, %54 : vector<256x32xf32>
    %56 = vector.broadcast %4 : vector<1x32xf32> to vector<256x32xf32>
    %57 = arith.addf %55, %56 : vector<256x32xf32>
    %cst_14 = arith.constant 0.000000e+00 : f32
    %58 = vector.broadcast %cst_14 : f32 to vector<256x32xf32>
    %59 = arith.maximumf %57, %58 : vector<256x32xf32>
    %c0_15 = arith.constant 0 : index
    %c0_16 = arith.constant 0 : index
    %60 = vector.load %arg4[%c0_15, %c0_16] : memref<32x16xf32, #tpu.memory_space<vmem>>, vector<32x16xf32>
    %c0_17 = arith.constant 0 : index
    %c0_18 = arith.constant 0 : index
    %61 = vector.load %arg5[%c0_17, %c0_18] : memref<1x16xf32, #tpu.memory_space<vmem>>, vector<1x16xf32>
    %cst_19 = arith.constant dense<0.000000e+00> : vector<256x16xf32>
    %62 = tpu.matmul %59, %60, %cst_19 {dimension_numbers = #tpu.dot_dimension_numbers<[1], [0], [0], [1], [0, 0, 1, 1], [], []>} : vector<256x32xf32>, vector<32x16xf32>, vector<256x16xf32> -> vector<256x16xf32>
    %63 = vector.broadcast %61 : vector<1x16xf32> to vector<256x16xf32>
    %64 = arith.addf %62, %63 : vector<256x16xf32>
    %cst_20 = arith.constant 0.000000e+00 : f32
    %65 = vector.broadcast %cst_20 : f32 to vector<256x16xf32>
    %66 = arith.maximumf %64, %65 : vector<256x16xf32>
    %c0_21 = arith.constant 0 : index
    %c0_22 = arith.constant 0 : index
    %67 = vector.load %arg6[%c0_21, %c0_22] : memref<144x4xf32, #tpu.memory_space<vmem>>, vector<144x4xf32>
    %c0_23 = arith.constant 0 : index
    %c0_24 = arith.constant 0 : index
    %68 = vector.load %arg7[%c0_23, %c0_24] : memref<1x4xf32, #tpu.memory_space<vmem>>, vector<1x4xf32>
    %69 = vector.shape_cast %66 : vector<256x16xf32> to vector<16x16x16xf32>
    %70 = vector.extract_strided_slice %69 {offsets = [15, 0, 0], sizes = [1, 16, 16], strides = [1, 1, 1]} : vector<16x16x16xf32> to vector<1x16x16xf32>
    %71 = vector.extract_strided_slice %69 {offsets = [0, 0, 0], sizes = [1, 16, 16], strides = [1, 1, 1]} : vector<16x16x16xf32> to vector<1x16x16xf32>
    %72 = tpu.concatenate %70, %69, %71 in 0 : vector<1x16x16xf32>, vector<16x16x16xf32>, vector<1x16x16xf32> -> vector<18x16x16xf32>
    %73 = vector.extract_strided_slice %72 {offsets = [0, 8, 0], sizes = [18, 8, 16], strides = [1, 1, 1]} : vector<18x16x16xf32> to vector<18x8x16xf32>
    %74 = vector.extract_strided_slice %72 {offsets = [0, 0, 0], sizes = [18, 8, 16], strides = [1, 1, 1]} : vector<18x16x16xf32> to vector<18x8x16xf32>
    %75 = tpu.concatenate %73, %72, %74 in 1 : vector<18x8x16xf32>, vector<18x16x16xf32>, vector<18x8x16xf32> -> vector<18x32x16xf32>
    %76 = vector.extract_strided_slice %75 {offsets = [0, 7, 0], sizes = [16, 16, 16], strides = [1, 1, 1]} : vector<18x32x16xf32> to vector<16x16x16xf32>
    %77 = vector.extract_strided_slice %67 {offsets = [0, 0], sizes = [16, 4], strides = [1, 1]} : vector<144x4xf32> to vector<16x4xf32>
    %78 = vector.shape_cast %76 : vector<16x16x16xf32> to vector<256x16xf32>
    %cst_25 = arith.constant dense<0.000000e+00> : vector<256x4xf32>
    %79 = tpu.matmul %78, %77, %cst_25 {dimension_numbers = #tpu.dot_dimension_numbers<[1], [0], [0], [1], [0, 0, 1, 1], [], []>} : vector<256x16xf32>, vector<16x4xf32>, vector<256x4xf32> -> vector<256x4xf32>
    %80 = vector.extract_strided_slice %75 {offsets = [0, 8, 0], sizes = [16, 16, 16], strides = [1, 1, 1]} : vector<18x32x16xf32> to vector<16x16x16xf32>
    %81 = vector.extract_strided_slice %67 {offsets = [16, 0], sizes = [16, 4], strides = [1, 1]} : vector<144x4xf32> to vector<16x4xf32>
    %82 = vector.shape_cast %80 : vector<16x16x16xf32> to vector<256x16xf32>
    %cst_26 = arith.constant dense<0.000000e+00> : vector<256x4xf32>
    %83 = tpu.matmul %82, %81, %cst_26 {dimension_numbers = #tpu.dot_dimension_numbers<[1], [0], [0], [1], [0, 0, 1, 1], [], []>} : vector<256x16xf32>, vector<16x4xf32>, vector<256x4xf32> -> vector<256x4xf32>
    %84 = arith.addf %79, %83 : vector<256x4xf32>
    %85 = vector.extract_strided_slice %75 {offsets = [0, 9, 0], sizes = [16, 16, 16], strides = [1, 1, 1]} : vector<18x32x16xf32> to vector<16x16x16xf32>
    %86 = vector.extract_strided_slice %67 {offsets = [32, 0], sizes = [16, 4], strides = [1, 1]} : vector<144x4xf32> to vector<16x4xf32>
    %87 = vector.shape_cast %85 : vector<16x16x16xf32> to vector<256x16xf32>
    %cst_27 = arith.constant dense<0.000000e+00> : vector<256x4xf32>
    %88 = tpu.matmul %87, %86, %cst_27 {dimension_numbers = #tpu.dot_dimension_numbers<[1], [0], [0], [1], [0, 0, 1, 1], [], []>} : vector<256x16xf32>, vector<16x4xf32>, vector<256x4xf32> -> vector<256x4xf32>
    %89 = arith.addf %84, %88 : vector<256x4xf32>
    %90 = vector.extract_strided_slice %75 {offsets = [1, 7, 0], sizes = [16, 16, 16], strides = [1, 1, 1]} : vector<18x32x16xf32> to vector<16x16x16xf32>
    %91 = vector.extract_strided_slice %67 {offsets = [48, 0], sizes = [16, 4], strides = [1, 1]} : vector<144x4xf32> to vector<16x4xf32>
    %92 = vector.shape_cast %90 : vector<16x16x16xf32> to vector<256x16xf32>
    %cst_28 = arith.constant dense<0.000000e+00> : vector<256x4xf32>
    %93 = tpu.matmul %92, %91, %cst_28 {dimension_numbers = #tpu.dot_dimension_numbers<[1], [0], [0], [1], [0, 0, 1, 1], [], []>} : vector<256x16xf32>, vector<16x4xf32>, vector<256x4xf32> -> vector<256x4xf32>
    %94 = arith.addf %89, %93 : vector<256x4xf32>
    %95 = vector.extract_strided_slice %75 {offsets = [1, 8, 0], sizes = [16, 16, 16], strides = [1, 1, 1]} : vector<18x32x16xf32> to vector<16x16x16xf32>
    %96 = vector.extract_strided_slice %67 {offsets = [64, 0], sizes = [16, 4], strides = [1, 1]} : vector<144x4xf32> to vector<16x4xf32>
    %97 = vector.shape_cast %95 : vector<16x16x16xf32> to vector<256x16xf32>
    %cst_29 = arith.constant dense<0.000000e+00> : vector<256x4xf32>
    %98 = tpu.matmul %97, %96, %cst_29 {dimension_numbers = #tpu.dot_dimension_numbers<[1], [0], [0], [1], [0, 0, 1, 1], [], []>} : vector<256x16xf32>, vector<16x4xf32>, vector<256x4xf32> -> vector<256x4xf32>
    %99 = arith.addf %94, %98 : vector<256x4xf32>
    %100 = vector.extract_strided_slice %75 {offsets = [1, 9, 0], sizes = [16, 16, 16], strides = [1, 1, 1]} : vector<18x32x16xf32> to vector<16x16x16xf32>
    %101 = vector.extract_strided_slice %67 {offsets = [80, 0], sizes = [16, 4], strides = [1, 1]} : vector<144x4xf32> to vector<16x4xf32>
    %102 = vector.shape_cast %100 : vector<16x16x16xf32> to vector<256x16xf32>
    %cst_30 = arith.constant dense<0.000000e+00> : vector<256x4xf32>
    %103 = tpu.matmul %102, %101, %cst_30 {dimension_numbers = #tpu.dot_dimension_numbers<[1], [0], [0], [1], [0, 0, 1, 1], [], []>} : vector<256x16xf32>, vector<16x4xf32>, vector<256x4xf32> -> vector<256x4xf32>
    %104 = arith.addf %99, %103 : vector<256x4xf32>
    %105 = vector.extract_strided_slice %75 {offsets = [2, 7, 0], sizes = [16, 16, 16], strides = [1, 1, 1]} : vector<18x32x16xf32> to vector<16x16x16xf32>
    %106 = vector.extract_strided_slice %67 {offsets = [96, 0], sizes = [16, 4], strides = [1, 1]} : vector<144x4xf32> to vector<16x4xf32>
    %107 = vector.shape_cast %105 : vector<16x16x16xf32> to vector<256x16xf32>
    %cst_31 = arith.constant dense<0.000000e+00> : vector<256x4xf32>
    %108 = tpu.matmul %107, %106, %cst_31 {dimension_numbers = #tpu.dot_dimension_numbers<[1], [0], [0], [1], [0, 0, 1, 1], [], []>} : vector<256x16xf32>, vector<16x4xf32>, vector<256x4xf32> -> vector<256x4xf32>
    %109 = arith.addf %104, %108 : vector<256x4xf32>
    %110 = vector.extract_strided_slice %75 {offsets = [2, 8, 0], sizes = [16, 16, 16], strides = [1, 1, 1]} : vector<18x32x16xf32> to vector<16x16x16xf32>
    %111 = vector.extract_strided_slice %67 {offsets = [112, 0], sizes = [16, 4], strides = [1, 1]} : vector<144x4xf32> to vector<16x4xf32>
    %112 = vector.shape_cast %110 : vector<16x16x16xf32> to vector<256x16xf32>
    %cst_32 = arith.constant dense<0.000000e+00> : vector<256x4xf32>
    %113 = tpu.matmul %112, %111, %cst_32 {dimension_numbers = #tpu.dot_dimension_numbers<[1], [0], [0], [1], [0, 0, 1, 1], [], []>} : vector<256x16xf32>, vector<16x4xf32>, vector<256x4xf32> -> vector<256x4xf32>
    %114 = arith.addf %109, %113 : vector<256x4xf32>
    %115 = vector.extract_strided_slice %75 {offsets = [2, 9, 0], sizes = [16, 16, 16], strides = [1, 1, 1]} : vector<18x32x16xf32> to vector<16x16x16xf32>
    %116 = vector.extract_strided_slice %67 {offsets = [128, 0], sizes = [16, 4], strides = [1, 1]} : vector<144x4xf32> to vector<16x4xf32>
    %117 = vector.shape_cast %115 : vector<16x16x16xf32> to vector<256x16xf32>
    %cst_33 = arith.constant dense<0.000000e+00> : vector<256x4xf32>
    %118 = tpu.matmul %117, %116, %cst_33 {dimension_numbers = #tpu.dot_dimension_numbers<[1], [0], [0], [1], [0, 0, 1, 1], [], []>} : vector<256x16xf32>, vector<16x4xf32>, vector<256x4xf32> -> vector<256x4xf32>
    %119 = arith.addf %114, %118 : vector<256x4xf32>
    %120 = vector.broadcast %68 : vector<1x4xf32> to vector<256x4xf32>
    %121 = arith.addf %119, %120 : vector<256x4xf32>
    %122 = tpu.transpose %121, [1, 0] : vector<256x4xf32> -> vector<4x256xf32>
    %123 = vector.shape_cast %122 : vector<4x256xf32> to vector<1x4x256xf32>
    %c0_34 = arith.constant 0 : index
    %c0_35 = arith.constant 0 : index
    %c0_36 = arith.constant 0 : index
    %124 = vector.load %arg8[%c0_34, %c0_35, %c0_36] : memref<1x4x256xf32, #tpu.memory_space<vmem>>, vector<1x4x256xf32>
    tpu.vector_store %arg8[%c0_34, %c0_35, %c0_36], %123 {strides = array<i32>} : memref<1x4x256xf32, #tpu.memory_space<vmem>>, vector<1x4x256xf32>,
    return
  }
  func.func @transform_0(%arg0: i32) -> (i32, i32, i32) {
    %c0_i32 = arith.constant 0 : i32
    %c0_i32_0 = arith.constant 0 : i32
    %c0_i32_1 = arith.constant 0 : i32
    return %arg0, %c0_i32, %c0_i32_0 : i32, i32, i32
  }
  func.func @transform_1(%arg0: i32) -> (i32, i32) {
    %c0_i32 = arith.constant 0 : i32
    %c0_i32_0 = arith.constant 0 : i32
    %c0_i32_1 = arith.constant 0 : i32
    return %c0_i32, %c0_i32_0 : i32, i32
  }
  func.func @transform_2(%arg0: i32) -> (i32, i32) {
    %c0_i32 = arith.constant 0 : i32
    %c0_i32_0 = arith.constant 0 : i32
    %c0_i32_1 = arith.constant 0 : i32
    return %c0_i32, %c0_i32_0 : i32, i32
  }
  func.func @transform_3(%arg0: i32) -> (i32, i32) {
    %c0_i32 = arith.constant 0 : i32
    %c0_i32_0 = arith.constant 0 : i32
    %c0_i32_1 = arith.constant 0 : i32
    return %c0_i32, %c0_i32_0 : i32, i32
  }
  func.func @transform_4(%arg0: i32) -> (i32, i32) {
    %c0_i32 = arith.constant 0 : i32
    %c0_i32_0 = arith.constant 0 : i32
    %c0_i32_1 = arith.constant 0 : i32
    return %c0_i32, %c0_i32_0 : i32, i32
  }
  func.func @transform_5(%arg0: i32) -> (i32, i32) {
    %c0_i32 = arith.constant 0 : i32
    %c0_i32_0 = arith.constant 0 : i32
    %c0_i32_1 = arith.constant 0 : i32
    return %c0_i32, %c0_i32_0 : i32, i32
  }
  func.func @transform_6(%arg0: i32) -> (i32, i32) {
    %c0_i32 = arith.constant 0 : i32
    %c0_i32_0 = arith.constant 0 : i32
    %c0_i32_1 = arith.constant 0 : i32
    return %c0_i32, %c0_i32_0 : i32, i32
  }
  func.func @transform_7(%arg0: i32) -> (i32, i32, i32) {
    %c0_i32 = arith.constant 0 : i32
    %c0_i32_0 = arith.constant 0 : i32
    %c0_i32_1 = arith.constant 0 : i32
    return %arg0, %c0_i32, %c0_i32_0 : i32, i32, i32
  }
}

</mosaic_0001>

<bundles_post_ra>
// kernel: srcnn_block.1
= control target key start
LH: loop header
LB: loop body
LE: loop exit
PB: predicated region body
PF: predicated region fallthrough
CT: control target
= control target key end

     0   :  { %s9067_s24 = smov 0   ;;  %s11213_s0 = inlined_call_operand.vmem [shape: f32[2,4,256], index: 0, kind: input, shape index: {}]   ;;  %s11214_s1 = inlined_call_operand.vmem [shape: f32[36,32], index: 1, kind: input, shape index: {}]   ;;  %s11215_s2 = inlined_call_operand.vmem [shape: f32[1,32], index: 2, kind: input, shape index: {}]   ;;  %s11216_s3 = inlined_call_operand.vmem [shape: f32[32,16], index: 3, kind: input, shape index: {}]   ;;  %s11217_s4 = inlined_call_operand.vmem [shape: f32[1,16], index: 4, kind: input, shape index: {}]   ;;  %s11218_s5 = inlined_call_operand.vmem [shape: f32[144,4], index: 5, kind: input, shape index: {}]   ;;  %s11219_s6 = inlined_call_operand.vmem [shape: f32[1,4], index: 6, kind: input, shape index: {}]   ;;  %s11220_s7 = inlined_call_operand.vmem [shape: f32[2,4,256], index: 7, kind: output, shape index: {}]  }
   0x1 LB: > { %s6203_s25 = sadd.s32 4294967295, %s9025_s24   ;;  %p6207_p0 = scmp.ge.s32.totalorder %s9025_s24, 1  ;;  %s9025_s24 = sphi %s9067_s24, %s17_s24  }
   0x2   : > { %p237_p1 = scmp.lt.s32.totalorder %s9025_s24, 3 }
   0x4   : > { %p238_p2 = pnand %p6207_p0, %p237_p1 }
   0x6   : > { %241 = sbr.rel (%p238_p2) target bundleno = 2173 (0x87d), region = 48 }
   0xd   : > { %p269_p3 = scmp.lt.s32.totalorder %s6203_s25, 1  ;;  %v347_v2 = vld [vmem:[%s11214_s1] sm:$0xff]  ;;  %vm517_vm0 = vcmask 1043456   ;;  %vm452_vm1 = vcmask 31744   ;;  %v9126_v20 = vld [vmem:[%s11214_s1 + $0x8] sm:$0xff]  ;;  %vm385_vm2 = vcmask 1040384  }
   0xe   : > { %v451_v3 = vrot.slane %v347_v2, 4  ;;  %v11221_v41 = vrot.slane %v9126_v20, 4  ;;  %vm1036_vm3 = vcmask 1046528   ;;  %vm3066_vm4 = vcmask 261120  }
   0xf   : > { %s11640_s25 = smov (!%p269_p3, %s6203_s25), 1  ;;  %vm3535_vm5 = vcmask 130048  }
  0x10   : > { %s6834_s26 = sshll.u32 %s11640_s25, 3  ;;  %7475 = vmatprep.subr.msk.mxu0 %vm517_vm0, %v451_v3 }
  0x11   : > { %s273_s29 = scalar_lea.vmem %s11213_s0, %s6834_s26  ;;  %7476 = vmatpush3.msk.msra.mxu0 %vm517_vm0, %v451_v3  ;;  %s278_s9 = scalar_lea.vmem %s11220_s7, %s6834_s26 }
  0x12   : > { %v279_v0 = vld [vmem:[%s273_s29] sm:$0xff]  ;;  %7525 = vmatprep.subr.msk.mxu0 %vm517_vm0, %v347_v2 }
  0x13   : > { %v281_v1 = vcombine.high %v279_v0, %v279_v0 }
  0x15   : > { %315 = vxpose.xlu0.b32.start.end [1/1] (short) %v281_v1, 128 }
  0x52   : > { %283 = vxpose.xlu0.b32.start.end [1/1] (short) %v279_v0, 128 }
  0x95   : > { %v9089_v4 = vpop.trf.xlu0 }
  0x99   : > { %v9091_v5 = vpop.trf.xlu0 }
  0x9d   : > { %v9093_v6 = vpop.trf.xlu0 }
  0xa1   : > { %v9095_v7 = vpop.trf.xlu0 }
  0xa5   : > { %v9097_v8 = vpop.trf.xlu0 }
  0xa9   : > { %v9099_v9 = vpop.trf.xlu0 }
  0xad   : > { %v9101_v10 = vpop.trf.xlu0 }
  0xb1   : > { %v9103_v11 = vpop.trf.xlu0 }
  0xb5   : > { %v9105_v12 = vpop.trf.xlu0 }
  0xb6   : > { %11395 = vst [vmem:[#allocation2_spill] sm:$0xff] %v9105_v12 }
  0xb9   : > { %v9107_v13 = vpop.trf.xlu0 }
  0xba   : > { %11396 = vst [vmem:[#allocation3_spill] sm:$0xff] %v9107_v13 }
  0xbd   : > { %v9109_v14 = vpop.trf.xlu0 }
  0xbe   : > { %11397 = vst [vmem:[#allocation4_spill] sm:$0xff] %v9109_v14 }
  0xc1   : > { %v9111_v15 = vpop.trf.xlu0 }
  0xc5   : > { %v9113_v16 = vpop.trf.xlu0 }
  0xc6   : > { %11398 = vst [vmem:[#allocation5_spill] sm:$0xff] %v9113_v16 }
  0xc9   : > { %v9115_v17 = vpop.trf.xlu0 }
  0xca   : > { %11399 = vst [vmem:[#allocation6_spill] sm:$0xff] %v9115_v17 }
  0xcd   : > { %v9117_v18 = vpop.trf.xlu0 }
  0xce   : > { %11400 = vst [vmem:[#allocation7_spill] sm:$0xff] %v9117_v18  ;;  %7477 = vmatprep.mubr.msk.f32.mxu0 %vm452_vm1, %v9117_v18  ;;  %v387_v38 = vrot.slane %v9117_v18, 7 }
  0xd1   : > { %v9121_v19 = vpop.trf.xlu0 }
  0xd2   : > { %11401 = vst [vmem:[#allocation8_spill] sm:$0xff] %v9121_v19  ;;  %7478 = vmatmul.mubr.msk.f32.vlgmr.msra.gmra.mrb[0].mxu0 %vm452_vm1, %v9121_v19  ;;  %v386_v37 = vrot.slane %v9121_v19, 7 }
  0xd3   : > { %7526 = vmatpush3.msk.msra.mxu0 %vm517_vm0, %v347_v2 }
  0xd4   : > { %7575 = vmatprep.subr.msk.mxu0 %vm517_vm0, %v9126_v20  ;;  %v9228_v39 = vsel %vm385_vm2, %v386_v37, %v387_v38  ;;  %v9236_v43 = vsel %vm385_vm2, %v387_v38, %v386_v37 }
  0xd5   : > { %v9133_v21 = vpop.trf.xlu0  ;;  %11405 = vst [vmem:[#allocation12_spill] sm:$0xff] %v9228_v39  ;;  %11406 = vst [vmem:[#allocation13_spill] sm:$0xff] %v9236_v43 }
  0xd6   : > { %11402 = vst [vmem:[#allocation9_spill] sm:$0xff] %v9133_v21  ;;  %7480 = vmatprep.mubr.msk.f32.mxu0 %vm452_vm1, %v9133_v21  ;;  %v391_v42 = vrot.slane %v9133_v21, 7 }
  0xd9   : > { %v9137_v22 = vpop.trf.xlu0 }
  0xda   : > { %11403 = vst [vmem:[#allocation10_spill] sm:$0xff] %v9137_v22  ;;  %7481 = vmatmul.mubr.msk.f32.gmra.mrb[2].mxu0 %vm452_vm1, %v9137_v22  ;;  %v390_v40 = vrot.slane %v9137_v22, 7 }
  0xdc   : > { %v9241_v44 = vsel %vm385_vm2, %v390_v40, %v391_v42  ;;  %v9253_v47 = vsel %vm385_vm2, %v391_v42, %v390_v40 }
  0xdd   : > { %v9141_v23 = vpop.trf.xlu0  ;;  %11407 = vst [vmem:[#allocation14_spill] sm:$0xff] %v9241_v44  ;;  %11408 = vst [vmem:[#allocation15_spill] sm:$0xff] %v9253_v47 }
  0xde   : > { %7483 = vmatprep.mubr.msk.f32.mxu0 %vm452_vm1, %v9141_v23  ;;  %v395_v46 = vrot.slane %v9141_v23, 7 }
  0xe1   : > { %v9145_v24 = vpop.trf.xlu0 }
  0xe2   : > { %7484 = vmatmul.mubr.msk.f32.gmra.mrb[4].mxu0 %vm452_vm1, %v9145_v24  ;;  %v394_v45 = vrot.slane %v9145_v24, 7 }
  0xe4   : > { %v9258_v48 = vsel %vm385_vm2, %v394_v45, %v395_v46  ;;  %v9265_v51 = vsel %vm385_vm2, %v395_v46, %v394_v45  ;;  %v422_v46 = vrot.slane %v9091_v5, 7 }
  0xe5   : > { %v9149_v25 = vpop.trf.xlu0 }
  0xe6   : > { %7486 = vmatprep.mubr.msk.f32.mxu0 %vm452_vm1, %v9149_v25  ;;  %v399_v50 = vrot.slane %v9149_v25, 7 }
  0xe9   : > { %v9153_v26 = vpop.trf.xlu0 }
  0xea   : > { %7487 = vmatmul.mubr.msk.f32.gmra.mrb[6].mxu0 %vm452_vm1, %v9153_v26  ;;  %v398_v49 = vrot.slane %v9153_v26, 7 }
  0xec   : > { %v9270_v52 = vsel %vm385_vm2, %v398_v49, %v399_v50  ;;  %v9277_v55 = vsel %vm385_vm2, %v399_v50, %v398_v49  ;;  %v423_v49 = vrot.slane %v9089_v4, 7 }
  0xed   : > { %v9157_v27 = vpop.trf.xlu0 }
  0xee   : > { %7489 = vmatprep.mubr.msk.f32.mxu0 %vm452_vm1, %v9157_v27  ;;  %v403_v54 = vrot.slane %v9157_v27, 7 }
  0xf1   : > { %v9161_v28 = vpop.trf.xlu0 }
  0xf2   : > { %7490 = vmatmul.mubr.msk.f32.gmra.mrb[8].mxu0 %vm452_vm1, %v9161_v28  ;;  %v402_v53 = vrot.slane %v9161_v28, 7 }
  0xf4   : > { %v9282_v56 = vsel %vm385_vm2, %v402_v53, %v403_v54  ;;  %v9289_v59 = vsel %vm385_vm2, %v403_v54, %v402_v53  ;;  %v9342_v53 = vsel %vm385_vm2, %v422_v46, %v423_v49  ;;  %v426_v54 = vrot.slane %v9095_v7, 7 }
  0xf5   : > { %v9165_v29 = vpop.trf.xlu0 }
  0xf6   : > { %7492 = vmatprep.mubr.msk.f32.mxu0 %vm452_vm1, %v9165_v29  ;;  %v407_v58 = vrot.slane %v9165_v29, 7 }
  0xf9   : > { %v9169_v30 = vpop.trf.xlu0 }
  0xfa   : > { %7493 = vmatmul.mubr.msk.f32.gmra.mrb[10].mxu0 %vm452_vm1, %v9169_v30  ;;  %v406_v57 = vrot.slane %v9169_v30, 7 }
  0xfc   : > { %v9294_v60 = vsel %vm385_vm2, %v406_v57, %v407_v58  ;;  %v9301_v63 = vsel %vm385_vm2, %v407_v58, %v406_v57  ;;  %v427_v57 = vrot.slane %v9093_v6, 7  ;;  %v9349_v58 = vsel %vm385_vm2, %v423_v49, %v422_v46 }
  0xfd   : > { %v9173_v31 = vpop.trf.xlu0  ;;  %v435_v46 = vrot.slane %v9101_v10, 7 }
  0xfe   : > { %7495 = vmatprep.mubr.msk.f32.mxu0 %vm452_vm1, %v9173_v31  ;;  %v411_v62 = vrot.slane %v9173_v31, 7 }
 0x101   : > { %v9177_v32 = vpop.trf.xlu0 }
 0x102   : > { %11404 = vst [vmem:[#allocation11_spill] sm:$0xff] %v9177_v32  ;;  %7496 = vmatmul.mubr.msk.f32.gmra.mrb[12].mxu0 %vm452_vm1, %v9177_v32  ;;  %v410_v61 = vrot.slane %v9177_v32, 7 }
 0x104   : > { %v9306_v0 = vsel %vm385_vm2, %v410_v61, %v411_v62  ;;  %v9313_v3 = vsel %vm385_vm2, %v411_v62, %v410_v61  ;;  %v9354_v61 = vsel %vm385_vm2, %v426_v54, %v427_v57  ;;  %v430_v62 = vrot.slane %v9099_v9, 7 }
 0x105   : > { %v9181_v33 = vpop.trf.xlu0 }
 0x106   : > { %7498 = vmatprep.mubr.msk.f32.mxu0 %vm452_vm1, %v9181_v33  ;;  %v415_v2 = vrot.slane %v9181_v33, 7 }
 0x109   : > { %v9185_v34 = vpop.trf.xlu0 }
 0x10a   : > { %7499 = vmatmul.mubr.msk.f32.gmra.mrb[14].mxu0 %vm452_vm1, %v9185_v34  ;;  %v414_v1 = vrot.slane %v9185_v34, 7 }
 0x10c   : > { %v9319_v38 = vsel %vm385_vm2, %v414_v1, %v415_v2  ;;  %v9325_v42 = vsel %vm385_vm2, %v415_v2, %v414_v1  ;;  %v431_v1 = vrot.slane %v9097_v8, 7  ;;  %v9361_v2 = vsel %vm385_vm2, %v427_v57, %v426_v54 }
 0x10d   : > { %v9189_v35 = vpop.trf.xlu0  ;;  %v438_v57 = vrot.slane %v9107_v13, 7 }
 0x10e   : > { %7501 = vmatprep.mubr.msk.f32.mxu0 %vm452_vm1, %v9189_v35  ;;  %v419_v40 = vrot.slane %v9189_v35, 7  ;;  %v9373_v49 = vsel %vm385_vm2, %v431_v1, %v430_v62 }
 0x111   : > { %v9193_v36 = vpop.trf.xlu0 }
 0x112   : > { %7502 = vmatmul.mubr.msk.f32.gmra.mrb[16].mxu0 %vm452_vm1, %v9193_v36  ;;  %v418_v37 = vrot.slane %v9193_v36, 7 }
 0x113   : > { %7504 = vmatprep.mubr.msk.f32.mxu0 %vm452_vm1, %v9089_v4 }
 0x114   : > { %v9330_v45 = vsel %vm385_vm2, %v418_v37, %v419_v40  ;;  %v9337_v50 = vsel %vm385_vm2, %v419_v40, %v418_v37  ;;  %v9366_v37 = vsel %vm385_vm2, %v430_v62, %v431_v1  ;;  %v434_v40 = vrot.slane %v9103_v11, 7 }
 0x115   : > { %v442_v1 = vrot.slane %v9111_v15, 7 }
 0x116   : > { %7505 = vmatmul.mubr.msk.f32.gmra.mrb[18].mxu0 %vm452_vm1, %v9091_v5  ;;  %v9378_v54 = vsel %vm385_vm2, %v434_v40, %v435_v46 }
 0x117   : > { %7507 = vmatprep.mubr.msk.f32.mxu0 %vm452_vm1, %v9093_v6  ;;  %11409 = vst [vmem:[#allocation16_spill] sm:$0xff] %v9378_v54 }
 0x11a   : > { %7508 = vmatmul.mubr.msk.f32.gmra.mrb[20].mxu0 %vm452_vm1, %v9095_v7 }
 0x11b   : > { %7510 = vmatprep.mubr.msk.f32.mxu0 %vm452_vm1, %v9097_v8 }
 0x11e   : > { %7511 = vmatmul.mubr.msk.f32.gmra.mrb[22].mxu0 %vm452_vm1, %v9099_v9 }
 0x11f   : > { %7513 = vmatprep.mubr.msk.f32.mxu0 %vm452_vm1, %v9101_v10 }
 0x122   : > { %7514 = vmatmul.mubr.msk.f32.gmra.mrb[24].mxu0 %vm452_vm1, %v9103_v11 }
 0x123   : > { %7516 = vmatprep.mubr.msk.f32.mxu0 %vm452_vm1, %v9105_v12 }
 0x126   : > { %7517 = vmatmul.mubr.msk.f32.gmra.mrb[26].mxu0 %vm452_vm1, %v9107_v13 }
 0x127   : > { %7519 = vmatprep.mubr.msk.f32.mxu0 %vm452_vm1, %v9109_v14 }
 0x12a   : > { %7520 = vmatmul.mubr.msk.f32.gmra.mrb[28].mxu0 %vm452_vm1, %v9111_v15 }
 0x12b   : > { %7522 = vmatprep.mubr.msk.f32.mxu0 %vm452_vm1, %v9113_v16 }
 0x12e   : > { %7523 = vmatmul.mubr.msk.f32.gmra.mrb[30].mxu0 %vm452_vm1, %v9115_v17 }
 0x12f   : > { %7527 = vmatprep.mubr.msk.f32.mxu0 %vm452_vm1, %v9228_v39  ;;  %v443_v39 = vrot.slane %v9109_v14, 7 }
 0x132   : > { %7528 = vmatmul.mubr.msk.f32.vlgmr.msra.gmra.mrb[0].mxu0 %vm452_vm1, %v9236_v43  ;;  %v9385_v43 = vsel %vm385_vm2, %v435_v46, %v434_v40  ;;  %v9402_v40 = vsel %vm385_vm2, %v442_v1, %v443_v39  ;;  %v446_v46 = vrot.slane %v9115_v17, 7 }
 0x133   : > { %7576 = vmatpush3.msk.msra.mxu0 %vm517_vm0, %v9126_v20  ;;  %7530 = vmatprep.mubr.msk.f32.mxu0 %vm452_vm1, %v9241_v44  ;;  %11410 = vst [vmem:[#allocation17_spill] sm:$0xff] %v9385_v43  ;;  %11413 = vst [vmem:[#allocation20_spill] sm:$0xff] %v9402_v40 }
 0x134   : > { %7625 = vmatprep.subr.msk.mxu0 %vm517_vm0, %v11221_v41  ;;  %v439_v41 = vrot.slane %v9105_v12, 7 }
 0x136   : > { %7531 = vmatmul.mubr.msk.f32.gmra.mrb[2].mxu0 %vm452_vm1, %v9253_v47  ;;  %v9390_v62 = vsel %vm385_vm2, %v438_v57, %v439_v41 }
 0x137   : > { %7533 = vmatprep.mubr.msk.f32.mxu0 %vm452_vm1, %v9258_v48  ;;  %11411 = vst [vmem:[#allocation18_spill] sm:$0xff] %v9390_v62 }
 0x13a   : > { %7534 = vmatmul.mubr.msk.f32.gmra.mrb[4].mxu0 %vm452_vm1, %v9265_v51 }
 0x13b   : > { %7536 = vmatprep.mubr.msk.f32.mxu0 %vm452_vm1, %v9270_v52 }
 0x13e   : > { %7537 = vmatmul.mubr.msk.f32.gmra.mrb[6].mxu0 %vm452_vm1, %v9277_v55 }
 0x13f   : > { %7539 = vmatprep.mubr.msk.f32.mxu0 %vm452_vm1, %v9282_v56 }
 0x142   : > { %7540 = vmatmul.mubr.msk.f32.gmra.mrb[8].mxu0 %vm452_vm1, %v9289_v59 }
 0x143   : > { %7542 = vmatprep.mubr.msk.f32.mxu0 %vm452_vm1, %v9294_v60 }
 0x146   : > { %7543 = vmatmul.mubr.msk.f32.gmra.mrb[10].mxu0 %vm452_vm1, %v9301_v63 }
 0x147   : > { %7545 = vmatprep.mubr.msk.f32.mxu0 %vm452_vm1, %v9306_v0 }
 0x14a   : > { %7546 = vmatmul.mubr.msk.f32.gmra.mrb[12].mxu0 %vm452_vm1, %v9313_v3 }
 0x14b   : > { %7548 = vmatprep.mubr.msk.f32.mxu0 %vm452_vm1, %v9319_v38 }
 0x14e   : > { %7549 = vmatmul.mubr.msk.f32.gmra.mrb[14].mxu0 %vm452_vm1, %v9325_v42 }
 0x14f   : > { %7551 = vmatprep.mubr.msk.f32.mxu0 %vm452_vm1, %v9330_v45 }
 0x152   : > { %7552 = vmatmul.mubr.msk.f32.gmra.mrb[16].mxu0 %vm452_vm1, %v9337_v50 }
 0x153   : > { %7554 = vmatprep.mubr.msk.f32.mxu0 %vm452_vm1, %v9342_v53 }
 0x156   : > { %7555 = vmatmul.mubr.msk.f32.gmra.mrb[18].mxu0 %vm452_vm1, %v9349_v58 }
 0x157   : > { %7557 = vmatprep.mubr.msk.f32.mxu0 %vm452_vm1, %v9354_v61 }
 0x15a   : > { %7558 = vmatmul.mubr.msk.f32.gmra.mrb[20].mxu0 %vm452_vm1, %v9361_v2 }
 0x15b   : > { %7560 = vmatprep.mubr.msk.f32.mxu0 %vm452_vm1, %v9366_v37 }
 0x15e   : > { %7561 = vmatmul.mubr.msk.f32.gmra.mrb[22].mxu0 %vm452_vm1, %v9373_v49 }
 0x15f   : > { %7563 = vmatprep.mubr.msk.f32.mxu0 %vm452_vm1, %v9378_v54  ;;  %v9397_v54 = vsel %vm385_vm2, %v439_v41, %v438_v57  ;;  %v1038_v57 = vrot.slane %v9121_v19, 1  ;;  %v1041_v19 = vrot.slane %v9133_v21, 1 }
 0x160   : > { %11412 = vst [vmem:[#allocation19_spill] sm:$0xff] %v9397_v54 }
 0x162   : > { %7564 = vmatmul.mubr.msk.f32.gmra.mrb[24].mxu0 %vm452_vm1, %v9385_v43  ;;  %v447_v43 = vrot.slane %v9113_v16, 7 }
 0x163   : > { %7566 = vmatprep.mubr.msk.f32.mxu0 %vm452_vm1, %v9390_v62  ;;  %v9409_v62 = vsel %vm385_vm2, %v443_v39, %v442_v1  ;;  %v1042_v1 = vrot.slane %v9137_v22, 1 }
 0x164   : > { %v9414_v41 = vsel %vm385_vm2, %v446_v46, %v447_v43 }
 0x165   : > { %11414 = vst [vmem:[#allocation21_spill] sm:$0xff] %v9414_v41 }
 0x166   : > { %7567 = vmatmul.mubr.msk.f32.gmra.mrb[26].mxu0 %vm452_vm1, %v9397_v54  ;;  %v1037_v54 = vrot.slane %v9117_v18, 1  ;;  %v1046_v18 = vrot.slane %v9145_v24, 1 }
 0x167   : > { %7569 = vmatprep.mubr.msk.f32.mxu0 %vm452_vm1, %v9402_v40  ;;  %v9421_v40 = vsel %vm385_vm2, %v447_v43, %v446_v46  ;;  %v9438_v43 = vld [vmem:[%s11214_s1 + $0x10] sm:$0xff]  ;;  %v9443_v46 = vsel %vm1036_vm3, %v1041_v19, %v1042_v1 }
 0x168   : > { %v9426_v39 = vsel %vm1036_vm3, %v1037_v54, %v1038_v57  ;;  %11417 = vst [vmem:[#allocation24_spill] sm:$0xff] %v9443_v46 }
 0x169   : > { %11415 = vst [vmem:[#allocation22_spill] sm:$0xff] %v9426_v39 }
 0x16a   : > { %7570 = vmatmul.mubr.msk.f32.gmra.mrb[28].mxu0 %vm452_vm1, %v9409_v62 }
 0x16b   : > { %7572 = vmatprep.mubr.msk.f32.mxu0 %vm452_vm1, %v9414_v41  ;;  %v9433_v41 = vsel %vm1036_vm3, %v1038_v57, %v1037_v54  ;;  %v1045_v54 = vrot.slane %v9141_v23, 1  ;;  %v9455_v57 = vsel %vm1036_vm3, %v1042_v1, %v1041_v19  ;;  %v1054_v1 = vrot.slane %v9161_v28, 1 }
 0x16c   : > { %11416 = vst [vmem:[#allocation23_spill] sm:$0xff] %v9433_v41  ;;  %11419 = vst [vmem:[#allocation25_spill] sm:$0xff] %v9455_v57 }
 0x16e   : > { %7573 = vmatmul.mubr.msk.f32.gmra.mrb[30].mxu0 %vm452_vm1, %v9421_v40 }
 0x16f   : > { %7577 = vmatprep.mubr.msk.f32.mxu0 %vm452_vm1, %v9426_v39  ;;  %v11418_v39 = vrot.slane %v9126_v20, 4  ;;  %v1050_v20 = vrot.slane %v9153_v26, 1 }
 0x172   : > { %7578 = vmatmul.mubr.msk.f32.vlgmr.msra.gmra.mrb[0].mxu0 %vm452_vm1, %v9433_v41  ;;  %v9460_v41 = vsel %vm1036_vm3, %v1045_v54, %v1046_v18 }
 0x173   : > { %7626 = vmatpush3.msk.msra.mxu0 %vm517_vm0, %v11418_v39  ;;  %7580 = vmatprep.mubr.msk.f32.mxu0 %vm452_vm1, %v9443_v46  ;;  %11420 = vst [vmem:[#allocation26_spill] sm:$0xff] %v9460_v41  ;;  %v1049_v39 = vrot.slane %v9149_v25, 1  ;;  %v9467_v46 = vsel %vm1036_vm3, %v1046_v18, %v1045_v54  ;;  %v1058_v54 = vrot.slane %v9169_v30, 1 }
 0x174   : > { %7675 = vmatprep.subr.msk.mxu0 %vm517_vm0, %v9438_v43  ;;  %11421 = vst [vmem:[#allocation27_spill] sm:$0xff] %v9467_v46 }
 0x175   : > { %v9472_v19 = vsel %vm1036_vm3, %v1049_v39, %v1050_v20 }
 0x176   : > { %7581 = vmatmul.mubr.msk.f32.gmra.mrb[2].mxu0 %vm452_vm1, %v9455_v57  ;;  %11422 = vst [vmem:[#allocation28_spill] sm:$0xff] %v9472_v19  ;;  %v1053_v57 = vrot.slane %v9157_v27, 1 }
 0x177   : > { %7583 = vmatprep.mubr.msk.f32.mxu0 %vm452_vm1, %v9460_v41  ;;  %v9479_v41 = vsel %vm1036_vm3, %v1050_v20, %v1049_v39  ;;  %v1062_v39 = vrot.slane %v9177_v32, 1  ;;  %v1070_v32 = vrot.slane %v9193_v36, 1 }
 0x178   : > { %11423 = vst [vmem:[#allocation29_spill] sm:$0xff] %v9479_v41  ;;  %v9484_v18 = vsel %vm1036_vm3, %v1053_v57, %v1054_v1 }
 0x179   : > { %11424 = vst [vmem:[#allocation30_spill] sm:$0xff] %v9484_v18 }
 0x17a   : > { %7584 = vmatmul.mubr.msk.f32.gmra.mrb[4].mxu0 %vm452_vm1, %v9467_v46  ;;  %v1057_v46 = vrot.slane %v9165_v29, 1 }
 0x17b   : > { %7586 = vmatprep.mubr.msk.f32.mxu0 %vm452_vm1, %v9472_v19  ;;  %v9491_v19 = vsel %vm1036_vm3, %v1054_v1, %v1053_v57  ;;  %v1066_v1 = vrot.slane %v9185_v34, 1 }
 0x17c   : > { %11425 = vst [vmem:[#allocation31_spill] sm:$0xff] %v9491_v19  ;;  %v9496_v20 = vsel %vm1036_vm3, %v1057_v46, %v1058_v54 }
 0x17d   : > { %11426 = vst [vmem:[#allocation32_spill] sm:$0xff] %v9496_v20 }
 0x17e   : > { %7587 = vmatmul.mubr.msk.f32.gmra.mrb[6].mxu0 %vm452_vm1, %v9479_v41  ;;  %v1061_v41 = vrot.slane %v9173_v31, 1 }
 0x17f   : > { %7589 = vmatprep.mubr.msk.f32.mxu0 %vm452_vm1, %v9484_v18  ;;  %v9503_v18 = vsel %vm1036_vm3, %v1058_v54, %v1057_v46  ;;  %v1069_v54 = vrot.slane %v9189_v35, 1 }
 0x180   : > { %11427 = vst [vmem:[#allocation33_spill] sm:$0xff] %v9503_v18  ;;  %v9508_v57 = vsel %vm1036_vm3, %v1061_v41, %v1062_v39 }
 0x181   : > { %11428 = vst [vmem:[#allocation34_spill] sm:$0xff] %v9508_v57 }
 0x182   : > { %7590 = vmatmul.mubr.msk.f32.gmra.mrb[8].mxu0 %vm452_vm1, %v9491_v19  ;;  %v1065_v19 = vrot.slane %v9181_v33, 1 }
 0x183   : > { %7592 = vmatprep.mubr.msk.f32.mxu0 %vm452_vm1, %v9496_v20  ;;  %v9515_v20 = vsel %vm1036_vm3, %v1062_v39, %v1061_v41  ;;  %v9532_v41 = vsel %vm1036_vm3, %v1069_v54, %v1070_v32  ;;  %v1074_v39 = vrot.slane %v9091_v5, 1 }
 0x184   : > { %11429 = vst [vmem:[#allocation35_spill] sm:$0xff] %v9515_v20  ;;  %v9521_v46 = vsel %vm1036_vm3, %v1065_v19, %v1066_v1  ;;  %11432 = vst [vmem:[#allocation38_spill] sm:$0xff] %v9532_v41 }
 0x185   : > { %11430 = vst [vmem:[#allocation36_spill] sm:$0xff] %v9521_v46 }
 0x186   : > { %7593 = vmatmul.mubr.msk.f32.gmra.mrb[10].mxu0 %vm452_vm1, %v9503_v18 }
 0x187   : > { %7595 = vmatprep.mubr.msk.f32.mxu0 %vm452_vm1, %v9508_v57  ;;  %v9527_v57 = vsel %vm1036_vm3, %v1066_v1, %v1065_v19  ;;  %v1078_v1 = vrot.slane %v9095_v7, 1 }
 0x188   : > { %11431 = vst [vmem:[#allocation37_spill] sm:$0xff] %v9527_v57 }
 0x18a   : > { %7596 = vmatmul.mubr.msk.f32.gmra.mrb[12].mxu0 %vm452_vm1, %v9515_v20  ;;  %v1073_v20 = vrot.slane %v9089_v4, 1 }
 0x18b   : > { %7598 = vmatprep.mubr.msk.f32.mxu0 %vm452_vm1, %v9521_v46  ;;  %v9539_v46 = vsel %vm1036_vm3, %v1070_v32, %v1069_v54  ;;  %v1082_v54 = vrot.slane %v9099_v9, 1 }
 0x18c   : > { %11433 = vst [vmem:[#allocation39_spill] sm:$0xff] %v9539_v46  ;;  %v9544_v19 = vsel %vm1036_vm3, %v1073_v20, %v1074_v39 }
 0x18d   : > { %11434 = vst [vmem:[#allocation40_spill] sm:$0xff] %v9544_v19 }
 0x18e   : > { %7599 = vmatmul.mubr.msk.f32.gmra.mrb[14].mxu0 %vm452_vm1, %v9527_v57  ;;  %v1077_v57 = vrot.slane %v9093_v6, 1 }
 0x18f   : > { %7601 = vmatprep.mubr.msk.f32.mxu0 %vm452_vm1, %v9532_v41  ;;  %v9551_v41 = vsel %vm1036_vm3, %v1074_v39, %v1073_v20  ;;  %v1086_v39 = vrot.slane %v9103_v11, 1 }
 0x190   : > { %11435 = vst [vmem:[#allocation41_spill] sm:$0xff] %v9551_v41  ;;  %v9556_v32 = vsel %vm1036_vm3, %v1077_v57, %v1078_v1 }
 0x191   : > { %11436 = vst [vmem:[#allocation42_spill] sm:$0xff] %v9556_v32 }
 0x192   : > { %7602 = vmatmul.mubr.msk.f32.gmra.mrb[16].mxu0 %vm452_vm1, %v9539_v46  ;;  %v1081_v46 = vrot.slane %v9097_v8, 1 }
 0x193   : > { %7604 = vmatprep.mubr.msk.f32.mxu0 %vm452_vm1, %v9544_v19  ;;  %v9563_v19 = vsel %vm1036_vm3, %v1078_v1, %v1077_v57  ;;  %v1090_v1 = vrot.slane %v9107_v13, 1 }
 0x194   : > { %11437 = vst [vmem:[#allocation43_spill] sm:$0xff] %v9563_v19  ;;  %v9568_v20 = vsel %vm1036_vm3, %v1081_v46, %v1082_v54 }
 0x195   : > { %11438 = vst [vmem:[#allocation44_spill] sm:$0xff] %v9568_v20 }
 0x196   : > { %7605 = vmatmul.mubr.msk.f32.gmra.mrb[18].mxu0 %vm452_vm1, %v9551_v41  ;;  %v1085_v41 = vrot.slane %v9101_v10, 1 }
 0x197   : > { %7607 = vmatprep.mubr.msk.f32.mxu0 %vm452_vm1, %v9556_v32  ;;  %v9575_v32 = vsel %vm1036_vm3, %v1082_v54, %v1081_v46  ;;  %v1094_v54 = vrot.slane %v9111_v15, 1 }
 0x198   : > { %11439 = vst [vmem:[#allocation45_spill] sm:$0xff] %v9575_v32  ;;  %v9580_v57 = vsel %vm1036_vm3, %v1085_v41, %v1086_v39 }
 0x199   : > { %11440 = vst [vmem:[#allocation46_spill] sm:$0xff] %v9580_v57 }
 0x19a   : > { %7608 = vmatmul.mubr.msk.f32.gmra.mrb[20].mxu0 %vm452_vm1, %v9563_v19  ;;  %v1089_v19 = vrot.slane %v9105_v12, 1 }
 0x19b   : > { %7610 = vmatprep.mubr.msk.f32.mxu0 %vm452_vm1, %v9568_v20  ;;  %v9587_v20 = vsel %vm1036_vm3, %v1086_v39, %v1085_v41  ;;  %v1098_v39 = vrot.slane %v9115_v17, 1 }
 0x19c   : > { %11441 = vst [vmem:[#allocation47_spill] sm:$0xff] %v9587_v20  ;;  %v9592_v46 = vsel %vm1036_vm3, %v1089_v19, %v1090_v1 }
 0x19d   : > { %11442 = vst [vmem:[#allocation48_spill] sm:$0xff] %v9592_v46 }
 0x19e   : > { %7611 = vmatmul.mubr.msk.f32.gmra.mrb[22].mxu0 %vm452_vm1, %v9575_v32  ;;  %v1093_v32 = vrot.slane %v9109_v14, 1 }
 0x19f   : > { %7613 = vmatprep.mubr.msk.f32.mxu0 %vm452_vm1, %v9580_v57  ;;  %v9599_v57 = vsel %vm1036_vm3, %v1090_v1, %v1089_v19 }
 0x1a0   : > { %v9604_v41 = vsel %vm1036_vm3, %v1093_v32, %v1094_v54 }
 0x1a1   : > { %11443 = vst [vmem:[#allocation49_spill] sm:$0xff] %v9604_v41 }
 0x1a2   : > { %7614 = vmatmul.mubr.msk.f32.gmra.mrb[24].mxu0 %vm452_vm1, %v9587_v20  ;;  %v1097_v20 = vrot.slane %v9113_v16, 1 }
 0x1a3   : > { %7616 = vmatprep.mubr.msk.f32.mxu0 %vm452_vm1, %v9592_v46  ;;  %v9611_v46 = vsel %vm1036_vm3, %v1094_v54, %v1093_v32  ;;  %v1945_v32 = vrot.slane %v9438_v43, 4  ;;  %v11446_v54 = vld [vmem:[#allocation18_spill] sm:$0xff] }
 0x1a4   : > { %v9616_v19 = vsel %vm1036_vm3, %v1097_v20, %v1098_v39  ;;  %v9621_v1 = vsel %vm1036_vm3, %v1098_v39, %v1097_v20  ;;  %v11445_v20 = vld [vmem:[#allocation17_spill] sm:$0xff]  ;;  %v11447_v39 = vld [vmem:[#allocation19_spill] sm:$0xff] }
 0x1a6   : > { %7617 = vmatmul.mubr.msk.f32.gmra.mrb[26].mxu0 %vm452_vm1, %v9599_v57 }
 0x1a7   : > { %7619 = vmatprep.mubr.msk.f32.mxu0 %vm452_vm1, %v9604_v41 }
 0x1aa   : > { %7620 = vmatmul.mubr.msk.f32.gmra.mrb[28].mxu0 %vm452_vm1, %v9611_v46 }
 0x1ab   : > { %7622 = vmatprep.mubr.msk.f32.mxu0 %vm452_vm1, %v9616_v19 }
 0x1ae   : > { %7623 = vmatmul.mubr.msk.f32.gmra.mrb[30].mxu0 %vm452_vm1, %v9621_v1 }
 0x1af   : > { %7627 = vmatprep.mubr.msk.f32.mxu0 %vm452_vm1, %v9241_v44  ;;  %v11449_v44 = vld [vmem:[#allocation21_spill] sm:$0xff] }
 0x1b2   : > { %7628 = vmatmul.mubr.msk.f32.vlgmr.msra.gmra.mrb[0].mxu0 %vm452_vm1, %v9253_v47  ;;  %v11448_v47 = vld [vmem:[#allocation20_spill] sm:$0xff] }
 0x1b3   : > { %7676 = vmatpush3.msk.msra.mxu0 %vm517_vm0, %v9438_v43  ;;  %7630 = vmatprep.mubr.msk.f32.mxu0 %vm452_vm1, %v9258_v48  ;;  %v11444_v43 = vld [vmem:[#allocation16_spill] sm:$0xff] }
 0x1b4   : > { %7725 = vmatprep.subr.msk.mxu0 %vm517_vm0, %v1945_v32 }
 0x1b6   : > { %7631 = vmatmul.mubr.msk.f32.gmra.mrb[2].mxu0 %vm452_vm1, %v9265_v51 }
 0x1b7   : > { %7633 = vmatprep.mubr.msk.f32.mxu0 %vm452_vm1, %v9270_v52 }
 0x1ba   : > { %7634 = vmatmul.mubr.msk.f32.gmra.mrb[4].mxu0 %vm452_vm1, %v9277_v55 }
 0x1bb   : > { %7636 = vmatprep.mubr.msk.f32.mxu0 %vm452_vm1, %v9282_v56 }
 0x1be   : > { %7637 = vmatmul.mubr.msk.f32.gmra.mrb[6].mxu0 %vm452_vm1, %v9289_v59 }
 0x1bf   : > { %7639 = vmatprep.mubr.msk.f32.mxu0 %vm452_vm1, %v9294_v60 }
 0x1c2   : > { %7640 = vmatmul.mubr.msk.f32.gmra.mrb[8].mxu0 %vm452_vm1, %v9301_v63 }
 0x1c3   : > { %7642 = vmatprep.mubr.msk.f32.mxu0 %vm452_vm1, %v9306_v0 }
 0x1c6   : > { %7643 = vmatmul.mubr.msk.f32.gmra.mrb[10].mxu0 %vm452_vm1, %v9313_v3 }
 0x1c7   : > { %7645 = vmatprep.mubr.msk.f32.mxu0 %vm452_vm1, %v9319_v38 }
 0x1ca   : > { %7646 = vmatmul.mubr.msk.f32.gmra.mrb[12].mxu0 %vm452_vm1, %v9325_v42 }
 0x1cb   : > { %7648 = vmatprep.mubr.msk.f32.mxu0 %vm452_vm1, %v9330_v45 }
 0x1ce   : > { %7649 = vmatmul.mubr.msk.f32.gmra.mrb[14].mxu0 %vm452_vm1, %v9337_v50 }
 0x1cf   : > { %7651 = vmatprep.mubr.msk.f32.mxu0 %vm452_vm1, %v9342_v53 }
 0x1d2   : > { %7652 = vmatmul.mubr.msk.f32.gmra.mrb[16].mxu0 %vm452_vm1, %v9349_v58 }
 0x1d3   : > { %7654 = vmatprep.mubr.msk.f32.mxu0 %vm452_vm1, %v9354_v61 }
 0x1d6   : > { %7655 = vmatmul.mubr.msk.f32.gmra.mrb[18].mxu0 %vm452_vm1, %v9361_v2 }
 0x1d7   : > { %7657 = vmatprep.mubr.msk.f32.mxu0 %vm452_vm1, %v9366_v37 }
 0x1da   : > { %7658 = vmatmul.mubr.msk.f32.gmra.mrb[20].mxu0 %vm452_vm1, %v9373_v49 }
 0x1db   : > { %7660 = vmatprep.mubr.msk.f32.mxu0 %vm452_vm1, %v11444_v43  ;;  %v11450_v43 = vld [vmem:[#allocation12_spill] sm:$0xff] }
 0x1de   : > { %7661 = vmatmul.mubr.msk.f32.gmra.mrb[22].mxu0 %vm452_vm1, %v11445_v20  ;;  %v11451_v20 = vld [vmem:[#allocation13_spill] sm:$0xff] }
 0x1df   : > { %7663 = vmatprep.mubr.msk.f32.mxu0 %vm452_vm1, %v11446_v54 }
 0x1e2   : > { %7664 = vmatmul.mubr.msk.f32.gmra.mrb[24].mxu0 %vm452_vm1, %v11447_v39 }
 0x1e3   : > { %7666 = vmatprep.mubr.msk.f32.mxu0 %vm452_vm1, %v11448_v47  ;;  %v9698_v47 = vld [vmem:[%s11214_s1 + $0x18] sm:$0xff] }
 0x1e6   : > { %7667 = vmatmul.mubr.msk.f32.gmra.mrb[26].mxu0 %vm452_vm1, %v9409_v62 }
 0x1e7   : > { %7669 = vmatprep.mubr.msk.f32.mxu0 %vm452_vm1, %v11449_v44 }
 0x1ea   : > { %7670 = vmatmul.mubr.msk.f32.gmra.mrb[28].mxu0 %vm452_vm1, %v9421_v40 }
 0x1eb   : > { %7672 = vmatprep.mubr.msk.f32.mxu0 %vm452_vm1, %v11450_v43 }
 0x1ee   : > { %7673 = vmatmul.mubr.msk.f32.gmra.mrb[30].mxu0 %vm452_vm1, %v11451_v20 }
 0x1ef   : > { %7677 = vmatprep.mubr.msk.f32.mxu0 %vm452_vm1, %v9133_v21  ;;  %v11454_v21 = vld [vmem:[#allocation8_spill] sm:$0xff] }
 0x1f2   : > { %7678 = vmatmul.mubr.msk.f32.vlgmr.msra.gmra.mrb[0].mxu0 %vm452_vm1, %v9137_v22  ;;  %v11453_v22 = vld [vmem:[#allocation7_spill] sm:$0xff] }
 0x1f3   : > { %7726 = vmatpush3.msk.msra.mxu0 %vm517_vm0, %v1945_v32  ;;  %7680 = vmatprep.mubr.msk.f32.mxu0 %vm452_vm1, %v9141_v23  ;;  %v11452_v32 = vld [vmem:[#allocation11_spill] sm:$0xff] }
 0x1f4   : > { %7775 = vmatprep.subr.msk.mxu0 %vm517_vm0, %v9698_v47 }
 0x1f6   : > { %7681 = vmatmul.mubr.msk.f32.gmra.mrb[2].mxu0 %vm452_vm1, %v9145_v24 }
 0x1f7   : > { %7683 = vmatprep.mubr.msk.f32.mxu0 %vm452_vm1, %v9149_v25 }
 0x1fa   : > { %7684 = vmatmul.mubr.msk.f32.gmra.mrb[4].mxu0 %vm452_vm1, %v9153_v26 }
 0x1fb   : > { %7686 = vmatprep.mubr.msk.f32.mxu0 %vm452_vm1, %v9157_v27 }
 0x1fe   : > { %7687 = vmatmul.mubr.msk.f32.gmra.mrb[6].mxu0 %vm452_vm1, %v9161_v28 }
 0x1ff   : > { %7689 = vmatprep.mubr.msk.f32.mxu0 %vm452_vm1, %v9165_v29 }
 0x202   : > { %7690 = vmatmul.mubr.msk.f32.gmra.mrb[8].mxu0 %vm452_vm1, %v9169_v30 }
 0x203   : > { %7692 = vmatprep.mubr.msk.f32.mxu0 %vm452_vm1, %v9173_v31 }
 0x206   : > { %7693 = vmatmul.mubr.msk.f32.gmra.mrb[10].mxu0 %vm452_vm1, %v11452_v32 }
 0x207   : > { %7695 = vmatprep.mubr.msk.f32.mxu0 %vm452_vm1, %v9181_v33 }
 0x20a   : > { %7696 = vmatmul.mubr.msk.f32.gmra.mrb[12].mxu0 %vm452_vm1, %v9185_v34 }
 0x20b   : > { %7698 = vmatprep.mubr.msk.f32.mxu0 %vm452_vm1, %v9189_v35 }
 0x20e   : > { %7699 = vmatmul.mubr.msk.f32.gmra.mrb[14].mxu0 %vm452_vm1, %v9193_v36 }
 0x20f   : > { %7701 = vmatprep.mubr.msk.f32.mxu0 %vm452_vm1, %v9089_v4 }
 0x212   : > { %7702 = vmatmul.mubr.msk.f32.gmra.mrb[16].mxu0 %vm452_vm1, %v9091_v5 }
 0x213   : > { %7704 = vmatprep.mubr.msk.f32.mxu0 %vm452_vm1, %v9093_v6 }
 0x216   : > { %7705 = vmatmul.mubr.msk.f32.gmra.mrb[18].mxu0 %vm452_vm1, %v9095_v7 }
 0x217   : > { %7707 = vmatprep.mubr.msk.f32.mxu0 %vm452_vm1, %v9097_v8 }
 0x21a   : > { %7708 = vmatmul.mubr.msk.f32.gmra.mrb[20].mxu0 %vm452_vm1, %v9099_v9 }
 0x21b   : > { %7710 = vmatprep.mubr.msk.f32.mxu0 %vm452_vm1, %v9101_v10 }
 0x21e   : > { %7711 = vmatmul.mubr.msk.f32.gmra.mrb[22].mxu0 %vm452_vm1, %v9103_v11 }
 0x21f   : > { %7713 = vmatprep.mubr.msk.f32.mxu0 %vm452_vm1, %v9105_v12  ;;  %v11455_v12 = vld [vmem:[#allocation24_spill] sm:$0xff] }
 0x222   : > { %7714 = vmatmul.mubr.msk.f32.gmra.mrb[24].mxu0 %vm452_vm1, %v9107_v13  ;;  %v11456_v13 = vld [vmem:[#allocation25_spill] sm:$0xff] }
 0x223   : > { %7716 = vmatprep.mubr.msk.f32.mxu0 %vm452_vm1, %v9109_v14  ;;  %v2465_v14 = vrot.slane %v9698_v47, 4 }
 0x226   : > { %7717 = vmatmul.mubr.msk.f32.gmra.mrb[26].mxu0 %vm452_vm1, %v9111_v15 }
 0x227   : > { %7719 = vmatprep.mubr.msk.f32.mxu0 %vm452_vm1, %v9113_v16  ;;  %v11457_v16 = vld [vmem:[#allocation26_spill] sm:$0xff] }
 0x22a   : > { %7720 = vmatmul.mubr.msk.f32.gmra.mrb[28].mxu0 %vm452_vm1, %v9115_v17  ;;  %v11461_v17 = vld [vmem:[#allocation30_spill] sm:$0xff] }
 0x22b   : > { %7722 = vmatprep.mubr.msk.f32.mxu0 %vm452_vm1, %v11453_v22  ;;  %v11458_v22 = vld [vmem:[#allocation27_spill] sm:$0xff] }
 0x22e   : > { %7723 = vmatmul.mubr.msk.f32.gmra.mrb[30].mxu0 %vm452_vm1, %v11454_v21  ;;  %v11459_v21 = vld [vmem:[#allocation28_spill] sm:$0xff] }
 0x22f   : > { %7727 = vmatprep.mubr.msk.f32.mxu0 %vm452_vm1, %v11455_v12  ;;  %v11460_v12 = vld [vmem:[#allocation29_spill] sm:$0xff] }
 0x232   : > { %7728 = vmatmul.mubr.msk.f32.vlgmr.msra.gmra.mrb[0].mxu0 %vm452_vm1, %v11456_v13  ;;  %v11462_v13 = vld [vmem:[#allocation31_spill] sm:$0xff] }
 0x233   : > { %7776 = vmatpush3.msk.msra.mxu0 %vm517_vm0, %v9698_v47  ;;  %7730 = vmatprep.mubr.msk.f32.mxu0 %vm452_vm1, %v11457_v16  ;;  %v11463_v47 = vld [vmem:[#allocation32_spill] sm:$0xff]  ;;  %v11464_v16 = vld [vmem:[#allocation34_spill] sm:$0xff] }
 0x234   : > { %7825 = vmatprep.subr.msk.mxu0 %vm517_vm0, %v2465_v14 }
 0x236   : > { %7731 = vmatmul.mubr.msk.f32.gmra.mrb[2].mxu0 %vm452_vm1, %v11458_v22  ;;  %v11465_v22 = vld [vmem:[#allocation35_spill] sm:$0xff] }
 0x237   : > { %7733 = vmatprep.mubr.msk.f32.mxu0 %vm452_vm1, %v11459_v21  ;;  %v11466_v21 = vld [vmem:[#allocation36_spill] sm:$0xff] }
 0x23a   : > { %7734 = vmatmul.mubr.msk.f32.gmra.mrb[4].mxu0 %vm452_vm1, %v11460_v12  ;;  %v11467_v12 = vld [vmem:[#allocation37_spill] sm:$0xff] }
 0x23b   : > { %7736 = vmatprep.mubr.msk.f32.mxu0 %vm452_vm1, %v11461_v17  ;;  %v11468_v17 = vld [vmem:[#allocation38_spill] sm:$0xff] }
 0x23e   : > { %7737 = vmatmul.mubr.msk.f32.gmra.mrb[6].mxu0 %vm452_vm1, %v11462_v13  ;;  %v11469_v13 = vld [vmem:[#allocation39_spill] sm:$0xff] }
 0x23f   : > { %7739 = vmatprep.mubr.msk.f32.mxu0 %vm452_vm1, %v11463_v47  ;;  %v11470_v47 = vld [vmem:[#allocation40_spill] sm:$0xff] }
 0x242   : > { %7740 = vmatmul.mubr.msk.f32.gmra.mrb[8].mxu0 %vm452_vm1, %v9503_v18  ;;  %v11471_v18 = vld [vmem:[#allocation41_spill] sm:$0xff] }
 0x243   : > { %7742 = vmatprep.mubr.msk.f32.mxu0 %vm452_vm1, %v11464_v16  ;;  %v11472_v16 = vld [vmem:[#allocation42_spill] sm:$0xff] }
 0x246   : > { %7743 = vmatmul.mubr.msk.f32.gmra.mrb[10].mxu0 %vm452_vm1, %v11465_v22  ;;  %v11473_v22 = vld [vmem:[#allocation43_spill] sm:$0xff] }
 0x247   : > { %7745 = vmatprep.mubr.msk.f32.mxu0 %vm452_vm1, %v11466_v21  ;;  %v11474_v21 = vld [vmem:[#allocation44_spill] sm:$0xff] }
 0x24a   : > { %7746 = vmatmul.mubr.msk.f32.gmra.mrb[12].mxu0 %vm452_vm1, %v11467_v12  ;;  %v11475_v12 = vld [vmem:[#allocation45_spill] sm:$0xff] }
 0x24b   : > { %7748 = vmatprep.mubr.msk.f32.mxu0 %vm452_vm1, %v11468_v17  ;;  %v11476_v17 = vld [vmem:[#allocation46_spill] sm:$0xff] }
 0x24e   : > { %7749 = vmatmul.mubr.msk.f32.gmra.mrb[14].mxu0 %vm452_vm1, %v11469_v13  ;;  %v11477_v13 = vld [vmem:[#allocation47_spill] sm:$0xff] }
 0x24f   : > { %7751 = vmatprep.mubr.msk.f32.mxu0 %vm452_vm1, %v11470_v47  ;;  %v11478_v47 = vld [vmem:[#allocation48_spill] sm:$0xff] }
 0x252   : > { %7752 = vmatmul.mubr.msk.f32.gmra.mrb[16].mxu0 %vm452_vm1, %v11471_v18 }
 0x253   : > { %7754 = vmatprep.mubr.msk.f32.mxu0 %vm452_vm1, %v11472_v16 }
 0x256   : > { %7755 = vmatmul.mubr.msk.f32.gmra.mrb[18].mxu0 %vm452_vm1, %v11473_v22 }
 0x257   : > { %7757 = vmatprep.mubr.msk.f32.mxu0 %vm452_vm1, %v11474_v21 }
 0x25a   : > { %7758 = vmatmul.mubr.msk.f32.gmra.mrb[20].mxu0 %vm452_vm1, %v11475_v12 }
 0x25b   : > { %7760 = vmatprep.mubr.msk.f32.mxu0 %vm452_vm1, %v11476_v17  ;;  %v11479_v17 = vld [vmem:[#allocation22_spill] sm:$0xff] }
 0x25e   : > { %7761 = vmatmul.mubr.msk.f32.gmra.mrb[22].mxu0 %vm452_vm1, %v11477_v13  ;;  %v11480_v13 = vld [vmem:[#allocation23_spill] sm:$0xff] }
 0x25f   : > { %7763 = vmatprep.mubr.msk.f32.mxu0 %vm452_vm1, %v11478_v47 }
 0x262   : > { %7764 = vmatmul.mubr.msk.f32.gmra.mrb[24].mxu0 %vm452_vm1, %v9599_v57 }
 0x263   : > { %7766 = vmatprep.mubr.msk.f32.mxu0 %vm452_vm1, %v9604_v41  ;;  %v351_v41 = vld [vmem:[%s11214_s1 + $0x20] sm:$0xf] }
 0x266   : > { %7767 = vmatmul.mubr.msk.f32.gmra.mrb[26].mxu0 %vm452_vm1, %v9611_v46 }
 0x267   : > { %7769 = vmatprep.mubr.msk.f32.mxu0 %vm452_vm1, %v9616_v19 }
 0x26a   : > { %7770 = vmatmul.mubr.msk.f32.gmra.mrb[28].mxu0 %vm452_vm1, %v9621_v1 }
 0x26b   : > { %7772 = vmatprep.mubr.msk.f32.mxu0 %vm452_vm1, %v11479_v17 }
 0x26e   : > { %7773 = vmatmul.mubr.msk.f32.gmra.mrb[30].mxu0 %vm452_vm1, %v11480_v13 }
 0x26f   : > { %7777 = vmatprep.mubr.msk.f32.mxu0 %vm452_vm1, %v9258_v48  ;;  %v11482_v48 = vld [vmem:[#allocation17_spill] sm:$0xff] }
 0x272   : > { %7778 = vmatmul.mubr.msk.f32.vlgmr.msra.gmra.mrb[0].mxu0 %vm452_vm1, %v9265_v51  ;;  %v11483_v51 = vld [vmem:[#allocation20_spill] sm:$0xff] }
 0x273   : > { %7826 = vmatpush3.msk.msra.mxu0 %vm517_vm0, %v2465_v14  ;;  %7780 = vmatprep.mubr.msk.f32.mxu0 %vm452_vm1, %v9270_v52  ;;  %v11481_v14 = vld [vmem:[#allocation16_spill] sm:$0xff]  ;;  %v11484_v52 = vld [vmem:[#allocation14_spill] sm:$0xff] }
 0x274   : > { %7875 = vmatprep.subr.msk.mxu0 %vm517_vm0, %v351_v41 }
 0x276   : > { %7781 = vmatmul.mubr.msk.f32.gmra.mrb[2].mxu0 %vm452_vm1, %v9277_v55  ;;  %v11485_v55 = vld [vmem:[#allocation15_spill] sm:$0xff] }
 0x277   : > { %7783 = vmatprep.mubr.msk.f32.mxu0 %vm452_vm1, %v9282_v56  ;;  %v3055_v56 = vld [vmem:[%s11216_s3] sm:$0xff] }
 0x27a   : > { %7784 = vmatmul.mubr.msk.f32.gmra.mrb[4].mxu0 %vm452_vm1, %v9289_v59 }
 0x27b   : > { %7786 = vmatprep.mubr.msk.f32.mxu0 %vm452_vm1, %v9294_v60  ;;  %v11508_v60 = vld [vmem:[#allocation39_spill] sm:$0xff] }
 0x27e   : > { %7787 = vmatmul.mubr.msk.f32.gmra.mrb[6].mxu0 %vm452_vm1, %v9301_v63  ;;  %v11509_v63 = vld [vmem:[#allocation40_spill] sm:$0xff] }
 0x27f   : > { %7789 = vmatprep.mubr.msk.f32.mxu0 %vm452_vm1, %v9306_v0  ;;  %v11510_v0 = vld [vmem:[#allocation46_spill] sm:$0xff] }
 0x282   : > { %7790 = vmatmul.mubr.msk.f32.gmra.mrb[8].mxu0 %vm452_vm1, %v9313_v3  ;;  %v11511_v3 = vld [vmem:[#allocation47_spill] sm:$0xff] }
 0x283   : > { %7792 = vmatprep.mubr.msk.f32.mxu0 %vm452_vm1, %v9319_v38  ;;  %v3058_v38 = vld [vmem:[%s11216_s3 + $0x18] sm:$0xff] }
 0x286   : > { %7793 = vmatmul.mubr.msk.f32.gmra.mrb[10].mxu0 %vm452_vm1, %v9325_v42 }
 0x287   : > { %7795 = vmatprep.mubr.msk.f32.mxu0 %vm452_vm1, %v9330_v45 }
 0x28a   : > { %7796 = vmatmul.mubr.msk.f32.gmra.mrb[12].mxu0 %vm452_vm1, %v9337_v50 }
 0x28b   : > { %7798 = vmatprep.mubr.msk.f32.mxu0 %vm452_vm1, %v9342_v53 }
 0x28e   : > { %7799 = vmatmul.mubr.msk.f32.gmra.mrb[14].mxu0 %vm452_vm1, %v9349_v58 }
 0x28f   : > { %7801 = vmatprep.mubr.msk.f32.mxu0 %vm452_vm1, %v9354_v61 }
 0x292   : > { %7802 = vmatmul.mubr.msk.f32.gmra.mrb[16].mxu0 %vm452_vm1, %v9361_v2 }
 0x293   : > { %7804 = vmatprep.mubr.msk.f32.mxu0 %vm452_vm1, %v9366_v37 }
 0x296   : > { %7805 = vmatmul.mubr.msk.f32.gmra.mrb[18].mxu0 %vm452_vm1, %v9373_v49 }
 0x297   : > { %7807 = vmatprep.mubr.msk.f32.mxu0 %vm452_vm1, %v11481_v14 }
 0x29a   : > { %7808 = vmatmul.mubr.msk.f32.gmra.mrb[20].mxu0 %vm452_vm1, %v11482_v48 }
 0x29b   : > { %7810 = vmatprep.mubr.msk.f32.mxu0 %vm452_vm1, %v11446_v54 }
 0x29e   : > { %7811 = vmatmul.mubr.msk.f32.gmra.mrb[22].mxu0 %vm452_vm1, %v11447_v39 }
 0x29f   : > { %7813 = vmatprep.mubr.msk.f32.mxu0 %vm452_vm1, %v11483_v51 }
 0x2a2   : > { %7814 = vmatmul.mubr.msk.f32.gmra.mrb[24].mxu0 %vm452_vm1, %v9409_v62 }
 0x2a3   : > { %7816 = vmatprep.mubr.msk.f32.mxu0 %vm452_vm1, %v11449_v44  ;;  %v3056_v44 = vld [vmem:[%s11216_s3 + $0x8] sm:$0xff] }
 0x2a4   : > { %v8449_v59 = vpack.c.bf16 %v3056_v44, %v3055_v56 }
 0x2a6   : > { %7817 = vmatmul.mubr.msk.f32.gmra.mrb[26].mxu0 %vm452_vm1, %v9421_v40  ;;  %8493 = vmatprep.subr.bf16.mxu1 %v8449_v59 }
 0x2a7   : > { %7819 = vmatprep.mubr.msk.f32.mxu0 %vm452_vm1, %v11450_v43  ;;  %8495 = vmatpush3.bf16.msra.mxu1 %v8449_v59 }
 0x2aa   : > { %7820 = vmatmul.mubr.msk.f32.gmra.mrb[28].mxu0 %vm452_vm1, %v11451_v20 }
 0x2ab   : > { %7822 = vmatprep.mubr.msk.f32.mxu0 %vm452_vm1, %v11484_v52 }
 0x2ae   : > { %7823 = vmatmul.mubr.msk.f32.gmra.mrb[30].mxu0 %vm452_vm1, %v11485_v55 }
 0x2af   : > { %7827 = vmatprep.mubr.msk.f32.mxu0 %vm452_vm1, %v9141_v23  ;;  %v11494_v23 = vld [vmem:[#allocation10_spill] sm:$0xff] }
 0x2b2   : > { %7828 = vmatmul.mubr.msk.f32.vlgmr.msra.gmra.mrb[0].mxu0 %vm452_vm1, %v9145_v24  ;;  %v11495_v24 = vld [vmem:[#allocation26_spill] sm:$0xff] }
 0x2b3   : > { %7876 = vmatpush3.msk.msra.mxu0 %vm517_vm0, %v351_v41  ;;  %7830 = vmatprep.mubr.msk.f32.mxu0 %vm452_vm1, %v9149_v25  ;;  %v11497_v25 = vld [vmem:[#allocation28_spill] sm:$0xff] }
 0x2b4   : > { %8450 = vmatprep.subr.bf16.mxu0 %v8449_v59 }
 0x2b6   : > { %7831 = vmatmul.mubr.msk.f32.gmra.mrb[2].mxu0 %vm452_vm1, %v9153_v26  ;;  %v11498_v26 = vld [vmem:[#allocation29_spill] sm:$0xff] }
 0x2b7   : > { %7833 = vmatprep.mubr.msk.f32.mxu0 %vm452_vm1, %v9157_v27  ;;  %v11499_v27 = vld [vmem:[#allocation30_spill] sm:$0xff] }
 0x2ba   : > { %7834 = vmatmul.mubr.msk.f32.gmra.mrb[4].mxu0 %vm452_vm1, %v9161_v28  ;;  %v11500_v28 = vld [vmem:[#allocation31_spill] sm:$0xff] }
 0x2bb   : > { %7836 = vmatprep.mubr.msk.f32.mxu0 %vm452_vm1, %v9165_v29  ;;  %v11501_v29 = vld [vmem:[#allocation32_spill] sm:$0xff] }
 0x2be   : > { %7837 = vmatmul.mubr.msk.f32.gmra.mrb[6].mxu0 %vm452_vm1, %v9169_v30  ;;  %v11502_v30 = vld [vmem:[#allocation33_spill] sm:$0xff] }
 0x2bf   : > { %7839 = vmatprep.mubr.msk.f32.mxu0 %vm452_vm1, %v9173_v31  ;;  %v11503_v31 = vld [vmem:[#allocation34_spill] sm:$0xff] }
 0x2c2   : > { %7840 = vmatmul.mubr.msk.f32.gmra.mrb[8].mxu0 %vm452_vm1, %v11452_v32 }
 0x2c3   : > { %7842 = vmatprep.mubr.msk.f32.mxu0 %vm452_vm1, %v9181_v33  ;;  %v11504_v33 = vld [vmem:[#allocation35_spill] sm:$0xff] }
 0x2c6   : > { %7843 = vmatmul.mubr.msk.f32.gmra.mrb[10].mxu0 %vm452_vm1, %v9185_v34  ;;  %v11505_v34 = vld [vmem:[#allocation36_spill] sm:$0xff] }
 0x2c7   : > { %7845 = vmatprep.mubr.msk.f32.mxu0 %vm452_vm1, %v9189_v35  ;;  %v11506_v35 = vld [vmem:[#allocation37_spill] sm:$0xff] }
 0x2ca   : > { %7846 = vmatmul.mubr.msk.f32.gmra.mrb[12].mxu0 %vm452_vm1, %v9193_v36  ;;  %v11507_v36 = vld [vmem:[#allocation38_spill] sm:$0xff] }
 0x2cb   : > { %7848 = vmatprep.mubr.msk.f32.mxu0 %vm452_vm1, %v9089_v4  ;;  %v11486_v4 = vld [vmem:[#allocation2_spill] sm:$0xff] }
 0x2ce   : > { %7849 = vmatmul.mubr.msk.f32.gmra.mrb[14].mxu0 %vm452_vm1, %v9091_v5  ;;  %v11487_v5 = vld [vmem:[#allocation3_spill] sm:$0xff] }
 0x2cf   : > { %7851 = vmatprep.mubr.msk.f32.mxu0 %vm452_vm1, %v9093_v6  ;;  %v11488_v6 = vld [vmem:[#allocation4_spill] sm:$0xff] }
 0x2d2   : > { %7852 = vmatmul.mubr.msk.f32.gmra.mrb[16].mxu0 %vm452_vm1, %v9095_v7  ;;  %v11489_v7 = vld [vmem:[#allocation5_spill] sm:$0xff] }
 0x2d3   : > { %7854 = vmatprep.mubr.msk.f32.mxu0 %vm452_vm1, %v9097_v8  ;;  %v11490_v8 = vld [vmem:[#allocation6_spill] sm:$0xff] }
 0x2d6   : > { %7855 = vmatmul.mubr.msk.f32.gmra.mrb[18].mxu0 %vm452_vm1, %v9099_v9  ;;  %v11491_v9 = vld [vmem:[#allocation7_spill] sm:$0xff] }
 0x2d7   : > { %7857 = vmatprep.mubr.msk.f32.mxu0 %vm452_vm1, %v9101_v10  ;;  %v11492_v10 = vld [vmem:[#allocation8_spill] sm:$0xff] }
 0x2da   : > { %7858 = vmatmul.mubr.msk.f32.gmra.mrb[20].mxu0 %vm452_vm1, %v9103_v11  ;;  %v11493_v11 = vld [vmem:[#allocation9_spill] sm:$0xff] }
 0x2db   : > { %7860 = vmatprep.mubr.msk.f32.mxu0 %vm452_vm1, %v11486_v4 }
 0x2de   : > { %7861 = vmatmul.mubr.msk.f32.gmra.mrb[22].mxu0 %vm452_vm1, %v11487_v5 }
 0x2df   : > { %7863 = vmatprep.mubr.msk.f32.mxu0 %vm452_vm1, %v11488_v6 }
 0x2e2   : > { %7864 = vmatmul.mubr.msk.f32.gmra.mrb[24].mxu0 %vm452_vm1, %v9111_v15  ;;  %v11496_v15 = vld [vmem:[#allocation27_spill] sm:$0xff] }
 0x2e3   : > { %7866 = vmatprep.mubr.msk.f32.mxu0 %vm452_vm1, %v11489_v7 }
 0x2e6   : > { %7867 = vmatmul.mubr.msk.f32.gmra.mrb[26].mxu0 %vm452_vm1, %v11490_v8 }
 0x2e7   : > { %7869 = vmatprep.mubr.msk.f32.mxu0 %vm452_vm1, %v11491_v9 }
 0x2ea   : > { %7870 = vmatmul.mubr.msk.f32.gmra.mrb[28].mxu0 %vm452_vm1, %v11492_v10 }
 0x2eb   : > { %7872 = vmatprep.mubr.msk.f32.mxu0 %vm452_vm1, %v11493_v11 }
 0x2ee   : > { %7873 = vmatmul.mubr.msk.f32.gmra.mrb[30].mxu0 %vm452_vm1, %v11494_v23 }
 0x2ef   : > { %7877 = vmatprep.mubr.msk.f32.mxu0 %vm452_vm1, %v11495_v24 }
 0x2f2   : > { %7878 = vmatmul.mubr.msk.f32.vlgmr.msra.gmra.mrb[0].mxu0 %vm452_vm1, %v11496_v15 }
 0x2f3   : > { %7880 = vmatprep.mubr.msk.f32.mxu0 %vm452_vm1, %v11497_v25  ;;  %8452 = vmatpush3.bf16.msra.mxu0 %v8449_v59 }
 0x2f6   : > { %7881 = vmatmul.mubr.msk.f32.gmra.mrb[2].mxu0 %vm452_vm1, %v11498_v26 }
 0x2f7   : > { %7883 = vmatprep.mubr.msk.f32.mxu0 %vm452_vm1, %v11499_v27 }
 0x2fa   : > { %7884 = vmatmul.mubr.msk.f32.gmra.mrb[4].mxu0 %vm452_vm1, %v11500_v28 }
 0x2fb   : > { %7886 = vmatprep.mubr.msk.f32.mxu0 %vm452_vm1, %v11501_v29 }
 0x2fe   : > { %7887 = vmatmul.mubr.msk.f32.gmra.mrb[6].mxu0 %vm452_vm1, %v11502_v30 }
 0x2ff   : > { %7889 = vmatprep.mubr.msk.f32.mxu0 %vm452_vm1, %v11503_v31 }
 0x302   : > { %7890 = vmatmul.mubr.msk.f32.gmra.mrb[8].mxu0 %vm452_vm1, %v11504_v33 }
 0x303   : > { %7892 = vmatprep.mubr.msk.f32.mxu0 %vm452_vm1, %v11505_v34 }
 0x306   : > { %7893 = vmatmul.mubr.msk.f32.gmra.mrb[10].mxu0 %vm452_vm1, %v11506_v35 }
 0x307   : > { %7895 = vmatprep.mubr.msk.f32.mxu0 %vm452_vm1, %v11507_v36 }
 0x30a   : > { %7896 = vmatmul.mubr.msk.f32.gmra.mrb[12].mxu0 %vm452_vm1, %v11508_v60 }
 0x30b   : > { %7898 = vmatprep.mubr.msk.f32.mxu0 %vm452_vm1, %v11509_v63 }
 0x30e   : > { %7899 = vmatmul.mubr.msk.f32.gmra.mrb[14].mxu0 %vm452_vm1, %v11471_v18 }
 0x30f   : > { %7901 = vmatprep.mubr.msk.f32.mxu0 %vm452_vm1, %v11472_v16  ;;  %v11512_v16 = vld [vmem:[#allocation49_spill] sm:$0xff] }
 0x312   : > { %7902 = vmatmul.mubr.msk.f32.gmra.mrb[16].mxu0 %vm452_vm1, %v11473_v22  ;;  %v3057_v22 = vld [vmem:[%s11216_s3 + $0x10] sm:$0xff] }
 0x313   : > { %7904 = vmatprep.mubr.msk.f32.mxu0 %vm452_vm1, %v11474_v21  ;;  %v11514_v21 = vld [vmem:[#allocation25_spill] sm:$0xff]  ;;  %v8453_v42 = vpack.c.bf16 %v3058_v38, %v3057_v22 }
 0x315   : > { %8454 = vmatprep.subr.bf16.mxu0 %v8453_v42  ;;  %8494 = vmatprep.subr.bf16.mxu1 %v8453_v42 }
 0x316   : > { %7905 = vmatmul.mubr.msk.f32.gmra.mrb[18].mxu0 %vm452_vm1, %v11475_v12  ;;  %v11513_v12 = vld [vmem:[#allocation24_spill] sm:$0xff]  ;;  %8496 = vmatpush3.bf16.msra.mxu1 %v8453_v42 }
 0x317   : > { %7907 = vmatprep.mubr.msk.f32.mxu0 %vm452_vm1, %v11510_v0  ;;  %8456 = vmatpush3.bf16.msra.mxu0 %v8453_v42 }
 0x31a   : > { %7908 = vmatmul.mubr.msk.f32.gmra.mrb[20].mxu0 %vm452_vm1, %v11511_v3 }
 0x31b   : > { %7910 = vmatprep.mubr.msk.f32.mxu0 %vm452_vm1, %v11478_v47 }
 0x31e   : > { %7911 = vmatmul.mubr.msk.f32.gmra.mrb[22].mxu0 %vm452_vm1, %v9599_v57 }
 0x31f   : > { %7913 = vmatprep.mubr.msk.f32.mxu0 %vm452_vm1, %v11512_v16 }
 0x322   : > { %7914 = vmatmul.mubr.msk.f32.gmra.mrb[24].mxu0 %vm452_vm1, %v9611_v46 }
 0x323   : > { %7916 = vmatprep.mubr.msk.f32.mxu0 %vm452_vm1, %v9616_v19 }
 0x326   : > { %7917 = vmatmul.mubr.msk.f32.gmra.mrb[26].mxu0 %vm452_vm1, %v9621_v1 }
 0x327   : > { %7919 = vmatprep.mubr.msk.f32.mxu0 %vm452_vm1, %v11479_v17 }
 0x32a   : > { %7920 = vmatmul.mubr.msk.f32.gmra.mrb[28].mxu0 %vm452_vm1, %v11480_v13  ;;  %v10046_v13 = vld [vmem:[%s11215_s2] ss:$0 sm:$0xff] }
 0x32b   : > { %7922 = vmatprep.mubr.msk.f32.mxu0 %vm452_vm1, %v11513_v12 }
 0x32e   : > { %7923 = vmatmul.mubr.msk.f32.gmra.mrb[30].mxu0 %vm452_vm1, %v11514_v21 }
 0x3c5   : > { %v7879_v17 = vpop.f32.mrb[0].mxu0 }
 0x3c6   : > { %v2992_v45 = vadd.f32 %v7879_v17, %v10046_v13  ;;  %v2794_v50 = vpop.f32.mrb[1].mxu0 }
 0x3c7   : > { %v2991_v53 = vadd.f32 %v10046_v13, %v2794_v50 }
 0x3c8   : > { %v3024_v2 = vmax.f32 %v2992_v45, 0.0 }
 0x3c9   : > { %v3023_v58 = vmax.f32 %v2991_v53, 0.0  ;;  %v7882_v61 = vpop.f32.mrb[2].mxu0 }
 0x3ca   : > { %v2994_v37 = vadd.f32 %v7882_v61, %v10046_v13  ;;  %v2804_v49 = vpop.f32.mrb[3].mxu0 }
 0x3cb   : > { %v2993_v62 = vadd.f32 %v10046_v13, %v2804_v49  ;;  %7933 = vmatprep.mubr.msk.f32.mxu0 %vm3066_vm4, %v3023_v58 }
 0x3cc   : > { %7934 = vmatmul.mubr.msk.f32.vlgmr.msra.gmra.mrb[32].mxu0 %vm3066_vm4, %v3024_v2  ;;  %v3026_v57 = vmax.f32 %v2994_v37, 0.0 }
 0x3cd   : > { %v3025_v40 = vmax.f32 %v2993_v62, 0.0  ;;  %v7885_v18 = vpop.f32.mrb[4].mxu0 }
 0x3ce   : > { %v2996_v46 = vadd.f32 %v7885_v18, %v10046_v13  ;;  %v2814_v41 = vpop.f32.mrb[5].mxu0 }
 0x3cf   : > { %v2995_v19 = vadd.f32 %v10046_v13, %v2814_v41  ;;  %7936 = vmatprep.mubr.msk.f32.mxu0 %vm3066_vm4, %v3025_v40 }
 0x3d0   : > { %7937 = vmatmul.mubr.msk.f32.gmra.mrb[34].mxu0 %vm3066_vm4, %v3026_v57  ;;  %v3028_v20 = vmax.f32 %v2996_v46, 0.0 }
 0x3d1   : > { %v3027_v1 = vmax.f32 %v2995_v19, 0.0  ;;  %v7888_v43 = vpop.f32.mrb[6].mxu0 }
 0x3d2   : > { %v2998_v54 = vadd.f32 %v7888_v43, %v10046_v13  ;;  %v2824_v39 = vpop.f32.mrb[7].mxu0 }
 0x3d3   : > { %v2997_v32 = vadd.f32 %v10046_v13, %v2824_v39  ;;  %7939 = vmatprep.mubr.msk.f32.mxu0 %vm3066_vm4, %v3027_v1 }
 0x3d4   : > { %7940 = vmatmul.mubr.msk.f32.gmra.mrb[36].mxu0 %vm3066_vm4, %v3028_v20  ;;  %v3030_v48 = vmax.f32 %v2998_v54, 0.0 }
 0x3d5   : > { %v3029_v47 = vmax.f32 %v2997_v32, 0.0  ;;  %v7891_v14 = vpop.f32.mrb[8].mxu0 }
 0x3d6   : > { %v3000_v51 = vadd.f32 %v7891_v14, %v10046_v13  ;;  %v2834_v52 = vpop.f32.mrb[9].mxu0 }
 0x3d7   : > { %v2999_v55 = vadd.f32 %v10046_v13, %v2834_v52  ;;  %7942 = vmatprep.mubr.msk.f32.mxu0 %vm3066_vm4, %v3029_v47 }
 0x3d8   : > { %7943 = vmatmul.mubr.msk.f32.gmra.mrb[38].mxu0 %vm3066_vm4, %v3030_v48  ;;  %v3032_v59 = vmax.f32 %v3000_v51, 0.0 }
 0x3d9   : > { %v3031_v56 = vmax.f32 %v2999_v55, 0.0  ;;  %v7894_v44 = vpop.f32.mrb[10].mxu0 }
 0x3da   : > { %v3002_v4 = vadd.f32 %v7894_v44, %v10046_v13  ;;  %v2844_v5 = vpop.f32.mrb[11].mxu0 }
 0x3db   : > { %v3001_v6 = vadd.f32 %v10046_v13, %v2844_v5  ;;  %7945 = vmatprep.mubr.msk.f32.mxu0 %vm3066_vm4, %v3031_v56 }
 0x3dc   : > { %7946 = vmatmul.mubr.msk.f32.gmra.mrb[40].mxu0 %vm3066_vm4, %v3032_v59  ;;  %v3034_v9 = vmax.f32 %v3002_v4, 0.0 }
 0x3dd   : > { %v3033_v7 = vmax.f32 %v3001_v6, 0.0  ;;  %v7897_v8 = vpop.f32.mrb[12].mxu0  ;;  %v3422_v6 = vld [vmem:[%s11218_s5 + $0x10] sm:$0xff] }
 0x3de   : > { %v3004_v10 = vadd.f32 %v7897_v8, %v10046_v13  ;;  %v2854_v11 = vpop.f32.mrb[13].mxu0 }
 0x3df   : > { %v3003_v23 = vadd.f32 %v10046_v13, %v2854_v11  ;;  %7948 = vmatprep.mubr.msk.f32.mxu0 %vm3066_vm4, %v3033_v7  ;;  %v3423_v7 = vld [vmem:[%s11218_s5 + $0x18] sm:$0xff] }
 0x3e0   : > { %7949 = vmatmul.mubr.msk.f32.gmra.mrb[42].mxu0 %vm3066_vm4, %v3034_v9  ;;  %v3036_v25 = vmax.f32 %v3004_v10, 0.0  ;;  %v8457_v8 = vpack.c.bf16 %v3423_v7, %v3422_v6  ;;  %v3421_v9 = vld [vmem:[%s11218_s5 + $0x8] sm:$0xff] }
 0x3e1   : > { %v3035_v24 = vmax.f32 %v3003_v23, 0.0  ;;  %v7900_v15 = vpop.f32.mrb[14].mxu0 }
 0x3e2   : > { %v3006_v26 = vadd.f32 %v7900_v15, %v10046_v13  ;;  %v2864_v27 = vpop.f32.mrb[15].mxu0  ;;  %8458 = vmatprep.subr.bf16.mxu1 %v8457_v8 }
 0x3e3   : > { %v3005_v28 = vadd.f32 %v10046_v13, %v2864_v27  ;;  %7951 = vmatprep.mubr.msk.f32.mxu0 %vm3066_vm4, %v3035_v24 }
 0x3e4   : > { %7952 = vmatmul.mubr.msk.f32.gmra.mrb[44].mxu0 %vm3066_vm4, %v3036_v25  ;;  %v3038_v31 = vmax.f32 %v3006_v26, 0.0 }
 0x3e5   : > { %v3037_v29 = vmax.f32 %v3005_v28, 0.0  ;;  %v7903_v30 = vpop.f32.mrb[16].mxu0 }
 0x3e6   : > { %v3008_v33 = vadd.f32 %v7903_v30, %v10046_v13  ;;  %v2874_v34 = vpop.f32.mrb[17].mxu0 }
 0x3e7   : > { %v3007_v35 = vadd.f32 %v10046_v13, %v2874_v34  ;;  %7954 = vmatprep.mubr.msk.f32.mxu0 %vm3066_vm4, %v3037_v29 }
 0x3e8   : > { %7955 = vmatmul.mubr.msk.f32.gmra.mrb[46].mxu0 %vm3066_vm4, %v3038_v31  ;;  %v3040_v63 = vmax.f32 %v3008_v33, 0.0 }
 0x3e9   : > { %v3039_v36 = vmax.f32 %v3007_v35, 0.0  ;;  %v7906_v60 = vpop.f32.mrb[18].mxu0 }
 0x3ea   : > { %v3010_v0 = vadd.f32 %v7906_v60, %v10046_v13  ;;  %v2884_v3 = vpop.f32.mrb[19].mxu0 }
 0x3eb   : > { %v3009_v16 = vadd.f32 %v10046_v13, %v2884_v3  ;;  %7957 = vmatprep.mubr.msk.f32.mxu1 %vm3066_vm4, %v3039_v36 }
 0x3ec   : > { %7958 = vmatmul.mubr.msk.f32.vlgmr.msra.gmra.mrb[0].mxu1 %vm3066_vm4, %v3040_v63  ;;  %v3042_v22 = vmax.f32 %v3010_v0, 0.0 }
 0x3ed   : > { %v3041_v12 = vmax.f32 %v3009_v16, 0.0  ;;  %v7909_v21 = vpop.f32.mrb[20].mxu0  ;;  %8460 = vmatpush3.bf16.msra.mxu1 %v8457_v8 }
 0x3ee   : > { %v3012_v38 = vadd.f32 %v7909_v21, %v10046_v13  ;;  %v2894_v42 = vpop.f32.mrb[21].mxu0 }
 0x3ef   : > { %v3011_v17 = vadd.f32 %v10046_v13, %v2894_v42  ;;  %7960 = vmatprep.mubr.msk.f32.mxu1 %vm3066_vm4, %v3041_v12 }
 0x3f0   : > { %7961 = vmatmul.mubr.msk.f32.gmra.mrb[2].mxu1 %vm3066_vm4, %v3042_v22  ;;  %v3044_v53 = vmax.f32 %v3012_v38, 0.0 }
 0x3f1   : > { %v3043_v45 = vmax.f32 %v3011_v17, 0.0  ;;  %v7912_v50 = vpop.f32.mrb[22].mxu0 }
 0x3f2   : > { %v3014_v58 = vadd.f32 %v7912_v50, %v10046_v13  ;;  %v2904_v61 = vpop.f32.mrb[23].mxu0 }
 0x3f3   : > { %v3013_v2 = vadd.f32 %v10046_v13, %v2904_v61  ;;  %7963 = vmatprep.mubr.msk.f32.mxu1 %vm3066_vm4, %v3043_v45  ;;  %v10165_v61 = vld [vmem:[%s11217_s4] ss:$0 sm:$0xff] }
 0x3f4   : > { %7964 = vmatmul.mubr.msk.f32.gmra.mrb[4].mxu1 %vm3066_vm4, %v3044_v53  ;;  %v3046_v62 = vmax.f32 %v3014_v58, 0.0 }
 0x3f5   : > { %v3045_v37 = vmax.f32 %v3013_v2, 0.0  ;;  %v7915_v49 = vpop.f32.mrb[24].mxu0 }
 0x3f6   : > { %v3016_v40 = vadd.f32 %v7915_v49, %v10046_v13  ;;  %v2914_v18 = vpop.f32.mrb[25].mxu0 }
 0x3f7   : > { %v3015_v57 = vadd.f32 %v10046_v13, %v2914_v18  ;;  %7966 = vmatprep.mubr.msk.f32.mxu1 %vm3066_vm4, %v3045_v37  ;;  %v3424_v18 = vld [vmem:[%s11218_s5 + $0x20] sm:$0xff] }
 0x3f8   : > { %7967 = vmatmul.mubr.msk.f32.gmra.mrb[6].mxu1 %vm3066_vm4, %v3046_v62  ;;  %v3048_v19 = vmax.f32 %v3016_v40, 0.0 }
 0x3f9   : > { %v3047_v46 = vmax.f32 %v3015_v57, 0.0  ;;  %v7918_v41 = vpop.f32.mrb[26].mxu0  ;;  %v3425_v57 = vld [vmem:[%s11218_s5 + $0x28] sm:$0xff] }
 0x3fa   : > { %v3018_v1 = vadd.f32 %v7918_v41, %v10046_v13  ;;  %v2924_v43 = vpop.f32.mrb[27].mxu0 }
 0x3fb   : > { %v3017_v20 = vadd.f32 %v10046_v13, %v2924_v43  ;;  %7969 = vmatprep.mubr.msk.f32.mxu1 %vm3066_vm4, %v3047_v46 }
 0x3fc   : > { %7970 = vmatmul.mubr.msk.f32.gmra.mrb[8].mxu1 %vm3066_vm4, %v3048_v19  ;;  %v3050_v32 = vmax.f32 %v3018_v1, 0.0  ;;  %v10181_v1 = vpack.c.bf16 %v3425_v57, %v3424_v18 }
 0x3fd   : > { %v3049_v54 = vmax.f32 %v3017_v20, 0.0  ;;  %v7921_v39 = vpop.f32.mrb[28].mxu0 }
 0x3fe   : > { %v3020_v47 = vadd.f32 %v7921_v39, %v10046_v13  ;;  %v2934_v14 = vpop.f32.mrb[29].mxu0 }
 0x3ff   : > { %v3019_v48 = vadd.f32 %v10046_v13, %v2934_v14  ;;  %7972 = vmatprep.mubr.msk.f32.mxu1 %vm3066_vm4, %v3049_v54 }
 0x400   : > { %7973 = vmatmul.mubr.msk.f32.gmra.mrb[10].mxu1 %vm3066_vm4, %v3050_v32  ;;  %v3052_v55 = vmax.f32 %v3020_v47, 0.0 }
 0x401   : > { %v3051_v51 = vmax.f32 %v3019_v48, 0.0  ;;  %v7924_v52 = vpop.f32.mrb[30].mxu0 }
 0x402   : > { %v3022_v56 = vadd.f32 %v7924_v52, %v10046_v13  ;;  %v2944_v44 = vpop.f32.mrb[31].mxu0 }
 0x403   : > { %v3021_v59 = vadd.f32 %v10046_v13, %v2944_v44  ;;  %7975 = vmatprep.mubr.msk.f32.mxu1 %vm3066_vm4, %v3051_v51  ;;  %v3420_v13 = vld [vmem:[%s11218_s5] sm:$0xff] }
 0x404   : > { %7976 = vmatmul.mubr.msk.f32.gmra.mrb[12].mxu1 %vm3066_vm4, %v3052_v55  ;;  %v3054_v5 = vmax.f32 %v3022_v56, 0.0  ;;  %v8461_v10 = vpack.c.bf16 %v3421_v9, %v3420_v13 }
 0x405   : > { %v3053_v4 = vmax.f32 %v3021_v59, 0.0 }
 0x406   : > { %8462 = vmatprep.subr.bf16.mxu1 %v8461_v10 }
 0x407   : > { %7978 = vmatprep.mubr.msk.f32.mxu1 %vm3066_vm4, %v3053_v4 }
 0x408   : > { %7979 = vmatmul.mubr.msk.f32.gmra.mrb[14].mxu1 %vm3066_vm4, %v3054_v5 }
 0x49f   : > { %v7935_v11 = vpop.f32.mrb[32].mxu0 }
 0x4a0   : > { %v3229_v23 = vpop.f32.mrb[33].mxu0  ;;  %v3235_v41 = vadd.f32 %v7935_v11, %v10165_v61 }
 0x4a1   : > { %v3230_v62 = vadd.f32 %v10165_v61, %v3229_v23 }
 0x4a2   : > { %v10192_v54 = vmax.f32 %v3235_v41, 0.0 }
 0x4a3   : > { %v7938_v24 = vpop.f32.mrb[34].mxu0  ;;  %v10183_v43 = vmax.f32 %v3230_v62, 0.0 }
 0x4a4   : > { %v3239_v15 = vpop.f32.mrb[35].mxu0  ;;  %11518 = vst [vmem:[#allocation12_spill] sm:$0xff] %v10192_v54  ;;  %v3245_v39 = vadd.f32 %v7938_v24, %v10165_v61 }
 0x4a5   : > { %11517 = vst [vmem:[#allocation21_spill] sm:$0xff] %v10183_v43  ;;  %v3240_v20 = vadd.f32 %v10165_v61, %v3239_v15 }
 0x4a6   : > { %v10203_v14 = vmax.f32 %v3245_v39, 0.0  ;;  %v3426_v39 = vld [vmem:[%s11218_s5 + $0x30] sm:$0xff] }
 0x4a7   : > { %v7941_v25 = vpop.f32.mrb[36].mxu0  ;;  %v10196_v32 = vmax.f32 %v3240_v20, 0.0 }
 0x4a8   : > { %v3249_v26 = vpop.f32.mrb[37].mxu0  ;;  %v3255_v48 = vadd.f32 %v7941_v25, %v10165_v61 }
 0x4a9   : > { %v3250_v47 = vadd.f32 %v10165_v61, %v3249_v26 }
 0x4aa   : > { %v10213_v55 = vmax.f32 %v3255_v48, 0.0  ;;  %v3476_v48 = vrot.slane %v10183_v43, 7 }
 0x4ab   : > { %v7944_v27 = vpop.f32.mrb[38].mxu0  ;;  %v10206_v51 = vmax.f32 %v3250_v47, 0.0  ;;  %v3475_v47 = vrot.slane %v10192_v54, 7 }
 0x4ac   : > { %v3259_v28 = vpop.f32.mrb[39].mxu0  ;;  %v3265_v56 = vadd.f32 %v7944_v27, %v10165_v61 }
 0x4ad   : > { %v3260_v52 = vadd.f32 %v10165_v61, %v3259_v28 }
 0x4ae   : > { %v10223_v4 = vmax.f32 %v3265_v56, 0.0 }
 0x4af   : > { %v7947_v29 = vpop.f32.mrb[40].mxu0  ;;  %v10216_v44 = vmax.f32 %v3260_v52, 0.0 }
 0x4b0   : > { %v3269_v30 = vpop.f32.mrb[41].mxu0  ;;  %v3275_v5 = vadd.f32 %v7947_v29, %v10165_v61 }
 0x4b1   : > { %v3270_v59 = vadd.f32 %v10165_v61, %v3269_v30 }
 0x4b2   : > { %v10233_v8 = vmax.f32 %v3275_v5, 0.0  ;;  %v3479_v5 = vrot.slane %v10203_v14, 7 }
 0x4b3   : > { %v10124_v31 = vpop.f32.mrb[42].mxu0  ;;  %v10226_v6 = vmax.f32 %v3270_v59, 0.0  ;;  %v10378_v59 = vsel %vm385_vm2, %v3475_v47, %v3476_v48 }
 0x4b4   : > { %v3279_v33 = vpop.f32.mrb[43].mxu0  ;;  %v3285_v13 = vadd.f32 %v10124_v31, %v10165_v61  ;;  %11524 = vst [vmem:[#allocation44_spill] sm:$0xff] %v10378_v59 }
 0x4b5   : > { %v3280_v7 = vadd.f32 %v10165_v61, %v3279_v33 }
 0x4b6   : > { %v10245_v11 = vmax.f32 %v3285_v13, 0.0  ;;  %v10387_v13 = vsel %vm385_vm2, %v3476_v48, %v3475_v47 }
 0x4b7   : > { %v10126_v34 = vpop.f32.mrb[44].mxu0  ;;  %v10237_v9 = vmax.f32 %v3280_v7, 0.0  ;;  %v3480_v7 = vrot.slane %v10196_v32, 7  ;;  %11525 = vst [vmem:[#allocation45_spill] sm:$0xff] %v10387_v13 }
 0x4b8   : > { %v10128_v35 = vpop.f32.mrb[45].mxu0  ;;  %v3295_v23 = vadd.f32 %v10126_v34, %v10165_v61 }
 0x4ba   : > { %v10257_v25 = vmax.f32 %v3295_v23, 0.0  ;;  %v3483_v23 = vrot.slane %v10213_v55, 7 }
 0x4bb   : > { %v10130_v36 = vpop.f32.mrb[46].mxu0 }
 0x4bc   : > { %v10132_v60 = vpop.f32.mrb[47].mxu0  ;;  %v3305_v26 = vadd.f32 %v10130_v36, %v10165_v61 }
 0x4bd   : > { %v3300_v15 = vadd.f32 %v10165_v61, %v10132_v60 }
 0x4be   : > { %v10269_v29 = vmax.f32 %v3305_v26, 0.0 }
 0x4bf   : > { %v10134_v63 = vpop.f32.mrb[0].mxu1  ;;  %v10261_v27 = vmax.f32 %v3300_v15, 0.0  ;;  %v3484_v15 = vrot.slane %v10206_v51, 7 }
 0x4c0   : > { %v10136_v0 = vpop.f32.mrb[1].mxu1  ;;  %v3315_v30 = vadd.f32 %v10134_v63, %v10165_v61 }
 0x4c1   : > { %v3310_v28 = vadd.f32 %v10165_v61, %v10136_v0  ;;  %v10404_v26 = vsel %vm385_vm2, %v3483_v23, %v3484_v15 }
 0x4c2   : > { %v10281_v34 = vmax.f32 %v3315_v30, 0.0  ;;  %v3488_v30 = vrot.slane %v10216_v44, 7 }
 0x4c3   : > { %v10138_v3 = vpop.f32.mrb[2].mxu1  ;;  %v10273_v31 = vmax.f32 %v3310_v28, 0.0  ;;  %v3487_v28 = vrot.slane %v10223_v4, 7 }
 0x4c4   : > { %v10140_v16 = vpop.f32.mrb[3].mxu1 }
 0x4c5   : > { %v3320_v33 = vadd.f32 %v10165_v61, %v10140_v16 }
 0x4c7   : > { %v10142_v12 = vpop.f32.mrb[4].mxu1  ;;  %v10285_v36 = vmax.f32 %v3320_v33, 0.0  ;;  %v10411_v33 = vsel %vm385_vm2, %v3484_v15, %v3483_v23 }
 0x4c8   : > { %v10144_v21 = vpop.f32.mrb[5].mxu1  ;;  %v3335_v0 = vadd.f32 %v10142_v12, %v10165_v61 }
 0x4c9   : > { %v3330_v60 = vadd.f32 %v10165_v61, %v10144_v21 }
 0x4ca   : > { %v10305_v21 = vmax.f32 %v3335_v0, 0.0  ;;  %v3492_v0 = vrot.slane %v10226_v6, 7 }
 0x4cb   : > { %v10146_v22 = vpop.f32.mrb[6].mxu1  ;;  %v10297_v16 = vmax.f32 %v3330_v60, 0.0  ;;  %v3491_v60 = vrot.slane %v10233_v8, 7 }
 0x4cc   : > { %v10148_v38 = vpop.f32.mrb[7].mxu1 }
 0x4cf   : > { %v10150_v42 = vpop.f32.mrb[8].mxu1 }
 0x4d0   : > { %v10152_v17 = vpop.f32.mrb[9].mxu1 }
 0x4d1   : > { %v3350_v12 = vadd.f32 %v10165_v61, %v10152_v17 }
 0x4d3   : > { %v10154_v45 = vpop.f32.mrb[10].mxu1  ;;  %v10321_v62 = vmax.f32 %v3350_v12, 0.0  ;;  %v3495_v12 = vrot.slane %v10245_v11, 7 }
 0x4d4   : > { %v10156_v50 = vpop.f32.mrb[11].mxu1 }
 0x4d7   : > { %v10158_v53 = vpop.f32.mrb[12].mxu1 }
 0x4d8   : > { %v10160_v58 = vpop.f32.mrb[13].mxu1  ;;  %v3375_v57 = vadd.f32 %v10158_v53, %v10165_v61  ;;  %v3427_v53 = vld [vmem:[%s11218_s5 + $0x38] sm:$0xff] }
 0x4d9   : > { %v10370_v52 = vpack.c.bf16 %v3427_v53, %v3426_v39  ;;  %v3503_v39 = vrot.slane %v10269_v29, 7  ;;  %v3504_v53 = vrot.slane %v10261_v27, 7 }
 0x4da   : > { %v10353_v20 = vmax.f32 %v3375_v57, 0.0 }
 0x4db   : > { %v7980_v2 = vpop.f32.mrb[14].mxu1  ;;  %v10464_v48 = vsel %vm385_vm2, %v3503_v39, %v3504_v53  ;;  %v10471_v23 = vsel %vm385_vm2, %v3504_v53, %v3503_v39 }
 0x4dc   : > { %v3385_v37 = vadd.f32 %v7980_v2, %v10165_v61  ;;  %v3379_v49 = vpop.f32.mrb[15].mxu1  ;;  %v3345_v2 = vadd.f32 %v10146_v22, %v10165_v61  ;;  %v3360_v22 = vadd.f32 %v10165_v61, %v10156_v50  ;;  %11521 = vst [vmem:[#allocation41_spill] sm:$0xff] %v10353_v20 }
 0x4dd   : > { %v3380_v40 = vadd.f32 %v10165_v61, %v3379_v49  ;;  %v3355_v49 = vadd.f32 %v10150_v42, %v10165_v61  ;;  %v3370_v42 = vadd.f32 %v10165_v61, %v10160_v58 }
 0x4de   : > { %v10179_v19 = vmax.f32 %v3385_v37, 0.0  ;;  %v10333_v18 = vmax.f32 %v3360_v22, 0.0  ;;  %v10435_v22 = vsel %vm385_vm2, %v3492_v0, %v3491_v60 }
 0x4df   : > { %v10176_v46 = vmax.f32 %v3380_v40, 0.0  ;;  %v10329_v17 = vmax.f32 %v3355_v49, 0.0  ;;  %v3365_v40 = vadd.f32 %v10154_v45, %v10165_v61  ;;  %v10345_v41 = vmax.f32 %v3370_v42, 0.0 }
 0x4e0   : > { %11516 = vst [vmem:[#allocation19_spill] sm:$0xff] %v10179_v19  ;;  %v3471_v45 = vrot.slane %v10179_v19, 7  ;;  %v3496_v49 = vrot.slane %v10237_v9, 7  ;;  %v3499_v42 = vrot.slane %v10257_v25, 7 }
 0x4e1   : > { %11515 = vst [vmem:[#allocation18_spill] sm:$0xff] %v10176_v46  ;;  %7985 = vmatprep.mubr.msk.f32.mxu1 %vm3535_vm5, %v10176_v46  ;;  %v10341_v50 = vmax.f32 %v3365_v40, 0.0  ;;  %11520 = vst [vmem:[#allocation11_spill] sm:$0xff] %v10345_v41  ;;  %v3472_v58 = vrot.slane %v10176_v46, 7 }
 0x4e2   : > { %7986 = vmatmul.mubr.msk.f32.vlgmr.msra.gmra.mrb[16].mxu1 %vm3535_vm5, %v10179_v19  ;;  %v10440_v40 = vsel %vm385_vm2, %v3495_v12, %v3496_v49 }
 0x4e3   : > { %8464 = vmatpush3.bf16.msra.mxu1 %v8461_v10  ;;  %7988 = vmatprep.mubr.msk.f32.mxu1 %vm3535_vm5, %v10183_v43  ;;  %v3290_v10 = vadd.f32 %v10165_v61, %v10128_v35  ;;  %v3325_v35 = vadd.f32 %v10138_v3, %v10165_v61  ;;  %v3340_v3 = vadd.f32 %v10165_v61, %v10148_v38  ;;  %v10317_v38 = vmax.f32 %v3345_v2, 0.0 }
 0x4e4   : > { %8466 = vmatprep.subr.bf16.mxu1 %v10181_v1  ;;  %11519 = vst [vmem:[#allocation13_spill] sm:$0xff] %v10341_v50  ;;  %v10364_v61 = vsel %vm385_vm2, %v3471_v45, %v3472_v58  ;;  %v10373_v56 = vsel %vm385_vm2, %v3472_v58, %v3471_v45  ;;  %v10428_v2 = vsel %vm385_vm2, %v3491_v60, %v3492_v0 }
 0x4e5   : > { %v10249_v24 = vmax.f32 %v3290_v10, 0.0  ;;  %v10293_v63 = vmax.f32 %v3325_v35, 0.0  ;;  %v10309_v37 = vmax.f32 %v3340_v3, 0.0  ;;  %11522 = vst [vmem:[#allocation42_spill] sm:$0xff] %v10364_v61  ;;  %11523 = vst [vmem:[#allocation43_spill] sm:$0xff] %v10373_v56  ;;  %v10392_v10 = vsel %vm385_vm2, %v3479_v5, %v3480_v7 }
 0x4e6   : > { %7989 = vmatmul.mubr.msk.f32.gmra.mrb[18].mxu1 %vm3535_vm5, %v10192_v54  ;;  %v10416_v35 = vsel %vm385_vm2, %v3487_v28, %v3488_v30  ;;  %v10423_v3 = vsel %vm385_vm2, %v3488_v30, %v3487_v28  ;;  %v10447_v45 = vsel %vm385_vm2, %v3496_v49, %v3495_v12  ;;  %v3512_v30 = vrot.slane %v10285_v36, 7 }
 0x4e7   : > { %7991 = vmatprep.mubr.msk.f32.mxu1 %vm3535_vm5, %v10196_v32  ;;  %v3500_v57 = vrot.slane %v10249_v24, 7  ;;  %v3511_v28 = vrot.slane %v10293_v63, 7  ;;  %v3515_v12 = vrot.slane %v10305_v21, 7  ;;  %v3516_v49 = vrot.slane %v10297_v16, 7 }
 0x4e8   : > { %v3519_v39 = vrot.slane %v10317_v38, 7  ;;  %v3520_v53 = vrot.slane %v10309_v37, 7 }
 0x4e9   : > { %v10452_v58 = vsel %vm385_vm2, %v3499_v42, %v3500_v57  ;;  %v10459_v47 = vsel %vm385_vm2, %v3500_v57, %v3499_v42  ;;  %v10488_v0 = vsel %vm385_vm2, %v3511_v28, %v3512_v30  ;;  %v10495_v42 = vsel %vm385_vm2, %v3512_v30, %v3511_v28 }
 0x4ea   : > { %7992 = vmatmul.mubr.msk.f32.gmra.mrb[20].mxu1 %vm3535_vm5, %v10203_v14  ;;  %v10500_v57 = vsel %vm385_vm2, %v3515_v12, %v3516_v49  ;;  %v3523_v28 = vrot.slane %v10329_v17, 7  ;;  %v3524_v30 = vrot.slane %v10321_v62, 7 }
 0x4eb   : > { %7994 = vmatprep.mubr.msk.f32.mxu1 %vm3535_vm5, %v10206_v51 }
 0x4ee   : > { %7995 = vmatmul.mubr.msk.f32.gmra.mrb[22].mxu1 %vm3535_vm5, %v10213_v55 }
 0x4ef   : > { %7997 = vmatprep.mubr.msk.f32.mxu1 %vm3535_vm5, %v10216_v44 }
 0x4f2   : > { %7998 = vmatmul.mubr.msk.f32.gmra.mrb[24].mxu1 %vm3535_vm5, %v10223_v4 }
 0x4f3   : > { %8000 = vmatprep.mubr.msk.f32.mxu1 %vm3535_vm5, %v10226_v6 }
 0x4f6   : > { %8001 = vmatmul.mubr.msk.f32.gmra.mrb[26].mxu1 %vm3535_vm5, %v10233_v8 }
 0x4f7   : > { %8003 = vmatprep.mubr.msk.f32.mxu1 %vm3535_vm5, %v10237_v9 }
 0x4fa   : > { %8004 = vmatmul.mubr.msk.f32.gmra.mrb[28].mxu1 %vm3535_vm5, %v10245_v11 }
 0x4fb   : > { %8006 = vmatprep.mubr.msk.f32.mxu1 %vm3535_vm5, %v10249_v24 }
 0x4fe   : > { %8007 = vmatmul.mubr.msk.f32.gmra.mrb[30].mxu1 %vm3535_vm5, %v10257_v25 }
 0x4ff   : > { %8009 = vmatprep.mubr.msk.f32.mxu1 %vm3535_vm5, %v10261_v27 }
 0x502   : > { %8010 = vmatmul.mubr.msk.f32.gmra.mrb[32].mxu1 %vm3535_vm5, %v10269_v29 }
 0x503   : > { %8012 = vmatprep.mubr.msk.f32.mxu1 %vm3535_vm5, %v10273_v31 }
 0x506   : > { %8013 = vmatmul.mubr.msk.f32.gmra.mrb[34].mxu1 %vm3535_vm5, %v10281_v34 }
 0x507   : > { %8015 = vmatprep.mubr.msk.f32.mxu1 %vm3535_vm5, %v10285_v36 }
 0x50a   : > { %8016 = vmatmul.mubr.msk.f32.gmra.mrb[36].mxu1 %vm3535_vm5, %v10293_v63 }
 0x50b   : > { %8018 = vmatprep.mubr.msk.f32.mxu1 %vm3535_vm5, %v10297_v16 }
 0x50e   : > { %8019 = vmatmul.mubr.msk.f32.gmra.mrb[38].mxu1 %vm3535_vm5, %v10305_v21 }
 0x50f   : > { %8021 = vmatprep.mubr.msk.f32.mxu1 %vm3535_vm5, %v10309_v37 }
 0x512   : > { %8022 = vmatmul.mubr.msk.f32.gmra.mrb[40].mxu1 %vm3535_vm5, %v10317_v38 }
 0x513   : > { %8024 = vmatprep.mubr.msk.f32.mxu1 %vm3535_vm5, %v10321_v62 }
 0x516   : > { %8025 = vmatmul.mubr.msk.f32.gmra.mrb[42].mxu1 %vm3535_vm5, %v10329_v17 }
 0x517   : > { %8027 = vmatprep.mubr.msk.f32.mxu1 %vm3535_vm5, %v10333_v18 }
 0x51a   : > { %8028 = vmatmul.mubr.msk.f32.gmra.mrb[44].mxu1 %vm3535_vm5, %v10341_v50 }
 0x51b   : > { %8030 = vmatprep.mubr.msk.f32.mxu1 %vm3535_vm5, %v10345_v41 }
 0x51e   : > { %8031 = vmatmul.mubr.msk.f32.gmra.mrb[46].mxu1 %vm3535_vm5, %v10353_v20 }
 0x51f   : > { %8037 = vmatprep.mubr.msk.f32.mxu1 %vm3535_vm5, %v10364_v61  ;;  %v3528_v61 = vrot.slane %v10333_v18, 7 }
 0x522   : > { %8038 = vmatmul.mubr.msk.f32.vlgmr.msra.gmra.mrb[16].mxu1 %vm3535_vm5, %v10373_v56  ;;  %v10519_v56 = vsel %vm385_vm2, %v3520_v53, %v3519_v39 }
 0x523   : > { %8468 = vmatpush3.bf16.msra.mxu1 %v10181_v1  ;;  %8040 = vmatprep.mubr.msk.f32.mxu1 %vm3535_vm5, %v10378_v59  ;;  %v10399_v1 = vsel %vm385_vm2, %v3480_v7, %v3479_v5  ;;  %v3507_v5 = vrot.slane %v10281_v34, 7  ;;  %v3508_v7 = vrot.slane %v10273_v31, 7  ;;  %11528 = vst [vmem:[#allocation23_spill] sm:$0xff] %v10519_v56 }
 0x524   : > { %8470 = vmatprep.subr.bf16.mxu1 %v10370_v52 }
 0x525   : > { %v10476_v15 = vsel %vm385_vm2, %v3507_v5, %v3508_v7  ;;  %v10483_v60 = vsel %vm385_vm2, %v3508_v7, %v3507_v5  ;;  %v10507_v5 = vsel %vm385_vm2, %v3516_v49, %v3515_v12  ;;  %v10512_v7 = vsel %vm385_vm2, %v3519_v39, %v3520_v53 }
 0x526   : > { %8041 = vmatmul.mubr.msk.f32.gmra.mrb[18].mxu1 %vm3535_vm5, %v10387_v13  ;;  %11526 = vst [vmem:[#allocation48_spill] sm:$0xff] %v10507_v5  ;;  %11527 = vst [vmem:[#allocation22_spill] sm:$0xff] %v10512_v7  ;;  %v10524_v12 = vsel %vm385_vm2, %v3523_v28, %v3524_v30  ;;  %v3527_v49 = vrot.slane %v10341_v50, 7  ;;  %v3531_v53 = vrot.slane %v10353_v20, 7 }
 0x527   : > { %8043 = vmatprep.mubr.msk.f32.mxu1 %vm3535_vm5, %v10392_v10  ;;  %11529 = vst [vmem:[#allocation16_spill] sm:$0xff] %v10524_v12 }
 0x528   : > { %v10536_v39 = vsel %vm385_vm2, %v3527_v49, %v3528_v61 }
 0x529   : > { %11531 = vst [vmem:[#allocation20_spill] sm:$0xff] %v10536_v39 }
 0x52a   : > { %8044 = vmatmul.mubr.msk.f32.gmra.mrb[20].mxu1 %vm3535_vm5, %v10399_v1 }
 0x52b   : > { %8046 = vmatprep.mubr.msk.f32.mxu1 %vm3535_vm5, %v10404_v26 }
 0x52e   : > { %8047 = vmatmul.mubr.msk.f32.gmra.mrb[22].mxu1 %vm3535_vm5, %v10411_v33 }
 0x52f   : > { %8049 = vmatprep.mubr.msk.f32.mxu1 %vm3535_vm5, %v10416_v35 }
 0x532   : > { %8050 = vmatmul.mubr.msk.f32.gmra.mrb[24].mxu1 %vm3535_vm5, %v10423_v3 }
 0x533   : > { %8052 = vmatprep.mubr.msk.f32.mxu1 %vm3535_vm5, %v10428_v2 }
 0x536   : > { %8053 = vmatmul.mubr.msk.f32.gmra.mrb[26].mxu1 %vm3535_vm5, %v10435_v22 }
 0x537   : > { %8055 = vmatprep.mubr.msk.f32.mxu1 %vm3535_vm5, %v10440_v40 }
 0x53a   : > { %8056 = vmatmul.mubr.msk.f32.gmra.mrb[28].mxu1 %vm3535_vm5, %v10447_v45 }
 0x53b   : > { %8058 = vmatprep.mubr.msk.f32.mxu1 %vm3535_vm5, %v10452_v58 }
 0x53e   : > { %8059 = vmatmul.mubr.msk.f32.gmra.mrb[30].mxu1 %vm3535_vm5, %v10459_v47 }
 0x53f   : > { %8061 = vmatprep.mubr.msk.f32.mxu1 %vm3535_vm5, %v10464_v48 }
 0x542   : > { %8062 = vmatmul.mubr.msk.f32.gmra.mrb[32].mxu1 %vm3535_vm5, %v10471_v23 }
 0x543   : > { %8064 = vmatprep.mubr.msk.f32.mxu1 %vm3535_vm5, %v10476_v15 }
 0x546   : > { %8065 = vmatmul.mubr.msk.f32.gmra.mrb[34].mxu1 %vm3535_vm5, %v10483_v60 }
 0x547   : > { %8067 = vmatprep.mubr.msk.f32.mxu1 %vm3535_vm5, %v10488_v0 }
 0x54a   : > { %8068 = vmatmul.mubr.msk.f32.gmra.mrb[36].mxu1 %vm3535_vm5, %v10495_v42 }
 0x54b   : > { %8070 = vmatprep.mubr.msk.f32.mxu1 %vm3535_vm5, %v10500_v57 }
 0x54e   : > { %8071 = vmatmul.mubr.msk.f32.gmra.mrb[38].mxu1 %vm3535_vm5, %v10507_v5  ;;  %v10531_v5 = vsel %vm385_vm2, %v3524_v30, %v3523_v28  ;;  %v4114_v30 = vrot.slane %v10176_v46, 1 }
 0x54f   : > { %8073 = vmatprep.mubr.msk.f32.mxu1 %vm3535_vm5, %v10512_v7  ;;  %11530 = vst [vmem:[#allocation17_spill] sm:$0xff] %v10531_v5  ;;  %v10543_v7 = vsel %vm385_vm2, %v3528_v61, %v3527_v49  ;;  %v3428_v61 = vld [vmem:[%s11218_s5 + $0x40] sm:$0xff]  ;;  %v3429_v49 = vld [vmem:[%s11218_s5 + $0x48] sm:$0xff] }
 0x550   : > { %11532 = vst [vmem:[#allocation14_spill] sm:$0xff] %v10543_v7 }
 0x552   : > { %8074 = vmatmul.mubr.msk.f32.gmra.mrb[40].mxu1 %vm3535_vm5, %v10519_v56  ;;  %v3532_v56 = vrot.slane %v10345_v41, 7 }
 0x553   : > { %8076 = vmatprep.mubr.msk.f32.mxu1 %vm3535_vm5, %v10524_v12 }
 0x554   : > { %v10548_v28 = vsel %vm385_vm2, %v3531_v53, %v3532_v56  ;;  %v10555_v12 = vsel %vm385_vm2, %v3532_v56, %v3531_v53  ;;  %v10572_v56 = vpack.c.bf16 %v3429_v49, %v3428_v61  ;;  %v4126_v61 = vrot.slane %v10206_v51, 1 }
 0x555   : > { %11533 = vst [vmem:[#allocation15_spill] sm:$0xff] %v10548_v28  ;;  %11534 = vst [vmem:[#allocation2_spill] sm:$0xff] %v10555_v12  ;;  %v4127_v49 = vrot.slane %v10213_v55, 1 }
 0x556   : > { %8077 = vmatmul.mubr.msk.f32.gmra.mrb[42].mxu1 %vm3535_vm5, %v10531_v5  ;;  %v4115_v5 = vrot.slane %v10179_v19, 1  ;;  %v4118_v19 = vrot.slane %v10183_v43, 1  ;;  %v4123_v43 = vrot.slane %v10203_v14, 1 }
 0x557   : > { %8079 = vmatprep.mubr.msk.f32.mxu1 %vm3535_vm5, %v10536_v39 }
 0x558   : > { %v10566_v46 = vsel %vm1036_vm3, %v4114_v30, %v4115_v5  ;;  %v10575_v53 = vsel %vm1036_vm3, %v4115_v5, %v4114_v30 }
 0x559   : > { %11535 = vst [vmem:[#allocation3_spill] sm:$0xff] %v10566_v46  ;;  %11536 = vst [vmem:[#allocation4_spill] sm:$0xff] %v10575_v53 }
 0x55a   : > { %8080 = vmatmul.mubr.msk.f32.gmra.mrb[44].mxu1 %vm3535_vm5, %v10543_v7  ;;  %v4122_v7 = vrot.slane %v10196_v32, 1 }
 0x55b   : > { %8082 = vmatprep.mubr.msk.f32.mxu1 %vm3535_vm5, %v10548_v28  ;;  %v4119_v28 = vrot.slane %v10192_v54, 1 }
 0x55c   : > { %v10594_v30 = vsel %vm1036_vm3, %v4122_v7, %v4123_v43 }
 0x55d   : > { %v10589_v5 = vsel %vm1036_vm3, %v4119_v28, %v4118_v19  ;;  %11539 = vst [vmem:[#allocation7_spill] sm:$0xff] %v10594_v30 }
 0x55e   : > { %8083 = vmatmul.mubr.msk.f32.gmra.mrb[46].mxu1 %vm3535_vm5, %v10555_v12  ;;  %v10580_v12 = vsel %vm1036_vm3, %v4118_v19, %v4119_v28  ;;  %11538 = vst [vmem:[#allocation6_spill] sm:$0xff] %v10589_v5  ;;  %v10606_v19 = vsel %vm1036_vm3, %v4126_v61, %v4127_v49  ;;  %v4130_v28 = vrot.slane %v10216_v44, 1 }
 0x55f   : > { %8089 = vmatprep.mubr.msk.f32.mxu1 %vm3535_vm5, %v10566_v46  ;;  %11537 = vst [vmem:[#allocation5_spill] sm:$0xff] %v10580_v12  ;;  %11541 = vst [vmem:[#allocation9_spill] sm:$0xff] %v10606_v19  ;;  %v10613_v46 = vsel %vm1036_vm3, %v4127_v49, %v4126_v61  ;;  %v4138_v49 = vrot.slane %v10237_v9, 1 }
 0x560   : > { %11542 = vst [vmem:[#allocation10_spill] sm:$0xff] %v10613_v46 }
 0x562   : > { %8090 = vmatmul.mubr.msk.f32.vlgmr.msra.gmra.mrb[16].mxu1 %vm3535_vm5, %v10575_v53  ;;  %v4131_v53 = vrot.slane %v10223_v4, 1 }
 0x563   : > { %8472 = vmatpush3.bf16.msra.mxu1 %v10370_v52  ;;  %8092 = vmatprep.mubr.msk.f32.mxu1 %vm3535_vm5, %v10580_v12  ;;  %v10601_v52 = vsel %vm1036_vm3, %v4123_v43, %v4122_v7  ;;  %v4134_v7 = vrot.slane %v10226_v6, 1 }
 0x564   : > { %8474 = vmatprep.subr.bf16.mxu1 %v10572_v56  ;;  %11540 = vst [vmem:[#allocation8_spill] sm:$0xff] %v10601_v52  ;;  %v10618_v43 = vsel %vm1036_vm3, %v4130_v28, %v4131_v53 }
 0x565   : > { %11543 = vst [vmem:[#allocation26_spill] sm:$0xff] %v10618_v43 }
 0x566   : > { %8093 = vmatmul.mubr.msk.f32.gmra.mrb[18].mxu1 %vm3535_vm5, %v10589_v5 }
 0x567   : > { %8095 = vmatprep.mubr.msk.f32.mxu1 %vm3535_vm5, %v10594_v30  ;;  %v10625_v30 = vsel %vm1036_vm3, %v4131_v53, %v4130_v28  ;;  %v4142_v28 = vrot.slane %v10249_v24, 1 }
 0x568   : > { %11544 = vst [vmem:[#allocation27_spill] sm:$0xff] %v10625_v30 }
 0x56a   : > { %8096 = vmatmul.mubr.msk.f32.gmra.mrb[20].mxu1 %vm3535_vm5, %v10601_v52  ;;  %v4135_v52 = vrot.slane %v10233_v8, 1 }
 0x56b   : > { %8098 = vmatprep.mubr.msk.f32.mxu1 %vm3535_vm5, %v10606_v19 }
 0x56c   : > { %v10630_v61 = vsel %vm1036_vm3, %v4134_v7, %v4135_v52  ;;  %v10637_v19 = vsel %vm1036_vm3, %v4135_v52, %v4134_v7  ;;  %v4146_v7 = vrot.slane %v10261_v27, 1 }
 0x56d   : > { %11545 = vst [vmem:[#allocation28_spill] sm:$0xff] %v10630_v61  ;;  %11546 = vst [vmem:[#allocation29_spill] sm:$0xff] %v10637_v19 }
 0x56e   : > { %8099 = vmatmul.mubr.msk.f32.gmra.mrb[22].mxu1 %vm3535_vm5, %v10613_v46  ;;  %v4139_v46 = vrot.slane %v10245_v11, 1 }
 0x56f   : > { %8101 = vmatprep.mubr.msk.f32.mxu1 %vm3535_vm5, %v10618_v43 }
 0x570   : > { %v10642_v53 = vsel %vm1036_vm3, %v4138_v49, %v4139_v46  ;;  %v10649_v43 = vsel %vm1036_vm3, %v4139_v46, %v4138_v49  ;;  %v4150_v49 = vrot.slane %v10273_v31, 1 }
 0x571   : > { %11547 = vst [vmem:[#allocation30_spill] sm:$0xff] %v10642_v53  ;;  %11548 = vst [vmem:[#allocation31_spill] sm:$0xff] %v10649_v43 }
 0x572   : > { %8102 = vmatmul.mubr.msk.f32.gmra.mrb[24].mxu1 %vm3535_vm5, %v10625_v30  ;;  %v4143_v30 = vrot.slane %v10257_v25, 1 }
 0x573   : > { %8104 = vmatprep.mubr.msk.f32.mxu1 %vm3535_vm5, %v10630_v61 }
 0x574   : > { %v10654_v52 = vsel %vm1036_vm3, %v4142_v28, %v4143_v30  ;;  %v10661_v61 = vsel %vm1036_vm3, %v4143_v30, %v4142_v28  ;;  %v4154_v28 = vrot.slane %v10285_v36, 1 }
 0x575   : > { %11549 = vst [vmem:[#allocation32_spill] sm:$0xff] %v10654_v52  ;;  %11550 = vst [vmem:[#allocation33_spill] sm:$0xff] %v10661_v61 }
 0x576   : > { %8105 = vmatmul.mubr.msk.f32.gmra.mrb[26].mxu1 %vm3535_vm5, %v10637_v19  ;;  %v4147_v19 = vrot.slane %v10269_v29, 1 }
 0x577   : > { %8107 = vmatprep.mubr.msk.f32.mxu1 %vm3535_vm5, %v10642_v53 }
 0x578   : > { %v10666_v46 = vsel %vm1036_vm3, %v4146_v7, %v4147_v19  ;;  %v10673_v53 = vsel %vm1036_vm3, %v4147_v19, %v4146_v7  ;;  %v4158_v7 = vrot.slane %v10297_v16, 1 }
 0x579   : > { %11551 = vst [vmem:[#allocation34_spill] sm:$0xff] %v10666_v46  ;;  %11552 = vst [vmem:[#allocation35_spill] sm:$0xff] %v10673_v53 }
 0x57a   : > { %8108 = vmatmul.mubr.msk.f32.gmra.mrb[28].mxu1 %vm3535_vm5, %v10649_v43  ;;  %v4151_v43 = vrot.slane %v10281_v34, 1 }
 0x57b   : > { %8110 = vmatprep.mubr.msk.f32.mxu1 %vm3535_vm5, %v10654_v52 }
 0x57c   : > { %v10678_v30 = vsel %vm1036_vm3, %v4150_v49, %v4151_v43  ;;  %v10685_v52 = vsel %vm1036_vm3, %v4151_v43, %v4150_v49  ;;  %v4162_v49 = vrot.slane %v10309_v37, 1 }
 0x57d   : > { %11553 = vst [vmem:[#allocation36_spill] sm:$0xff] %v10678_v30  ;;  %11554 = vst [vmem:[#allocation37_spill] sm:$0xff] %v10685_v52 }
 0x57e   : > { %8111 = vmatmul.mubr.msk.f32.gmra.mrb[30].mxu1 %vm3535_vm5, %v10661_v61  ;;  %v4155_v61 = vrot.slane %v10293_v63, 1 }
 0x57f   : > { %8113 = vmatprep.mubr.msk.f32.mxu1 %vm3535_vm5, %v10666_v46 }
 0x580   : > { %v10690_v19 = vsel %vm1036_vm3, %v4154_v28, %v4155_v61  ;;  %v10697_v46 = vsel %vm1036_vm3, %v4155_v61, %v4154_v28  ;;  %v4166_v28 = vrot.slane %v10321_v62, 1 }
 0x581   : > { %11555 = vst [vmem:[#allocation38_spill] sm:$0xff] %v10690_v19  ;;  %11556 = vst [vmem:[#allocation39_spill] sm:$0xff] %v10697_v46 }
 0x582   : > { %8114 = vmatmul.mubr.msk.f32.gmra.mrb[32].mxu1 %vm3535_vm5, %v10673_v53  ;;  %v4159_v53 = vrot.slane %v10305_v21, 1 }
 0x583   : > { %8116 = vmatprep.mubr.msk.f32.mxu1 %vm3535_vm5, %v10678_v30 }
 0x584   : > { %v10702_v43 = vsel %vm1036_vm3, %v4158_v7, %v4159_v53  ;;  %v10709_v30 = vsel %vm1036_vm3, %v4159_v53, %v4158_v7  ;;  %v4170_v7 = vrot.slane %v10333_v18, 1 }
 0x585   : > { %11557 = vst [vmem:[#allocation40_spill] sm:$0xff] %v10702_v43  ;;  %11558 = vst [vmem:[#allocation46_spill] sm:$0xff] %v10709_v30 }
 0x586   : > { %8117 = vmatmul.mubr.msk.f32.gmra.mrb[34].mxu1 %vm3535_vm5, %v10685_v52  ;;  %v4163_v52 = vrot.slane %v10317_v38, 1 }
 0x587   : > { %8119 = vmatprep.mubr.msk.f32.mxu1 %vm3535_vm5, %v10690_v19 }
 0x588   : > { %v10714_v61 = vsel %vm1036_vm3, %v4162_v49, %v4163_v52  ;;  %v10721_v19 = vsel %vm1036_vm3, %v4163_v52, %v4162_v49  ;;  %v4174_v49 = vrot.slane %v10345_v41, 1 }
 0x589   : > { %11559 = vst [vmem:[#allocation47_spill] sm:$0xff] %v10714_v61  ;;  %11560 = vst [vmem:[#allocation49_spill] sm:$0xff] %v10721_v19 }
 0x58a   : > { %8120 = vmatmul.mubr.msk.f32.gmra.mrb[36].mxu1 %vm3535_vm5, %v10697_v46  ;;  %v4167_v46 = vrot.slane %v10329_v17, 1 }
 0x58b   : > { %8122 = vmatprep.mubr.msk.f32.mxu1 %vm3535_vm5, %v10702_v43 }
 0x58c   : > { %v10726_v53 = vsel %vm1036_vm3, %v4166_v28, %v4167_v46  ;;  %v10733_v43 = vsel %vm1036_vm3, %v4167_v46, %v4166_v28 }
 0x58d   : > { %11561 = vst [vmem:[#allocation24_spill] sm:$0xff] %v10726_v53  ;;  %11562 = vst [vmem:[#allocation25_spill] sm:$0xff] %v10733_v43 }
 0x58e   : > { %8123 = vmatmul.mubr.msk.f32.gmra.mrb[38].mxu1 %vm3535_vm5, %v10709_v30  ;;  %v4171_v30 = vrot.slane %v10341_v50, 1 }
 0x58f   : > { %8125 = vmatprep.mubr.msk.f32.mxu1 %vm3535_vm5, %v10714_v61 }
 0x590   : > { %v10738_v52 = vsel %vm1036_vm3, %v4170_v7, %v4171_v30  ;;  %v10745_v61 = vsel %vm1036_vm3, %v4171_v30, %v4170_v7  ;;  %v3431_v30 = vld [vmem:[%s11218_s5 + $0x58] sm:$0xff] }
 0x591   : > { %11563 = vst [vmem:[#allocation50_spill] sm:$0xff] %v10738_v52 }
 0x592   : > { %8126 = vmatmul.mubr.msk.f32.gmra.mrb[40].mxu1 %vm3535_vm5, %v10721_v19  ;;  %v4175_v19 = vrot.slane %v10353_v20, 1 }
 0x593   : > { %8128 = vmatprep.mubr.msk.f32.mxu1 %vm3535_vm5, %v10726_v53 }
 0x594   : > { %v10750_v46 = vsel %vm1036_vm3, %v4174_v49, %v4175_v19  ;;  %v10755_v28 = vsel %vm1036_vm3, %v4175_v19, %v4174_v49  ;;  %v11566_v19 = vld [vmem:[#allocation22_spill] sm:$0xff]  ;;  %v11568_v49 = vld [vmem:[#allocation16_spill] sm:$0xff] }
 0x595   : > { %11564 = vst [vmem:[#allocation51_spill] sm:$0xff] %v10750_v46 }
 0x596   : > { %8129 = vmatmul.mubr.msk.f32.gmra.mrb[42].mxu1 %vm3535_vm5, %v10733_v43  ;;  %v3430_v43 = vld [vmem:[%s11218_s5 + $0x50] sm:$0xff] }
 0x597   : > { %8131 = vmatprep.mubr.msk.f32.mxu1 %vm3535_vm5, %v10738_v52  ;;  %v8477_v7 = vpack.c.bf16 %v3431_v30, %v3430_v43  ;;  %v11567_v43 = vld [vmem:[#allocation23_spill] sm:$0xff]  ;;  %v11569_v30 = vld [vmem:[#allocation17_spill] sm:$0xff] }
 0x59a   : > { %8132 = vmatmul.mubr.msk.f32.gmra.mrb[44].mxu1 %vm3535_vm5, %v10745_v61 }
 0x59b   : > { %8134 = vmatprep.mubr.msk.f32.mxu1 %vm3535_vm5, %v10750_v46 }
 0x59e   : > { %8135 = vmatmul.mubr.msk.f32.gmra.mrb[46].mxu1 %vm3535_vm5, %v10755_v28 }
 0x59f   : > { %8141 = vmatprep.mubr.msk.f32.mxu1 %vm3535_vm5, %v10378_v59  ;;  %v11571_v59 = vld [vmem:[#allocation15_spill] sm:$0xff] }
 0x5a2   : > { %8142 = vmatmul.mubr.msk.f32.vlgmr.msra.gmra.mrb[16].mxu1 %vm3535_vm5, %v10387_v13  ;;  %v11570_v13 = vld [vmem:[#allocation14_spill] sm:$0xff] }
 0x5a3   : > { %8476 = vmatpush3.bf16.msra.mxu1 %v10572_v56  ;;  %8144 = vmatprep.mubr.msk.f32.mxu1 %vm3535_vm5, %v10392_v10  ;;  %v11565_v56 = vld [vmem:[#allocation48_spill] sm:$0xff] }
 0x5a4   : > { %8478 = vmatprep.subr.bf16.mxu1 %v8477_v7 }
 0x5a6   : > { %8145 = vmatmul.mubr.msk.f32.gmra.mrb[18].mxu1 %vm3535_vm5, %v10399_v1 }
 0x5a7   : > { %8147 = vmatprep.mubr.msk.f32.mxu1 %vm3535_vm5, %v10404_v26 }
 0x5aa   : > { %8148 = vmatmul.mubr.msk.f32.gmra.mrb[20].mxu1 %vm3535_vm5, %v10411_v33 }
 0x5ab   : > { %8150 = vmatprep.mubr.msk.f32.mxu1 %vm3535_vm5, %v10416_v35 }
 0x5ae   : > { %8151 = vmatmul.mubr.msk.f32.gmra.mrb[22].mxu1 %vm3535_vm5, %v10423_v3 }
 0x5af   : > { %8153 = vmatprep.mubr.msk.f32.mxu1 %vm3535_vm5, %v10428_v2 }
 0x5b2   : > { %8154 = vmatmul.mubr.msk.f32.gmra.mrb[24].mxu1 %vm3535_vm5, %v10435_v22 }
 0x5b3   : > { %8156 = vmatprep.mubr.msk.f32.mxu1 %vm3535_vm5, %v10440_v40 }
 0x5b6   : > { %8157 = vmatmul.mubr.msk.f32.gmra.mrb[26].mxu1 %vm3535_vm5, %v10447_v45 }
 0x5b7   : > { %8159 = vmatprep.mubr.msk.f32.mxu1 %vm3535_vm5, %v10452_v58 }
 0x5ba   : > { %8160 = vmatmul.mubr.msk.f32.gmra.mrb[28].mxu1 %vm3535_vm5, %v10459_v47 }
 0x5bb   : > { %8162 = vmatprep.mubr.msk.f32.mxu1 %vm3535_vm5, %v10464_v48 }
 0x5be   : > { %8163 = vmatmul.mubr.msk.f32.gmra.mrb[30].mxu1 %vm3535_vm5, %v10471_v23 }
 0x5bf   : > { %8165 = vmatprep.mubr.msk.f32.mxu1 %vm3535_vm5, %v10476_v15 }
 0x5c2   : > { %8166 = vmatmul.mubr.msk.f32.gmra.mrb[32].mxu1 %vm3535_vm5, %v10483_v60 }
 0x5c3   : > { %8168 = vmatprep.mubr.msk.f32.mxu1 %vm3535_vm5, %v10488_v0 }
 0x5c6   : > { %8169 = vmatmul.mubr.msk.f32.gmra.mrb[34].mxu1 %vm3535_vm5, %v10495_v42 }
 0x5c7   : > { %8171 = vmatprep.mubr.msk.f32.mxu1 %vm3535_vm5, %v10500_v57 }
 0x5ca   : > { %8172 = vmatmul.mubr.msk.f32.gmra.mrb[36].mxu1 %vm3535_vm5, %v11565_v56  ;;  %v11572_v56 = vld [vmem:[#allocation2_spill] sm:$0xff] }
 0x5cb   : > { %8174 = vmatprep.mubr.msk.f32.mxu1 %vm3535_vm5, %v11566_v19  ;;  %v11573_v19 = vld [vmem:[#allocation42_spill] sm:$0xff] }
 0x5ce   : > { %8175 = vmatmul.mubr.msk.f32.gmra.mrb[38].mxu1 %vm3535_vm5, %v11567_v43 }
 0x5cf   : > { %8177 = vmatprep.mubr.msk.f32.mxu1 %vm3535_vm5, %v11568_v49  ;;  %v3432_v49 = vld [vmem:[%s11218_s5 + $0x60] sm:$0xff] }
 0x5d2   : > { %8178 = vmatmul.mubr.msk.f32.gmra.mrb[40].mxu1 %vm3535_vm5, %v11569_v30  ;;  %v11574_v30 = vld [vmem:[#allocation43_spill] sm:$0xff] }
 0x5d3   : > { %8180 = vmatprep.mubr.msk.f32.mxu1 %vm3535_vm5, %v10536_v39  ;;  %v3433_v39 = vld [vmem:[%s11218_s5 + $0x68] sm:$0xff] }
 0x5d6   : > { %8181 = vmatmul.mubr.msk.f32.gmra.mrb[42].mxu1 %vm3535_vm5, %v11570_v13  ;;  %v11575_v13 = vld [vmem:[#allocation21_spill] sm:$0xff] }
 0x5d7   : > { %8183 = vmatprep.mubr.msk.f32.mxu1 %vm3535_vm5, %v11571_v59  ;;  %v8481_v59 = vpack.c.bf16 %v3433_v39, %v3432_v49  ;;  %v11576_v39 = vld [vmem:[#allocation18_spill] sm:$0xff]  ;;  %v3435_v49 = vld [vmem:[%s11218_s5 + $0x78] sm:$0xff] }
 0x5da   : > { %8184 = vmatmul.mubr.msk.f32.gmra.mrb[44].mxu1 %vm3535_vm5, %v11572_v56 }
 0x5db   : > { %8186 = vmatprep.mubr.msk.f32.mxu1 %vm3535_vm5, %v11573_v19 }
 0x5de   : > { %8187 = vmatmul.mubr.msk.f32.gmra.mrb[46].mxu1 %vm3535_vm5, %v11574_v30 }
 0x5df   : > { %8193 = vmatprep.mubr.msk.f32.mxu1 %vm3535_vm5, %v11575_v13 }
 0x5e2   : > { %8194 = vmatmul.mubr.msk.f32.vlgmr.msra.gmra.mrb[16].mxu1 %vm3535_vm5, %v10192_v54  ;;  %v11577_v54 = vld [vmem:[#allocation19_spill] sm:$0xff] }
 0x5e3   : > { %8480 = vmatpush3.bf16.msra.mxu1 %v8477_v7  ;;  %8196 = vmatprep.mubr.msk.f32.mxu1 %vm3535_vm5, %v10196_v32  ;;  %v3434_v7 = vld [vmem:[%s11218_s5 + $0x70] sm:$0xff] }
 0x5e4   : > { %8482 = vmatprep.subr.bf16.mxu1 %v8481_v59  ;;  %v8485_v13 = vpack.c.bf16 %v3435_v49, %v3434_v7  ;;  %v11583_v7 = vld [vmem:[#allocation27_spill] sm:$0xff]  ;;  %v11585_v49 = vld [vmem:[#allocation29_spill] sm:$0xff] }
 0x5e6   : > { %8197 = vmatmul.mubr.msk.f32.gmra.mrb[18].mxu1 %vm3535_vm5, %v10203_v14 }
 0x5e7   : > { %8199 = vmatprep.mubr.msk.f32.mxu1 %vm3535_vm5, %v10206_v51 }
 0x5ea   : > { %8200 = vmatmul.mubr.msk.f32.gmra.mrb[20].mxu1 %vm3535_vm5, %v10213_v55 }
 0x5eb   : > { %8202 = vmatprep.mubr.msk.f32.mxu1 %vm3535_vm5, %v10216_v44 }
 0x5ee   : > { %8203 = vmatmul.mubr.msk.f32.gmra.mrb[22].mxu1 %vm3535_vm5, %v10223_v4 }
 0x5ef   : > { %8205 = vmatprep.mubr.msk.f32.mxu1 %vm3535_vm5, %v10226_v6 }
 0x5f2   : > { %8206 = vmatmul.mubr.msk.f32.gmra.mrb[24].mxu1 %vm3535_vm5, %v10233_v8 }
 0x5f3   : > { %8208 = vmatprep.mubr.msk.f32.mxu1 %vm3535_vm5, %v10237_v9 }
 0x5f6   : > { %8209 = vmatmul.mubr.msk.f32.gmra.mrb[26].mxu1 %vm3535_vm5, %v10245_v11 }
 0x5f7   : > { %8211 = vmatprep.mubr.msk.f32.mxu1 %vm3535_vm5, %v10249_v24 }
 0x5fa   : > { %8212 = vmatmul.mubr.msk.f32.gmra.mrb[28].mxu1 %vm3535_vm5, %v10257_v25 }
 0x5fb   : > { %8214 = vmatprep.mubr.msk.f32.mxu1 %vm3535_vm5, %v10261_v27 }
 0x5fe   : > { %8215 = vmatmul.mubr.msk.f32.gmra.mrb[30].mxu1 %vm3535_vm5, %v10269_v29 }
 0x5ff   : > { %8217 = vmatprep.mubr.msk.f32.mxu1 %vm3535_vm5, %v10273_v31 }
 0x602   : > { %8218 = vmatmul.mubr.msk.f32.gmra.mrb[32].mxu1 %vm3535_vm5, %v10281_v34 }
 0x603   : > { %8220 = vmatprep.mubr.msk.f32.mxu1 %vm3535_vm5, %v10285_v36 }
 0x606   : > { %8221 = vmatmul.mubr.msk.f32.gmra.mrb[34].mxu1 %vm3535_vm5, %v10293_v63 }
 0x607   : > { %8223 = vmatprep.mubr.msk.f32.mxu1 %vm3535_vm5, %v10297_v16 }
 0x60a   : > { %8224 = vmatmul.mubr.msk.f32.gmra.mrb[36].mxu1 %vm3535_vm5, %v10305_v21 }
 0x60b   : > { %8226 = vmatprep.mubr.msk.f32.mxu1 %vm3535_vm5, %v10309_v37 }
 0x60e   : > { %8227 = vmatmul.mubr.msk.f32.gmra.mrb[38].mxu1 %vm3535_vm5, %v10317_v38 }
 0x60f   : > { %8229 = vmatprep.mubr.msk.f32.mxu1 %vm3535_vm5, %v10321_v62 }
 0x612   : > { %8230 = vmatmul.mubr.msk.f32.gmra.mrb[40].mxu1 %vm3535_vm5, %v10329_v17 }
 0x613   : > { %8232 = vmatprep.mubr.msk.f32.mxu1 %vm3535_vm5, %v10333_v18 }
 0x616   : > { %8233 = vmatmul.mubr.msk.f32.gmra.mrb[42].mxu1 %vm3535_vm5, %v10341_v50  ;;  %v11581_v50 = vld [vmem:[#allocation10_spill] sm:$0xff] }
 0x617   : > { %8235 = vmatprep.mubr.msk.f32.mxu1 %vm3535_vm5, %v10345_v41  ;;  %v11580_v41 = vld [vmem:[#allocation9_spill] sm:$0xff] }
 0x61a   : > { %8236 = vmatmul.mubr.msk.f32.gmra.mrb[44].mxu1 %vm3535_vm5, %v10353_v20  ;;  %v11579_v20 = vld [vmem:[#allocation8_spill] sm:$0xff] }
 0x61b   : > { %8238 = vmatprep.mubr.msk.f32.mxu1 %vm3535_vm5, %v11576_v39  ;;  %v11578_v39 = vld [vmem:[#allocation7_spill] sm:$0xff] }
 0x61e   : > { %8239 = vmatmul.mubr.msk.f32.gmra.mrb[46].mxu1 %vm3535_vm5, %v11577_v54  ;;  %v11582_v54 = vld [vmem:[#allocation26_spill] sm:$0xff] }
 0x61f   : > { %8245 = vmatprep.mubr.msk.f32.mxu1 %vm3535_vm5, %v10580_v12  ;;  %v11587_v12 = vld [vmem:[#allocation31_spill] sm:$0xff] }
 0x622   : > { %8246 = vmatmul.mubr.msk.f32.vlgmr.msra.gmra.mrb[16].mxu1 %vm3535_vm5, %v10589_v5  ;;  %v11586_v5 = vld [vmem:[#allocation30_spill] sm:$0xff] }
 0x623   : > { %8484 = vmatpush3.bf16.msra.mxu1 %v8481_v59  ;;  %8248 = vmatprep.mubr.msk.f32.mxu1 %vm3535_vm5, %v11578_v39  ;;  %v11584_v59 = vld [vmem:[#allocation28_spill] sm:$0xff] }
 0x624   : > { %8486 = vmatprep.subr.bf16.mxu1 %v8485_v13 }
 0x626   : > { %8249 = vmatmul.mubr.msk.f32.gmra.mrb[18].mxu1 %vm3535_vm5, %v11579_v20 }
 0x627   : > { %8251 = vmatprep.mubr.msk.f32.mxu1 %vm3535_vm5, %v11580_v41  ;;  %v11588_v41 = vld [vmem:[#allocation32_spill] sm:$0xff] }
 0x62a   : > { %8252 = vmatmul.mubr.msk.f32.gmra.mrb[20].mxu1 %vm3535_vm5, %v11581_v50  ;;  %v11589_v50 = vld [vmem:[#allocation33_spill] sm:$0xff] }
 0x62b   : > { %8254 = vmatprep.mubr.msk.f32.mxu1 %vm3535_vm5, %v11582_v54  ;;  %v11590_v54 = vld [vmem:[#allocation34_spill] sm:$0xff] }
 0x62e   : > { %8255 = vmatmul.mubr.msk.f32.gmra.mrb[22].mxu1 %vm3535_vm5, %v11583_v7  ;;  %v11591_v7 = vld [vmem:[#allocation35_spill] sm:$0xff] }
 0x62f   : > { %8257 = vmatprep.mubr.msk.f32.mxu1 %vm3535_vm5, %v11584_v59  ;;  %v11592_v59 = vld [vmem:[#allocation36_spill] sm:$0xff] }
 0x632   : > { %8258 = vmatmul.mubr.msk.f32.gmra.mrb[24].mxu1 %vm3535_vm5, %v11585_v49  ;;  %v11593_v49 = vld [vmem:[#allocation37_spill] sm:$0xff] }
 0x633   : > { %8260 = vmatprep.mubr.msk.f32.mxu1 %vm3535_vm5, %v11586_v5  ;;  %v11594_v5 = vld [vmem:[#allocation38_spill] sm:$0xff] }
 0x636   : > { %8261 = vmatmul.mubr.msk.f32.gmra.mrb[26].mxu1 %vm3535_vm5, %v11587_v12  ;;  %v11595_v12 = vld [vmem:[#allocation39_spill] sm:$0xff] }
 0x637   : > { %8263 = vmatprep.mubr.msk.f32.mxu1 %vm3535_vm5, %v11588_v41  ;;  %v11596_v41 = vld [vmem:[#allocation40_spill] sm:$0xff] }
 0x63a   : > { %8264 = vmatmul.mubr.msk.f32.gmra.mrb[28].mxu1 %vm3535_vm5, %v11589_v50  ;;  %v11597_v50 = vld [vmem:[#allocation46_spill] sm:$0xff] }
 0x63b   : > { %8266 = vmatprep.mubr.msk.f32.mxu1 %vm3535_vm5, %v11590_v54  ;;  %v11598_v54 = vld [vmem:[#allocation47_spill] sm:$0xff] }
 0x63e   : > { %8267 = vmatmul.mubr.msk.f32.gmra.mrb[30].mxu1 %vm3535_vm5, %v11591_v7  ;;  %v11599_v7 = vld [vmem:[#allocation49_spill] sm:$0xff] }
 0x63f   : > { %8269 = vmatprep.mubr.msk.f32.mxu1 %vm3535_vm5, %v11592_v59 }
 0x642   : > { %8270 = vmatmul.mubr.msk.f32.gmra.mrb[32].mxu1 %vm3535_vm5, %v11593_v49  ;;  %v11600_v49 = vld [vmem:[#allocation25_spill] sm:$0xff] }
 0x643   : > { %8272 = vmatprep.mubr.msk.f32.mxu1 %vm3535_vm5, %v11594_v5 }
 0x646   : > { %8273 = vmatmul.mubr.msk.f32.gmra.mrb[34].mxu1 %vm3535_vm5, %v11595_v12 }
 0x647   : > { %8275 = vmatprep.mubr.msk.f32.mxu1 %vm3535_vm5, %v11596_v41 }
 0x64a   : > { %8276 = vmatmul.mubr.msk.f32.gmra.mrb[36].mxu1 %vm3535_vm5, %v11597_v50 }
 0x64b   : > { %8278 = vmatprep.mubr.msk.f32.mxu1 %vm3535_vm5, %v11598_v54  ;;  %v11601_v54 = vld [vmem:[#allocation3_spill] sm:$0xff] }
 0x64e   : > { %8279 = vmatmul.mubr.msk.f32.gmra.mrb[38].mxu1 %vm3535_vm5, %v11599_v7 }
 0x64f   : > { %8281 = vmatprep.mubr.msk.f32.mxu1 %vm3535_vm5, %v10726_v53  ;;  %v3436_v53 = vld [vmem:[%s11218_s5 + $0x80] sm:$0xff] }
 0x652   : > { %8282 = vmatmul.mubr.msk.f32.gmra.mrb[40].mxu1 %vm3535_vm5, %v11600_v49  ;;  %v11602_v49 = vld [vmem:[#allocation4_spill] sm:$0xff] }
 0x653   : > { %8284 = vmatprep.mubr.msk.f32.mxu1 %vm3535_vm5, %v10738_v52  ;;  %v3437_v52 = vld [vmem:[%s11218_s5 + $0x88] sm:$0xff] }
 0x656   : > { %8285 = vmatmul.mubr.msk.f32.gmra.mrb[42].mxu1 %vm3535_vm5, %v10745_v61 }
 0x657   : > { %8287 = vmatprep.mubr.msk.f32.mxu1 %vm3535_vm5, %v10750_v46  ;;  %v8489_v46 = vpack.c.bf16 %v3437_v52, %v3436_v53 }
 0x65a   : > { %8288 = vmatmul.mubr.msk.f32.gmra.mrb[44].mxu1 %vm3535_vm5, %v10755_v28 }
 0x65b   : > { %8290 = vmatprep.mubr.msk.f32.mxu1 %vm3535_vm5, %v11601_v54 }
 0x65e   : > { %8291 = vmatmul.mubr.msk.f32.gmra.mrb[46].mxu1 %vm3535_vm5, %v11602_v49 }
 0x65f   : > { %8297 = vmatprep.mubr.msk.f32.mxu1 %vm3535_vm5, %v10392_v10  ;;  %v11604_v10 = vld [vmem:[#allocation22_spill] sm:$0xff] }
 0x662   : > { %8298 = vmatmul.mubr.msk.f32.vlgmr.msra.gmra.mrb[16].mxu1 %vm3535_vm5, %v10399_v1  ;;  %v11605_v1 = vld [vmem:[#allocation16_spill] sm:$0xff] }
 0x663   : > { %8488 = vmatpush3.bf16.msra.mxu1 %v8485_v13  ;;  %8300 = vmatprep.mubr.msk.f32.mxu1 %vm3535_vm5, %v10404_v26  ;;  %v11603_v13 = vld [vmem:[#allocation48_spill] sm:$0xff]  ;;  %v11606_v26 = vld [vmem:[#allocation17_spill] sm:$0xff] }
 0x664   : > { %8490 = vmatprep.subr.bf16.mxu1 %v8489_v46 }
 0x666   : > { %8301 = vmatmul.mubr.msk.f32.gmra.mrb[18].mxu1 %vm3535_vm5, %v10411_v33  ;;  %v11607_v33 = vld [vmem:[#allocation20_spill] sm:$0xff] }
 0x667   : > { %8303 = vmatprep.mubr.msk.f32.mxu1 %vm3535_vm5, %v10416_v35  ;;  %v11608_v35 = vld [vmem:[#allocation14_spill] sm:$0xff] }
 0x66a   : > { %8304 = vmatmul.mubr.msk.f32.gmra.mrb[20].mxu1 %vm3535_vm5, %v10423_v3  ;;  %v11609_v3 = vld [vmem:[#allocation15_spill] sm:$0xff] }
 0x66b   : > { %8306 = vmatprep.mubr.msk.f32.mxu1 %vm3535_vm5, %v10428_v2  ;;  %v11610_v2 = vld [vmem:[#allocation44_spill] sm:$0xff] }
 0x66e   : > { %8307 = vmatmul.mubr.msk.f32.gmra.mrb[22].mxu1 %vm3535_vm5, %v10435_v22  ;;  %v11611_v22 = vld [vmem:[#allocation45_spill] sm:$0xff] }
 0x66f   : > { %8309 = vmatprep.mubr.msk.f32.mxu1 %vm3535_vm5, %v10440_v40 }
 0x672   : > { %8310 = vmatmul.mubr.msk.f32.gmra.mrb[24].mxu1 %vm3535_vm5, %v10447_v45 }
 0x673   : > { %8312 = vmatprep.mubr.msk.f32.mxu1 %vm3535_vm5, %v10452_v58 }
 0x676   : > { %8313 = vmatmul.mubr.msk.f32.gmra.mrb[26].mxu1 %vm3535_vm5, %v10459_v47 }
 0x677   : > { %8315 = vmatprep.mubr.msk.f32.mxu1 %vm3535_vm5, %v10464_v48 }
 0x67a   : > { %8316 = vmatmul.mubr.msk.f32.gmra.mrb[28].mxu1 %vm3535_vm5, %v10471_v23 }
 0x67b   : > { %8318 = vmatprep.mubr.msk.f32.mxu1 %vm3535_vm5, %v10476_v15 }
 0x67e   : > { %8319 = vmatmul.mubr.msk.f32.gmra.mrb[30].mxu1 %vm3535_vm5, %v10483_v60 }
 0x67f   : > { %8321 = vmatprep.mubr.msk.f32.mxu1 %vm3535_vm5, %v10488_v0 }
 0x682   : > { %8322 = vmatmul.mubr.msk.f32.gmra.mrb[32].mxu1 %vm3535_vm5, %v10495_v42 }
 0x683   : > { %8324 = vmatprep.mubr.msk.f32.mxu1 %vm3535_vm5, %v10500_v57 }
 0x686   : > { %8325 = vmatmul.mubr.msk.f32.gmra.mrb[34].mxu1 %vm3535_vm5, %v11603_v13 }
 0x687   : > { %8327 = vmatprep.mubr.msk.f32.mxu1 %vm3535_vm5, %v11604_v10 }
 0x68a   : > { %8328 = vmatmul.mubr.msk.f32.gmra.mrb[36].mxu1 %vm3535_vm5, %v11567_v43 }
 0x68b   : > { %8330 = vmatprep.mubr.msk.f32.mxu1 %vm3535_vm5, %v11605_v1 }
 0x68e   : > { %8331 = vmatmul.mubr.msk.f32.gmra.mrb[38].mxu1 %vm3535_vm5, %v11606_v26 }
 0x68f   : > { %8333 = vmatprep.mubr.msk.f32.mxu1 %vm3535_vm5, %v11607_v33 }
 0x692   : > { %8334 = vmatmul.mubr.msk.f32.gmra.mrb[40].mxu1 %vm3535_vm5, %v11608_v35 }
 0x693   : > { %8336 = vmatprep.mubr.msk.f32.mxu1 %vm3535_vm5, %v11609_v3 }
 0x696   : > { %8337 = vmatmul.mubr.msk.f32.gmra.mrb[42].mxu1 %vm3535_vm5, %v11572_v56 }
 0x697   : > { %8339 = vmatprep.mubr.msk.f32.mxu1 %vm3535_vm5, %v11573_v19 }
 0x69a   : > { %8340 = vmatmul.mubr.msk.f32.gmra.mrb[44].mxu1 %vm3535_vm5, %v11574_v30 }
 0x69b   : > { %8342 = vmatprep.mubr.msk.f32.mxu1 %vm3535_vm5, %v11610_v2 }
 0x69e   : > { %8343 = vmatmul.mubr.msk.f32.gmra.mrb[46].mxu1 %vm3535_vm5, %v11611_v22 }
 0x69f   : > { %8349 = vmatprep.mubr.msk.f32.mxu1 %vm3535_vm5, %v10196_v32  ;;  %v11612_v32 = vld [vmem:[#allocation13_spill] sm:$0xff] }
 0x6a2   : > { %8350 = vmatmul.mubr.msk.f32.vlgmr.msra.gmra.mrb[16].mxu1 %vm3535_vm5, %v10203_v14  ;;  %v11613_v14 = vld [vmem:[#allocation11_spill] sm:$0xff] }
 0x6a3   : > { %8492 = vmatpush3.bf16.msra.mxu1 %v8489_v46  ;;  %8352 = vmatprep.mubr.msk.f32.mxu1 %vm3535_vm5, %v10206_v51  ;;  %v11614_v51 = vld [vmem:[#allocation41_spill] sm:$0xff] }
 0x6a6   : > { %8353 = vmatmul.mubr.msk.f32.gmra.mrb[18].mxu1 %vm3535_vm5, %v10213_v55  ;;  %v11615_v55 = vld [vmem:[#allocation18_spill] sm:$0xff] }
 0x6a7   : > { %8355 = vmatprep.mubr.msk.f32.mxu1 %vm3535_vm5, %v10216_v44  ;;  %v11616_v44 = vld [vmem:[#allocation19_spill] sm:$0xff] }
 0x6aa   : > { %8356 = vmatmul.mubr.msk.f32.gmra.mrb[20].mxu1 %vm3535_vm5, %v10223_v4  ;;  %v11617_v4 = vld [vmem:[#allocation21_spill] sm:$0xff] }
 0x6ab   : > { %8358 = vmatprep.mubr.msk.f32.mxu1 %vm3535_vm5, %v10226_v6  ;;  %v11618_v6 = vld [vmem:[#allocation12_spill] sm:$0xff] }
 0x6ae   : > { %8359 = vmatmul.mubr.msk.f32.gmra.mrb[22].mxu1 %vm3535_vm5, %v10233_v8  ;;  %v11619_v8 = vld [vmem:[#allocation9_spill] sm:$0xff] }
 0x6af   : > { %8361 = vmatprep.mubr.msk.f32.mxu1 %vm3535_vm5, %v10237_v9  ;;  %v11620_v9 = vld [vmem:[#allocation10_spill] sm:$0xff] }
 0x6b2   : > { %8362 = vmatmul.mubr.msk.f32.gmra.mrb[24].mxu1 %vm3535_vm5, %v10245_v11  ;;  %v11621_v11 = vld [vmem:[#allocation26_spill] sm:$0xff] }
 0x6b3   : > { %8364 = vmatprep.mubr.msk.f32.mxu1 %vm3535_vm5, %v10249_v24  ;;  %v11622_v24 = vld [vmem:[#allocation27_spill] sm:$0xff] }
 0x6b6   : > { %8365 = vmatmul.mubr.msk.f32.gmra.mrb[26].mxu1 %vm3535_vm5, %v10257_v25  ;;  %v11623_v25 = vld [vmem:[#allocation28_spill] sm:$0xff] }
 0x6b7   : > { %8367 = vmatprep.mubr.msk.f32.mxu1 %vm3535_vm5, %v10261_v27  ;;  %v11624_v27 = vld [vmem:[#allocation29_spill] sm:$0xff] }
 0x6ba   : > { %8368 = vmatmul.mubr.msk.f32.gmra.mrb[28].mxu1 %vm3535_vm5, %v10269_v29  ;;  %v11625_v29 = vld [vmem:[#allocation30_spill] sm:$0xff] }
 0x6bb   : > { %8370 = vmatprep.mubr.msk.f32.mxu1 %vm3535_vm5, %v10273_v31  ;;  %v11626_v31 = vld [vmem:[#allocation31_spill] sm:$0xff] }
 0x6be   : > { %8371 = vmatmul.mubr.msk.f32.gmra.mrb[30].mxu1 %vm3535_vm5, %v10281_v34  ;;  %v11627_v34 = vld [vmem:[#allocation32_spill] sm:$0xff] }
 0x6bf   : > { %8373 = vmatprep.mubr.msk.f32.mxu1 %vm3535_vm5, %v10285_v36  ;;  %v11628_v36 = vld [vmem:[#allocation33_spill] sm:$0xff] }
 0x6c2   : > { %8374 = vmatmul.mubr.msk.f32.gmra.mrb[32].mxu1 %vm3535_vm5, %v10293_v63  ;;  %v11629_v63 = vld [vmem:[#allocation34_spill] sm:$0xff] }
 0x6c3   : > { %8376 = vmatprep.mubr.msk.f32.mxu1 %vm3535_vm5, %v10297_v16  ;;  %v11630_v16 = vld [vmem:[#allocation35_spill] sm:$0xff] }
 0x6c6   : > { %8377 = vmatmul.mubr.msk.f32.gmra.mrb[34].mxu1 %vm3535_vm5, %v10305_v21  ;;  %v11631_v21 = vld [vmem:[#allocation37_spill] sm:$0xff] }
 0x6c7   : > { %8379 = vmatprep.mubr.msk.f32.mxu1 %vm3535_vm5, %v10309_v37  ;;  %v11632_v37 = vld [vmem:[#allocation47_spill] sm:$0xff] }
 0x6ca   : > { %8380 = vmatmul.mubr.msk.f32.gmra.mrb[36].mxu1 %vm3535_vm5, %v10317_v38  ;;  %v11633_v38 = vld [vmem:[#allocation24_spill] sm:$0xff] }
 0x6cb   : > { %8382 = vmatprep.mubr.msk.f32.mxu1 %vm3535_vm5, %v10321_v62  ;;  %v11634_v62 = vld [vmem:[#allocation25_spill] sm:$0xff] }
 0x6ce   : > { %8383 = vmatmul.mubr.msk.f32.gmra.mrb[38].mxu1 %vm3535_vm5, %v10329_v17  ;;  %v11635_v17 = vld [vmem:[#allocation50_spill] sm:$0xff] }
 0x6cf   : > { %8385 = vmatprep.mubr.msk.f32.mxu1 %vm3535_vm5, %v10333_v18  ;;  %v11636_v18 = vld [vmem:[#allocation51_spill] sm:$0xff] }
 0x6d2   : > { %8386 = vmatmul.mubr.msk.f32.gmra.mrb[40].mxu1 %vm3535_vm5, %v11612_v32 }
 0x6d3   : > { %8388 = vmatprep.mubr.msk.f32.mxu1 %vm3535_vm5, %v11613_v14 }
 0x6d6   : > { %8389 = vmatmul.mubr.msk.f32.gmra.mrb[42].mxu1 %vm3535_vm5, %v11614_v51 }
 0x6d7   : > { %8391 = vmatprep.mubr.msk.f32.mxu1 %vm3535_vm5, %v11615_v55 }
 0x6da   : > { %8392 = vmatmul.mubr.msk.f32.gmra.mrb[44].mxu1 %vm3535_vm5, %v11616_v44 }
 0x6db   : > { %8394 = vmatprep.mubr.msk.f32.mxu1 %vm3535_vm5, %v11617_v4 }
 0x6de   : > { %8395 = vmatmul.mubr.msk.f32.gmra.mrb[46].mxu1 %vm3535_vm5, %v11618_v6 }
 0x6df   : > { %8401 = vmatprep.mubr.msk.f32.mxu1 %vm3535_vm5, %v11578_v39 }
 0x6e2   : > { %8402 = vmatmul.mubr.msk.f32.vlgmr.msra.gmra.mrb[16].mxu1 %vm3535_vm5, %v11579_v20  ;;  %v11171_v20 = vld [vmem:[%s11219_s6] ss:$0 sm:$0xff] }
 0x6e3   : > { %8404 = vmatprep.mubr.msk.f32.mxu1 %vm3535_vm5, %v11619_v8 }
 0x6e6   : > { %8405 = vmatmul.mubr.msk.f32.gmra.mrb[18].mxu1 %vm3535_vm5, %v11620_v9 }
 0x6e7   : > { %8407 = vmatprep.mubr.msk.f32.mxu1 %vm3535_vm5, %v11621_v11 }
 0x6ea   : > { %8408 = vmatmul.mubr.msk.f32.gmra.mrb[20].mxu1 %vm3535_vm5, %v11622_v24 }
 0x6eb   : > { %8410 = vmatprep.mubr.msk.f32.mxu1 %vm3535_vm5, %v11623_v25 }
 0x6ee   : > { %8411 = vmatmul.mubr.msk.f32.gmra.mrb[22].mxu1 %vm3535_vm5, %v11624_v27 }
 0x6ef   : > { %8413 = vmatprep.mubr.msk.f32.mxu1 %vm3535_vm5, %v11625_v29 }
 0x6f2   : > { %8414 = vmatmul.mubr.msk.f32.gmra.mrb[24].mxu1 %vm3535_vm5, %v11626_v31 }
 0x6f3   : > { %8416 = vmatprep.mubr.msk.f32.mxu1 %vm3535_vm5, %v11627_v34 }
 0x6f6   : > { %8417 = vmatmul.mubr.msk.f32.gmra.mrb[26].mxu1 %vm3535_vm5, %v11628_v36 }
 0x6f7   : > { %8419 = vmatprep.mubr.msk.f32.mxu1 %vm3535_vm5, %v11629_v63 }
 0x6fa   : > { %8420 = vmatmul.mubr.msk.f32.gmra.mrb[28].mxu1 %vm3535_vm5, %v11630_v16 }
 0x6fb   : > { %8422 = vmatprep.mubr.msk.f32.mxu1 %vm3535_vm5, %v11592_v59 }
 0x6fe   : > { %8423 = vmatmul.mubr.msk.f32.gmra.mrb[30].mxu1 %vm3535_vm5, %v11631_v21 }
 0x6ff   : > { %8425 = vmatprep.mubr.msk.f32.mxu1 %vm3535_vm5, %v11594_v5 }
 0x702   : > { %8426 = vmatmul.mubr.msk.f32.gmra.mrb[32].mxu1 %vm3535_vm5, %v11595_v12 }
 0x703   : > { %8428 = vmatprep.mubr.msk.f32.mxu1 %vm3535_vm5, %v11596_v41  ;;  %v11638_v41 = vld [vmem:[#allocation6_spill] sm:$0xff] }
 0x706   : > { %8429 = vmatmul.mubr.msk.f32.gmra.mrb[34].mxu1 %vm3535_vm5, %v11597_v50  ;;  %v11637_v50 = vld [vmem:[#allocation5_spill] sm:$0xff] }
 0x707   : > { %8431 = vmatprep.mubr.msk.f32.mxu1 %vm3535_vm5, %v11632_v37 }
 0x70a   : > { %8432 = vmatmul.mubr.msk.f32.gmra.mrb[36].mxu1 %vm3535_vm5, %v11599_v7 }
 0x70b   : > { %8434 = vmatprep.mubr.msk.f32.mxu1 %vm3535_vm5, %v11633_v38 }
 0x70e   : > { %8435 = vmatmul.mubr.msk.f32.gmra.mrb[38].mxu1 %vm3535_vm5, %v11634_v62 }
 0x70f   : > { %8437 = vmatprep.mubr.msk.f32.mxu1 %vm3535_vm5, %v11635_v17 }
 0x712   : > { %8438 = vmatmul.mubr.msk.f32.gmra.mrb[40].mxu1 %vm3535_vm5, %v10745_v61 }
 0x713   : > { %8440 = vmatprep.mubr.msk.f32.mxu1 %vm3535_vm5, %v11636_v18 }
 0x716   : > { %8441 = vmatmul.mubr.msk.f32.gmra.mrb[42].mxu1 %vm3535_vm5, %v10755_v28 }
 0x717   : > { %8443 = vmatprep.mubr.msk.f32.mxu1 %vm3535_vm5, %v11601_v54 }
 0x71a   : > { %8444 = vmatmul.mubr.msk.f32.gmra.mrb[44].mxu1 %vm3535_vm5, %v11602_v49 }
 0x71b   : > { %8446 = vmatprep.mubr.msk.f32.mxu1 %vm3535_vm5, %v11637_v50 }
 0x71e   : > { %8447 = vmatmul.mubr.msk.f32.gmra.mrb[46].mxu1 %vm3535_vm5, %v11638_v41 }
 0x7b5   : > { %v8403_v40 = vpop.f32.mrb[16].mxu1 }
 0x7b6   : > { %v5850_v45 = vpop.f32.mrb[17].mxu1  ;;  %v6048_v48 = vadd.f32 %v8403_v40, %v11171_v20 }
 0x7b7   : > { %v6047_v58 = vadd.f32 %v11171_v20, %v5850_v45 }
 0x7b9   : > { %6079 = vxpose.xlu1.b32.start [1/16] (narrow) %v6047_v58, 8  ;;  %v8406_v54 = vpop.f32.mrb[18].mxu1 }
 0x7ba   : > { %v5860_v47 = vpop.f32.mrb[19].mxu1  ;;  %v6050_v57 = vadd.f32 %v8406_v54, %v11171_v20 }
 0x7bb   : > { %v6049_v60 = vadd.f32 %v11171_v20, %v5860_v47 }
 0x7bd   : > { %6080 = vxpose.xlu1.b32.cont [2/16] (narrow) %v6048_v48, 8  ;;  %v8409_v23 = vpop.f32.mrb[20].mxu1 }
 0x7be   : > { %v5870_v15 = vpop.f32.mrb[21].mxu1  ;;  %v6052_v46 = vadd.f32 %v8409_v23, %v11171_v20 }
 0x7bf   : > { %v6051_v61 = vadd.f32 %v11171_v20, %v5870_v15 }
 0x7c1   : > { %6081 = vxpose.xlu1.b32.cont [3/16] (narrow) %v6049_v60, 8  ;;  %v8412_v0 = vpop.f32.mrb[22].mxu1 }
 0x7c2   : > { %v5880_v42 = vpop.f32.mrb[23].mxu1  ;;  %v6054_v39 = vadd.f32 %v8412_v0, %v11171_v20 }
 0x7c3   : > { %v6053_v19 = vadd.f32 %v11171_v20, %v5880_v42 }
 0x7c5   : > { %6082 = vxpose.xlu1.b32.cont [4/16] (narrow) %v6050_v57, 8  ;;  %v8415_v12 = vpop.f32.mrb[24].mxu1 }
 0x7c6   : > { %v5890_v5 = vpop.f32.mrb[25].mxu1  ;;  %v6056_v35 = vadd.f32 %v8415_v12, %v11171_v20 }
 0x7c7   : > { %v6055_v13 = vadd.f32 %v11171_v20, %v5890_v5 }
 0x7c9   : > { %6083 = vxpose.xlu1.b32.cont [5/16] (narrow) %v6051_v61, 8  ;;  %v8418_v53 = vpop.f32.mrb[26].mxu1 }
 0x7ca   : > { %v5900_v52 = vpop.f32.mrb[27].mxu1  ;;  %v6058_v6 = vadd.f32 %v8418_v53, %v11171_v20 }
 0x7cb   : > { %v6057_v14 = vadd.f32 %v11171_v20, %v5900_v52 }
 0x7cd   : > { %6084 = vxpose.xlu1.b32.cont [6/16] (narrow) %v6052_v46, 8  ;;  %v8421_v28 = vpop.f32.mrb[28].mxu1 }
 0x7ce   : > { %v5910_v56 = vpop.f32.mrb[29].mxu1  ;;  %v6060_v36 = vadd.f32 %v8421_v28, %v11171_v20 }
 0x7cf   : > { %v6059_v25 = vadd.f32 %v11171_v20, %v5910_v56 }
 0x7d1   : > { %6085 = vxpose.xlu1.b32.cont [7/16] (narrow) %v6053_v19, 8  ;;  %v8424_v43 = vpop.f32.mrb[30].mxu1 }
 0x7d2   : > { %v5920_v30 = vpop.f32.mrb[31].mxu1  ;;  %v6062_v41 = vadd.f32 %v8424_v43, %v11171_v20 }
 0x7d3   : > { %v6061_v38 = vadd.f32 %v11171_v20, %v5920_v30 }
 0x7d5   : > { %6086 = vxpose.xlu1.b32.cont [8/16] (narrow) %v6054_v39, 8  ;;  %v8427_v7 = vpop.f32.mrb[32].mxu1 }
 0x7d6   : > { %v6064_v59 = vadd.f32 %v8427_v7, %v11171_v20  ;;  %v5930_v49 = vpop.f32.mrb[33].mxu1 }
 0x7d7   : > { %v6063_v10 = vadd.f32 %v11171_v20, %v5930_v49 }
 0x7d9   : > { %6087 = vxpose.xlu1.b32.cont [9/16] (narrow) %v6055_v13, 8  ;;  %v8430_v1 = vpop.f32.mrb[34].mxu1 }
 0x7da   : > { %v6066_v26 = vadd.f32 %v8430_v1, %v11171_v20  ;;  %v5940_v33 = vpop.f32.mrb[35].mxu1 }
 0x7db   : > { %v6065_v3 = vadd.f32 %v11171_v20, %v5940_v33 }
 0x7dd   : > { %6088 = vxpose.xlu1.b32.cont [10/16] (narrow) %v6056_v35, 8  ;;  %v8433_v2 = vpop.f32.mrb[36].mxu1 }
 0x7de   : > { %v6068_v22 = vadd.f32 %v8433_v2, %v11171_v20  ;;  %v5950_v32 = vpop.f32.mrb[37].mxu1 }
 0x7df   : > { %v6067_v51 = vadd.f32 %v11171_v20, %v5950_v32 }
 0x7e1   : > { %6089 = vxpose.xlu1.b32.cont [11/16] (narrow) %v6057_v14, 8  ;;  %v8436_v55 = vpop.f32.mrb[38].mxu1 }
 0x7e2   : > { %v6070_v44 = vadd.f32 %v8436_v55, %v11171_v20  ;;  %v5960_v4 = vpop.f32.mrb[39].mxu1 }
 0x7e3   : > { %v6069_v8 = vadd.f32 %v11171_v20, %v5960_v4 }
 0x7e5   : > { %6090 = vxpose.xlu1.b32.cont [12/16] (narrow) %v6058_v6, 8  ;;  %v8439_v9 = vpop.f32.mrb[40].mxu1 }
 0x7e6   : > { %v6072_v11 = vadd.f32 %v8439_v9, %v11171_v20  ;;  %v5970_v24 = vpop.f32.mrb[41].mxu1 }
 0x7e7   : > { %v6071_v27 = vadd.f32 %v11171_v20, %v5970_v24 }
 0x7e9   : > { %6091 = vxpose.xlu1.b32.cont [13/16] (narrow) %v6059_v25, 8  ;;  %v8442_v29 = vpop.f32.mrb[42].mxu1 }
 0x7ea   : > { %v6074_v31 = vadd.f32 %v8442_v29, %v11171_v20  ;;  %v5980_v34 = vpop.f32.mrb[43].mxu1 }
 0x7eb   : > { %v6073_v63 = vadd.f32 %v11171_v20, %v5980_v34 }
 0x7ed   : > { %6092 = vxpose.xlu1.b32.cont [14/16] (narrow) %v6060_v36, 8  ;;  %v8445_v16 = vpop.f32.mrb[44].mxu1 }
 0x7ee   : > { %v6076_v21 = vadd.f32 %v8445_v16, %v11171_v20  ;;  %v5990_v37 = vpop.f32.mrb[45].mxu1 }
 0x7ef   : > { %v6075_v62 = vadd.f32 %v11171_v20, %v5990_v37 }
 0x7f1   : > { %6093 = vxpose.xlu1.b32.cont [15/16] (narrow) %v6061_v38, 8  ;;  %v8448_v17 = vpop.f32.mrb[46].mxu1 }
 0x7f2   : > { %v6078_v18 = vadd.f32 %v8448_v17, %v11171_v20  ;;  %v6000_v50 = vpop.f32.mrb[47].mxu1 }
 0x7f3   : > { %v6077_v40 = vadd.f32 %v11171_v20, %v6000_v50 }
 0x7f5   : > { %6094 = vxpose.xlu1.b32.end [16/16] (narrow) %v6062_v41, 8 }
 0x7f9   : > { %6111 = vxpose.xlu1.b32.start [1/16] (narrow) %v6063_v10, 8 }
 0x7fd   : > { %6112 = vxpose.xlu1.b32.cont [2/16] (narrow) %v6064_v59, 8 }
 0x801   : > { %6113 = vxpose.xlu1.b32.cont [3/16] (narrow) %v6065_v3, 8 }
 0x805   : > { %6114 = vxpose.xlu1.b32.cont [4/16] (narrow) %v6066_v26, 8 }
 0x809   : > { %6115 = vxpose.xlu1.b32.cont [5/16] (narrow) %v6067_v51, 8 }
 0x80d   : > { %6116 = vxpose.xlu1.b32.cont [6/16] (narrow) %v6068_v22, 8 }
 0x811   : > { %6117 = vxpose.xlu1.b32.cont [7/16] (narrow) %v6069_v8, 8 }
 0x815   : > { %6118 = vxpose.xlu1.b32.cont [8/16] (narrow) %v6070_v44, 8 }
 0x819   : > { %6119 = vxpose.xlu1.b32.cont [9/16] (narrow) %v6071_v27, 8 }
 0x81d   : > { %6120 = vxpose.xlu1.b32.cont [10/16] (narrow) %v6072_v11, 8 }
 0x821   : > { %6121 = vxpose.xlu1.b32.cont [11/16] (narrow) %v6073_v63, 8 }
 0x825   : > { %6122 = vxpose.xlu1.b32.cont [12/16] (narrow) %v6074_v31, 8 }
 0x829   : > { %6123 = vxpose.xlu1.b32.cont [13/16] (narrow) %v6075_v62, 8 }
 0x82d   : > { %6124 = vxpose.xlu1.b32.cont [14/16] (narrow) %v6076_v21, 8 }
 0x831   : > { %6125 = vxpose.xlu1.b32.cont [15/16] (narrow) %v6077_v40, 8 }
 0x835   : > { %6126 = vxpose.xlu1.b32.end [16/16] (narrow) %v6078_v18, 8 }
 0x839   : > { %v6095_v45 = vpop.trf.xlu1 }
 0x879   : > { %v6127_v20 = vpop.trf.xlu1 }
 0x87a   : > { %v6145_v58 = vcombine.low %v6095_v45, %v6127_v20 }
 0x87c   : > { %6147 = vst [vmem:[%s278_s9] sm:$0xff] %v6145_v58 }
 0x87d PF: > { %s17_s24 = sadd.s32 1, %s9025_s24  }
 0x87e   : > { %p14_p4 = scmp.ge.s32.totalorder %s17_s24, 4  }
 0x880   :  { %16 = sbr.rel (!%p14_p4) target bundleno = 1 (0x1), region = 78 }

</bundles_post_ra>
